<compile_context>
chip_gen: v7x
topology: tpu7x:2x2x1
jax: 0.10.0
libtpu: 0.0.40
codegen_flags: <defaults>
</compile_context>

<pallas_src>
import jax
import jax.numpy as jnp
from jax.experimental import pallas as pl
from jax.experimental.pallas import tpu as pltpu

LATENT_DIM = 100
LATENT_PAD = 128          # lane-aligned latent dim (zero-padded in-kernel)
IMG_SIZE = 28 * 28        # 784
IMG_PAD = 896             # 7 * 128, lane-aligned output dim (zero-padded cols)
OUT_BLOCK = 128           # streamed w4 / output column block
HIDDEN = (256, 512, 1024)
LRELU_SLOPE = 0.2
BN_EPS = 1e-5


def _linear_lrelu_bn(x_bf16, w_ref, bn_ref):
    """Linear (bf16 MXU, f32 acc) -> LeakyReLU -> training-mode BatchNorm1d.

    bn_ref is a packed (3, N) f32 array: row 0 = linear bias, row 1 = gamma,
    row 2 = beta. Uses one-pass variance and a fused scale/shift apply.
    """
    p = bn_ref[...]                                              # (3, N) f32
    h = jnp.dot(x_bf16, w_ref[...],
                preferred_element_type=jnp.float32) + p[0:1, :]  # + bias
    h = jnp.where(h > 0, h, LRELU_SLOPE * h)                     # LeakyReLU
    mean = jnp.mean(h, axis=0, keepdims=True)
    var = jnp.mean(h * h, axis=0, keepdims=True) - mean * mean   # biased var
    scale = p[1:2, :] * jax.lax.rsqrt(var + BN_EPS)              # gamma/std
    shift = p[2:3, :] - mean * scale                             # beta - m*s
    return h * scale + shift


def generator_kernel(
    z_ref,
    w1_ref, bn1_ref,
    w2_ref, bn2_ref,
    w3_ref, bn3_ref,
    w4_ref, b4_ref,
    o_ref,
    zp_ref, h3_ref,
):
    # Layers 1-3 run once; their result is carried across the output-column
    # grid axis in a bf16 VMEM scratch.
    @pl.when(pl.program_id(0) == 0)
    def _():
        # Zero-pad the latent to a lane-aligned width inside the kernel
        # (padded w1 rows are zero, so the extra lanes contribute nothing).
        zp_ref[...] = jnp.zeros_like(zp_ref)
        zp_ref[:, :LATENT_DIM] = z_ref[...]

        h = _linear_lrelu_bn(zp_ref[...].astype(jnp.bfloat16), w1_ref, bn1_ref)
        h = _linear_lrelu_bn(h.astype(jnp.bfloat16), w2_ref, bn2_ref)
        h = _linear_lrelu_bn(h.astype(jnp.bfloat16), w3_ref, bn3_ref)
        h3_ref[...] = h.astype(jnp.bfloat16)

    # Streamed output layer: one 128-wide column block of Linear(1024->896pad)
    # + Tanh per grid step (w4 block DMA overlaps the j==0 compute and the
    # previous step's matmul/stores).
    out = jnp.dot(h3_ref[...], w4_ref[...],
                  preferred_element_type=jnp.float32) + b4_ref[...]
    o_ref[...] = jnp.tanh(out)


def init_params(key, latent_dim=LATENT_DIM, img_size=IMG_SIZE, hidden=HIDDEN):
    """Logical parameters (f32, unpadded), PyTorch-style uniform +-1/sqrt(fan_in)."""
    dims = (latent_dim,) + tuple(hidden) + (img_size,)
    params = {}
    for i in range(len(dims) - 1):
        fan_in, fan_out = dims[i], dims[i + 1]
        key, kw, kb = jax.random.split(key, 3)
        bound = 1.0 / jnp.sqrt(float(fan_in))
        # stored as [in, out] (transposed relative to PyTorch's [out, in])
        params[f"w{i+1}"] = jax.random.uniform(
            kw, (fan_in, fan_out), jnp.float32, -bound, bound)
        params[f"b{i+1}"] = jax.random.uniform(
            kb, (1, fan_out), jnp.float32, -bound, bound)
    # BatchNorm affine params (PyTorch init: gamma=1, beta=0) for hidden layers
    for i, h in enumerate(hidden):
        params[f"g{i+1}"] = jnp.ones((1, h), jnp.float32)
        params[f"be{i+1}"] = jnp.zeros((1, h), jnp.float32)
    return params


def prepare_params(params):
    """Pad to lane-aligned shapes, cast weights to bf16, pack per-layer
    (bias, gamma, beta) into single (3, N) arrays (done once, outside jit)."""
    p = {}
    p["w1"] = jnp.pad(
        params["w1"], ((0, LATENT_PAD - LATENT_DIM), (0, 0))).astype(jnp.bfloat16)
    p["w2"] = params["w2"].astype(jnp.bfloat16)
    p["w3"] = params["w3"].astype(jnp.bfloat16)
    p["w4"] = jnp.pad(
        params["w4"], ((0, 0), (0, IMG_PAD - IMG_SIZE))).astype(jnp.bfloat16)
    p["b4"] = jnp.pad(params["b4"], ((0, 0), (0, IMG_PAD - IMG_SIZE)))
    for i in range(1, 4):
        p[f"bn{i}"] = jnp.concatenate(
            [params[f"b{i}"], params[f"g{i}"], params[f"be{i}"]], axis=0)
    return p


@jax.jit
def generator_forward(z, prepared):
    B = z.shape[0]
    pinned = lambda shape: pl.BlockSpec(shape, lambda j: (0, 0))

    in_specs = [
        pinned((B, LATENT_DIM)),                 # z (full array, unpadded)
        pinned((LATENT_PAD, HIDDEN[0])),         # w1
        pinned((3, HIDDEN[0])),                  # bn1 (bias, gamma, beta)
        pinned((HIDDEN[0], HIDDEN[1])),          # w2
        pinned((3, HIDDEN[1])),                  # bn2
        pinned((HIDDEN[1], HIDDEN[2])),          # w3
        pinned((3, HIDDEN[2])),                  # bn3
        pl.BlockSpec((HIDDEN[2], OUT_BLOCK), lambda j: (0, j)),   # w4 (streamed)
        pl.BlockSpec((1, OUT_BLOCK), lambda j: (0, j)),           # b4 (streamed)
    ]

    out = pl.pallas_call(
        generator_kernel,
        out_shape=jax.ShapeDtypeStruct((B, IMG_PAD), jnp.float32),
        grid_spec=pltpu.PrefetchScalarGridSpec(
            num_scalar_prefetch=0,
            grid=(IMG_PAD // OUT_BLOCK,),
            in_specs=in_specs,
            out_specs=pl.BlockSpec((B, OUT_BLOCK), lambda j: (0, j)),
            scratch_shapes=[
                pltpu.VMEM((B, LATENT_PAD), z.dtype),        # padded latent
                pltpu.VMEM((B, HIDDEN[2]), jnp.bfloat16),    # h3 carry
            ],
        ),
        compiler_params=pltpu.CompilerParams(
            dimension_semantics=("arbitrary",),
            vmem_limit_bytes=32 << 20,
        ),
    )(z,
      prepared["w1"], prepared["bn1"],
      prepared["w2"], prepared["bn2"],
      prepared["w3"], prepared["bn3"],
      prepared["w4"], prepared["b4"])
    return out[:, :IMG_SIZE]


def generator_forward_ref(z, params):
    """Pure-JAX reference with matching precision (bf16 MXU inputs, f32 acc)."""
    def dot(x, w, b):
        return jnp.dot(x.astype(jnp.bfloat16), w.astype(jnp.bfloat16),
                       preferred_element_type=jnp.float32) + b

    def lrelu(x):
        return jnp.where(x > 0, x, LRELU_SLOPE * x)

    def bn(x, gamma, beta):
        mean = jnp.mean(x, axis=0, keepdims=True)
        var = jnp.mean((x - mean) * (x - mean), axis=0, keepdims=True)
        return (x - mean) * jax.lax.rsqrt(var + BN_EPS) * gamma + beta

    h = bn(lrelu(dot(z, params["w1"], params["b1"])), params["g1"], params["be1"])
    h = bn(lrelu(dot(h, params["w2"], params["b2"])), params["g2"], params["be2"])
    h = bn(lrelu(dot(h, params["w3"], params["b3"])), params["g3"], params["be3"])
    return jnp.tanh(dot(h, params["w4"], params["b4"]))


if __name__ == "__main__":
    key = jax.random.PRNGKey(0)
    key, kz = jax.random.split(key)

    B = 8  # small batch (BatchNorm is over the full batch in one invocation)
    z = jax.random.normal(kz, (B, LATENT_DIM), jnp.float32)
    params = init_params(key)
    prepared = prepare_params(params)

    out = generator_forward(z, prepared)
    out = jax.block_until_ready(out)

    ref = generator_forward_ref(z, params)
    assert out.shape == (B, IMG_SIZE), out.shape
    assert jnp.allclose(out, ref, atol=2e-2, rtol=2e-2), \
        float(jnp.max(jnp.abs(out - ref)))

    print("KERNEL_OK")
</pallas_src>

<mosaic_0001>
module attributes {stable_mosaic.version = 11 : i64} {
  func.func @generator_kernel(%arg0: i32, %arg1: memref<8x100xf32, #tpu.memory_space<vmem>>, %arg2: memref<128x256xbf16, #tpu.memory_space<vmem>>, %arg3: memref<3x256xf32, #tpu.memory_space<vmem>>, %arg4: memref<256x512xbf16, #tpu.memory_space<vmem>>, %arg5: memref<3x512xf32, #tpu.memory_space<vmem>>, %arg6: memref<512x1024xbf16, #tpu.memory_space<vmem>>, %arg7: memref<3x1024xf32, #tpu.memory_space<vmem>>, %arg8: memref<1024x128xbf16, #tpu.memory_space<vmem>>, %arg9: memref<1x128xf32, #tpu.memory_space<vmem>>, %arg10: memref<8x128xf32, #tpu.memory_space<vmem>>, %arg11: memref<8x128xf32, #tpu.memory_space<vmem>>, %arg12: memref<8x1024xbf16, #tpu.memory_space<vmem>>) attributes {dimension_semantics = [#tpu.dimension_semantics<arbitrary>], iteration_bounds = array<i64: 7>, scalar_prefetch = 0 : i64, scratch_operands = 2 : i64, tpu.core_type = #tpu.core_type<tc>, window_params = [{pipeline_mode = #tpu.pipeline_mode<synchronous>, transform_indices = @transform_0, window_bounds = array<i64: 8, 100>}, {pipeline_mode = #tpu.pipeline_mode<synchronous>, transform_indices = @transform_1, window_bounds = array<i64: 128, 256>}, {pipeline_mode = #tpu.pipeline_mode<synchronous>, transform_indices = @transform_2, window_bounds = array<i64: 3, 256>}, {pipeline_mode = #tpu.pipeline_mode<synchronous>, transform_indices = @transform_3, window_bounds = array<i64: 256, 512>}, {pipeline_mode = #tpu.pipeline_mode<synchronous>, transform_indices = @transform_4, window_bounds = array<i64: 3, 512>}, {pipeline_mode = #tpu.pipeline_mode<synchronous>, transform_indices = @transform_5, window_bounds = array<i64: 512, 1024>}, {pipeline_mode = #tpu.pipeline_mode<synchronous>, transform_indices = @transform_6, window_bounds = array<i64: 3, 1024>}, {transform_indices = @transform_7, window_bounds = array<i64: 1024, 128>}, {transform_indices = @transform_8, window_bounds = array<i64: 1, 128>}, {transform_indices = @transform_9, window_bounds = array<i64: 8, 128>}]} {
    %c0_i32 = arith.constant 0 : i32
    %0 = arith.cmpi eq, %arg0, %c0_i32 : i32
    %1 = arith.extui %0 : i1 to i32
    %c0_i32_0 = arith.constant 0 : i32
    %2 = arith.cmpi ne, %1, %c0_i32_0 : i32
    scf.if %2 {
      %cst_8 = arith.constant 0.000000e+00 : f32
      %11 = vector.broadcast %cst_8 : f32 to vector<8x128xf32>
      %c0_9 = arith.constant 0 : index
      %c0_10 = arith.constant 0 : index
      %12 = vector.load %arg11[%c0_9, %c0_10] : memref<8x128xf32, #tpu.memory_space<vmem>>, vector<8x128xf32>
      tpu.vector_store %arg11[%c0_9, %c0_10], %11 {strides = array<i32>} : memref<8x128xf32, #tpu.memory_space<vmem>>, vector<8x128xf32>,
      %c0_11 = arith.constant 0 : index
      %c0_12 = arith.constant 0 : index
      %13 = vector.load %arg1[%c0_11, %c0_12] : memref<8x100xf32, #tpu.memory_space<vmem>>, vector<8x100xf32>
      %c0_13 = arith.constant 0 : index
      %c0_14 = arith.constant 0 : index
      %14 = vector.load %arg11[%c0_13, %c0_14] : memref<8x128xf32, #tpu.memory_space<vmem>>, vector<8x100xf32>
      tpu.vector_store %arg11[%c0_13, %c0_14], %13 {strides = array<i32>} : memref<8x128xf32, #tpu.memory_space<vmem>>, vector<8x100xf32>,
      %c0_15 = arith.constant 0 : index
      %c0_16 = arith.constant 0 : index
      %15 = vector.load %arg11[%c0_15, %c0_16] : memref<8x128xf32, #tpu.memory_space<vmem>>, vector<8x128xf32>
      %16 = arith.truncf %15 : vector<8x128xf32> to vector<8x128xbf16>
      %c0_17 = arith.constant 0 : index
      %c0_18 = arith.constant 0 : index
      %17 = vector.load %arg3[%c0_17, %c0_18] : memref<3x256xf32, #tpu.memory_space<vmem>>, vector<3x256xf32>
      %c0_19 = arith.constant 0 : index
      %c0_20 = arith.constant 0 : index
      %18 = vector.load %arg2[%c0_19, %c0_20] : memref<128x256xbf16, #tpu.memory_space<vmem>>, vector<128x256xbf16>
      %cst_21 = arith.constant dense<0.000000e+00> : vector<8x256xf32>
      %19 = tpu.matmul %16, %18, %cst_21 {dimension_numbers = #tpu.dot_dimension_numbers<[1], [0], [0], [1], [0, 0, 1, 1], [], []>} : vector<8x128xbf16>, vector<128x256xbf16>, vector<8x256xf32> -> vector<8x256xf32>
      %20 = vector.extract_strided_slice %17 {offsets = [0, 0], sizes = [1, 256], strides = [1, 1]} : vector<3x256xf32> to vector<1x256xf32>
      %21 = vector.broadcast %20 : vector<1x256xf32> to vector<8x256xf32>
      %22 = arith.addf %19, %21 : vector<8x256xf32>
      %cst_22 = arith.constant 0.000000e+00 : f32
      %23 = vector.broadcast %cst_22 : f32 to vector<8x256xf32>
      %24 = arith.cmpf ogt, %22, %23 : vector<8x256xf32>
      %cst_23 = arith.constant 2.000000e-01 : f32
      %25 = vector.broadcast %cst_23 : f32 to vector<8x256xf32>
      %26 = arith.mulf %25, %22 : vector<8x256xf32>
      %27 = arith.select %24, %22, %26 : vector<8x256xi1>, vector<8x256xf32>
      %cst_24 = arith.constant dense<0.000000e+00> : vector<256xf32>
      %28 = vector.multi_reduction <add>, %27, %cst_24 [0] : vector<8x256xf32> to vector<256xf32>
      %29 = vector.shape_cast %28 : vector<256xf32> to vector<1x256xf32>
      %cst_25 = arith.constant 8.000000e+00 : f32
      %30 = vector.broadcast %cst_25 : f32 to vector<1x256xf32>
      %31 = arith.divf %29, %30 : vector<1x256xf32>
      %32 = arith.mulf %27, %27 : vector<8x256xf32>
      %cst_26 = arith.constant dense<0.000000e+00> : vector<256xf32>
      %33 = vector.multi_reduction <add>, %32, %cst_26 [0] : vector<8x256xf32> to vector<256xf32>
      %34 = vector.shape_cast %33 : vector<256xf32> to vector<1x256xf32>
      %cst_27 = arith.constant 8.000000e+00 : f32
      %35 = vector.broadcast %cst_27 : f32 to vector<1x256xf32>
      %36 = arith.divf %34, %35 : vector<1x256xf32>
      %37 = arith.mulf %31, %31 : vector<1x256xf32>
      %38 = arith.subf %36, %37 : vector<1x256xf32>
      %39 = vector.extract_strided_slice %17 {offsets = [1, 0], sizes = [1, 256], strides = [1, 1]} : vector<3x256xf32> to vector<1x256xf32>
      %cst_28 = arith.constant 9.99999974E-6 : f32
      %40 = vector.broadcast %cst_28 : f32 to vector<1x256xf32>
      %41 = arith.addf %38, %40 : vector<1x256xf32>
      %42 = math.rsqrt %41 : vector<1x256xf32>
      %43 = arith.mulf %39, %42 : vector<1x256xf32>
      %44 = vector.extract_strided_slice %17 {offsets = [2, 0], sizes = [1, 256], strides = [1, 1]} : vector<3x256xf32> to vector<1x256xf32>
      %45 = arith.mulf %31, %43 : vector<1x256xf32>
      %46 = arith.subf %44, %45 : vector<1x256xf32>
      %47 = vector.broadcast %43 : vector<1x256xf32> to vector<8x256xf32>
      %48 = arith.mulf %27, %47 : vector<8x256xf32>
      %49 = vector.broadcast %46 : vector<1x256xf32> to vector<8x256xf32>
      %50 = arith.addf %48, %49 : vector<8x256xf32>
      %51 = arith.truncf %50 : vector<8x256xf32> to vector<8x256xbf16>
      %c0_29 = arith.constant 0 : index
      %c0_30 = arith.constant 0 : index
      %52 = vector.load %arg5[%c0_29, %c0_30] : memref<3x512xf32, #tpu.memory_space<vmem>>, vector<3x512xf32>
      %c0_31 = arith.constant 0 : index
      %c0_32 = arith.constant 0 : index
      %53 = vector.load %arg4[%c0_31, %c0_32] : memref<256x512xbf16, #tpu.memory_space<vmem>>, vector<256x512xbf16>
      %cst_33 = arith.constant dense<0.000000e+00> : vector<8x512xf32>
      %54 = tpu.matmul %51, %53, %cst_33 {dimension_numbers = #tpu.dot_dimension_numbers<[1], [0], [0], [1], [0, 0, 1, 1], [], []>} : vector<8x256xbf16>, vector<256x512xbf16>, vector<8x512xf32> -> vector<8x512xf32>
      %55 = vector.extract_strided_slice %52 {offsets = [0, 0], sizes = [1, 512], strides = [1, 1]} : vector<3x512xf32> to vector<1x512xf32>
      %56 = vector.broadcast %55 : vector<1x512xf32> to vector<8x512xf32>
      %57 = arith.addf %54, %56 : vector<8x512xf32>
      %cst_34 = arith.constant 0.000000e+00 : f32
      %58 = vector.broadcast %cst_34 : f32 to vector<8x512xf32>
      %59 = arith.cmpf ogt, %57, %58 : vector<8x512xf32>
      %cst_35 = arith.constant 2.000000e-01 : f32
      %60 = vector.broadcast %cst_35 : f32 to vector<8x512xf32>
      %61 = arith.mulf %60, %57 : vector<8x512xf32>
      %62 = arith.select %59, %57, %61 : vector<8x512xi1>, vector<8x512xf32>
      %cst_36 = arith.constant dense<0.000000e+00> : vector<512xf32>
      %63 = vector.multi_reduction <add>, %62, %cst_36 [0] : vector<8x512xf32> to vector<512xf32>
      %64 = vector.shape_cast %63 : vector<512xf32> to vector<1x512xf32>
      %cst_37 = arith.constant 8.000000e+00 : f32
      %65 = vector.broadcast %cst_37 : f32 to vector<1x512xf32>
      %66 = arith.divf %64, %65 : vector<1x512xf32>
      %67 = arith.mulf %62, %62 : vector<8x512xf32>
      %cst_38 = arith.constant dense<0.000000e+00> : vector<512xf32>
      %68 = vector.multi_reduction <add>, %67, %cst_38 [0] : vector<8x512xf32> to vector<512xf32>
      %69 = vector.shape_cast %68 : vector<512xf32> to vector<1x512xf32>
      %cst_39 = arith.constant 8.000000e+00 : f32
      %70 = vector.broadcast %cst_39 : f32 to vector<1x512xf32>
      %71 = arith.divf %69, %70 : vector<1x512xf32>
      %72 = arith.mulf %66, %66 : vector<1x512xf32>
      %73 = arith.subf %71, %72 : vector<1x512xf32>
      %74 = vector.extract_strided_slice %52 {offsets = [1, 0], sizes = [1, 512], strides = [1, 1]} : vector<3x512xf32> to vector<1x512xf32>
      %cst_40 = arith.constant 9.99999974E-6 : f32
      %75 = vector.broadcast %cst_40 : f32 to vector<1x512xf32>
      %76 = arith.addf %73, %75 : vector<1x512xf32>
      %77 = math.rsqrt %76 : vector<1x512xf32>
      %78 = arith.mulf %74, %77 : vector<1x512xf32>
      %79 = vector.extract_strided_slice %52 {offsets = [2, 0], sizes = [1, 512], strides = [1, 1]} : vector<3x512xf32> to vector<1x512xf32>
      %80 = arith.mulf %66, %78 : vector<1x512xf32>
      %81 = arith.subf %79, %80 : vector<1x512xf32>
      %82 = vector.broadcast %78 : vector<1x512xf32> to vector<8x512xf32>
      %83 = arith.mulf %62, %82 : vector<8x512xf32>
      %84 = vector.broadcast %81 : vector<1x512xf32> to vector<8x512xf32>
      %85 = arith.addf %83, %84 : vector<8x512xf32>
      %86 = arith.truncf %85 : vector<8x512xf32> to vector<8x512xbf16>
      %c0_41 = arith.constant 0 : index
      %c0_42 = arith.constant 0 : index
      %87 = vector.load %arg7[%c0_41, %c0_42] : memref<3x1024xf32, #tpu.memory_space<vmem>>, vector<3x1024xf32>
      %c0_43 = arith.constant 0 : index
      %c0_44 = arith.constant 0 : index
      %88 = vector.load %arg6[%c0_43, %c0_44] : memref<512x1024xbf16, #tpu.memory_space<vmem>>, vector<512x1024xbf16>
      %cst_45 = arith.constant dense<0.000000e+00> : vector<8x1024xf32>
      %89 = tpu.matmul %86, %88, %cst_45 {dimension_numbers = #tpu.dot_dimension_numbers<[1], [0], [0], [1], [0, 0, 1, 1], [], []>} : vector<8x512xbf16>, vector<512x1024xbf16>, vector<8x1024xf32> -> vector<8x1024xf32>
      %90 = vector.extract_strided_slice %87 {offsets = [0, 0], sizes = [1, 1024], strides = [1, 1]} : vector<3x1024xf32> to vector<1x1024xf32>
      %91 = vector.broadcast %90 : vector<1x1024xf32> to vector<8x1024xf32>
      %92 = arith.addf %89, %91 : vector<8x1024xf32>
      %cst_46 = arith.constant 0.000000e+00 : f32
      %93 = vector.broadcast %cst_46 : f32 to vector<8x1024xf32>
      %94 = arith.cmpf ogt, %92, %93 : vector<8x1024xf32>
      %cst_47 = arith.constant 2.000000e-01 : f32
      %95 = vector.broadcast %cst_47 : f32 to vector<8x1024xf32>
      %96 = arith.mulf %95, %92 : vector<8x1024xf32>
      %97 = arith.select %94, %92, %96 : vector<8x1024xi1>, vector<8x1024xf32>
      %cst_48 = arith.constant dense<0.000000e+00> : vector<1024xf32>
      %98 = vector.multi_reduction <add>, %97, %cst_48 [0] : vector<8x1024xf32> to vector<1024xf32>
      %99 = vector.shape_cast %98 : vector<1024xf32> to vector<1x1024xf32>
      %cst_49 = arith.constant 8.000000e+00 : f32
      %100 = vector.broadcast %cst_49 : f32 to vector<1x1024xf32>
      %101 = arith.divf %99, %100 : vector<1x1024xf32>
      %102 = arith.mulf %97, %97 : vector<8x1024xf32>
      %cst_50 = arith.constant dense<0.000000e+00> : vector<1024xf32>
      %103 = vector.multi_reduction <add>, %102, %cst_50 [0] : vector<8x1024xf32> to vector<1024xf32>
      %104 = vector.shape_cast %103 : vector<1024xf32> to vector<1x1024xf32>
      %cst_51 = arith.constant 8.000000e+00 : f32
      %105 = vector.broadcast %cst_51 : f32 to vector<1x1024xf32>
      %106 = arith.divf %104, %105 : vector<1x1024xf32>
      %107 = arith.mulf %101, %101 : vector<1x1024xf32>
      %108 = arith.subf %106, %107 : vector<1x1024xf32>
      %109 = vector.extract_strided_slice %87 {offsets = [1, 0], sizes = [1, 1024], strides = [1, 1]} : vector<3x1024xf32> to vector<1x1024xf32>
      %cst_52 = arith.constant 9.99999974E-6 : f32
      %110 = vector.broadcast %cst_52 : f32 to vector<1x1024xf32>
      %111 = arith.addf %108, %110 : vector<1x1024xf32>
      %112 = math.rsqrt %111 : vector<1x1024xf32>
      %113 = arith.mulf %109, %112 : vector<1x1024xf32>
      %114 = vector.extract_strided_slice %87 {offsets = [2, 0], sizes = [1, 1024], strides = [1, 1]} : vector<3x1024xf32> to vector<1x1024xf32>
      %115 = arith.mulf %101, %113 : vector<1x1024xf32>
      %116 = arith.subf %114, %115 : vector<1x1024xf32>
      %117 = vector.broadcast %113 : vector<1x1024xf32> to vector<8x1024xf32>
      %118 = arith.mulf %97, %117 : vector<8x1024xf32>
      %119 = vector.broadcast %116 : vector<1x1024xf32> to vector<8x1024xf32>
      %120 = arith.addf %118, %119 : vector<8x1024xf32>
      %121 = arith.truncf %120 : vector<8x1024xf32> to vector<8x1024xbf16>
      %c0_53 = arith.constant 0 : index
      %c0_54 = arith.constant 0 : index
      %122 = vector.load %arg12[%c0_53, %c0_54] : memref<8x1024xbf16, #tpu.memory_space<vmem>>, vector<8x1024xbf16>
      tpu.vector_store %arg12[%c0_53, %c0_54], %121 {strides = array<i32>} : memref<8x1024xbf16, #tpu.memory_space<vmem>>, vector<8x1024xbf16>,
    } else {
    }
    %c0 = arith.constant 0 : index
    %c0_1 = arith.constant 0 : index
    %3 = vector.load %arg12[%c0, %c0_1] : memref<8x1024xbf16, #tpu.memory_space<vmem>>, vector<8x1024xbf16>
    %c0_2 = arith.constant 0 : index
    %c0_3 = arith.constant 0 : index
    %4 = vector.load %arg8[%c0_2, %c0_3] : memref<1024x128xbf16, #tpu.memory_space<vmem>>, vector<1024x128xbf16>
    %cst = arith.constant dense<0.000000e+00> : vector<8x128xf32>
    %5 = tpu.matmul %3, %4, %cst {dimension_numbers = #tpu.dot_dimension_numbers<[1], [0], [0], [1], [0, 0, 1, 1], [], []>} : vector<8x1024xbf16>, vector<1024x128xbf16>, vector<8x128xf32> -> vector<8x128xf32>
    %c0_4 = arith.constant 0 : index
    %c0_5 = arith.constant 0 : index
    %6 = vector.load %arg9[%c0_4, %c0_5] : memref<1x128xf32, #tpu.memory_space<vmem>>, vector<1x128xf32>
    %7 = vector.broadcast %6 : vector<1x128xf32> to vector<8x128xf32>
    %8 = arith.addf %5, %7 : vector<8x128xf32>
    %9 = math.tanh %8 : vector<8x128xf32>
    %c0_6 = arith.constant 0 : index
    %c0_7 = arith.constant 0 : index
    %10 = vector.load %arg10[%c0_6, %c0_7] : memref<8x128xf32, #tpu.memory_space<vmem>>, vector<8x128xf32>
    tpu.vector_store %arg10[%c0_6, %c0_7], %9 {strides = array<i32>} : memref<8x128xf32, #tpu.memory_space<vmem>>, vector<8x128xf32>,
    return
  }
  func.func @transform_0(%arg0: i32) -> (i32, i32) {
    %c0_i32 = arith.constant 0 : i32
    %c0_i32_0 = arith.constant 0 : i32
    %c0_i32_1 = arith.constant 0 : i32
    return %c0_i32, %c0_i32_0 : i32, i32
  }
  func.func @transform_1(%arg0: i32) -> (i32, i32) {
    %c0_i32 = arith.constant 0 : i32
    %c0_i32_0 = arith.constant 0 : i32
    %c0_i32_1 = arith.constant 0 : i32
    return %c0_i32, %c0_i32_0 : i32, i32
  }
  func.func @transform_2(%arg0: i32) -> (i32, i32) {
    %c0_i32 = arith.constant 0 : i32
    %c0_i32_0 = arith.constant 0 : i32
    %c0_i32_1 = arith.constant 0 : i32
    return %c0_i32, %c0_i32_0 : i32, i32
  }
  func.func @transform_3(%arg0: i32) -> (i32, i32) {
    %c0_i32 = arith.constant 0 : i32
    %c0_i32_0 = arith.constant 0 : i32
    %c0_i32_1 = arith.constant 0 : i32
    return %c0_i32, %c0_i32_0 : i32, i32
  }
  func.func @transform_4(%arg0: i32) -> (i32, i32) {
    %c0_i32 = arith.constant 0 : i32
    %c0_i32_0 = arith.constant 0 : i32
    %c0_i32_1 = arith.constant 0 : i32
    return %c0_i32, %c0_i32_0 : i32, i32
  }
  func.func @transform_5(%arg0: i32) -> (i32, i32) {
    %c0_i32 = arith.constant 0 : i32
    %c0_i32_0 = arith.constant 0 : i32
    %c0_i32_1 = arith.constant 0 : i32
    return %c0_i32, %c0_i32_0 : i32, i32
  }
  func.func @transform_6(%arg0: i32) -> (i32, i32) {
    %c0_i32 = arith.constant 0 : i32
    %c0_i32_0 = arith.constant 0 : i32
    %c0_i32_1 = arith.constant 0 : i32
    return %c0_i32, %c0_i32_0 : i32, i32
  }
  func.func @transform_7(%arg0: i32) -> (i32, i32) {
    %c0_i32 = arith.constant 0 : i32
    %c0_i32_0 = arith.constant 0 : i32
    return %c0_i32, %arg0 : i32, i32
  }
  func.func @transform_8(%arg0: i32) -> (i32, i32) {
    %c0_i32 = arith.constant 0 : i32
    %c0_i32_0 = arith.constant 0 : i32
    return %c0_i32, %arg0 : i32, i32
  }
  func.func @transform_9(%arg0: i32) -> (i32, i32) {
    %c0_i32 = arith.constant 0 : i32
    %c0_i32_0 = arith.constant 0 : i32
    return %c0_i32, %arg0 : i32, i32
  }
}

</mosaic_0001>

<bundles_post_ra>
// kernel: generator_forward.1
= control target key start
LH: loop header
LB: loop body
LE: loop exit
PB: predicated region body
PF: predicated region fallthrough
CT: control target
= control target key end

     0   :  { %s6799_s0 = inlined_call_operand.hbm [shape: f32[8,100], index: 0, kind: input, shape index: {}]   ;;  %s6800_s1 = inlined_call_operand.hbm [shape: bf16[128,256], index: 1, kind: input, shape index: {}]   ;;  %s6801_s2 = inlined_call_operand.hbm [shape: f32[3,256], index: 2, kind: input, shape index: {}]   ;;  %s6802_s3 = inlined_call_operand.hbm [shape: bf16[256,512], index: 3, kind: input, shape index: {}]   ;;  %s6803_s4 = inlined_call_operand.hbm [shape: f32[3,512], index: 4, kind: input, shape index: {}]   ;;  %s6804_s5 = inlined_call_operand.hbm [shape: bf16[512,1024], index: 5, kind: input, shape index: {}]   ;;  %s6805_s6 = inlined_call_operand.hbm [shape: f32[3,1024], index: 6, kind: input, shape index: {}]   ;;  %s6806_s7 = inlined_call_operand.hbm [shape: bf16[1024,896], index: 7, kind: input, shape index: {}]   ;;  %s6807_s8 = inlined_call_operand.hbm [shape: f32[1,896], index: 8, kind: input, shape index: {}]   ;;  %s6808_s9 = inlined_call_operand.hbm [shape: f32[8,896], index: 9, kind: output, shape index: {}]  }
   0x1   :  { %6824 = sst [smem:[#allocation30_spill]] %s6800_s1 }
   0x2   :  { %6825 = sst [smem:[#allocation31_spill]] %s6802_s3 }
   0x3   :  { %6826 = sst [smem:[#allocation32_spill]] %s6804_s5 }
   0x4   :  { %6827 = sst [smem:[#allocation33_spill]] %s6806_s7 }
   0x5   :  { %6828 = sst [smem:[#allocation34_spill]] %s6808_s9 }
   0x6   :  { %14 = vsyncpa [#allocation5], 0 }
   0x7   :  { %15 = vsyncpa [#allocation8], 0 }
   0x8   :  { %16 = vsyncpa [#allocation11], 0 }
   0x9   :  { %17 = vsyncpa [#allocation14], 0 }
   0xa   :  { %18 = vsyncpa [#allocation17], 0 }
   0xb   :  { %20 = vsyncpa [#allocation17 + $0x1], 0 }
   0xc   :  { %21 = vsyncpa [#allocation6], 0 }
   0xd   :  { %23 = vsyncpa [#allocation6 + $0x1], 0  ;;  %s6042_s30 = smov 0   ;;  %s6044_s10 = smov 0  }
   0xe   :  { %s6046_s11 = smov 0   ;;  %s6048_s12 = smov 0  }
   0xf LB: > { %6829 = sst [smem:[#allocation26_spill]] %s5957_s30  ;;  %s5971_s13 = smov [#allocation7]   ;;  %s5969_s12 = sphi %s6048_s12, %s6866_s12   ;;  %s5965_s11 = sphi %s6046_s11, %s6870_s11   ;;  %s5961_s10 = sphi %s6044_s10, %s6869_s10   ;;  %s5957_s30 = sphi %s6042_s30, %s6868_s30  }
  0x10   : > { %s282_s14 = sshll.u32 %s5971_s13, 4  ;;  %s6063_s15 = sadd.s32 4294967295, %s5969_s12   ;;  %s6069_s14 = int_to_ptr.vmem [resolvable:$true] %s282_s14 }
  0x11   : > { %p4720_p0 = scmp.ge.s32.totalorder %s5969_s12, 1  ;;  %p6810_p1 = scmp.eq.s32.totalorder %s6063_s15, 0 }
  0x12   : > { %p259_p2 = scmp.lt.s32.totalorder %s5969_s12, 8  ;;  %s5972_s17 = smov [#allocation10]  }
  0x13   : > { %s306_s18 = sshll.u32 %s5972_s17, 4  ;;  %s5973_s20 = smov [#allocation13]   ;;  %s6083_s18 = int_to_ptr.vmem [resolvable:$true] %s306_s18 }
  0x14   : > { %p6071_p4 = pnand %p4720_p0, %p259_p2  ;;  %s6085_s21 = sshll.u32 %s5973_s20, 4  ;;  %s331_s21 = int_to_ptr.vmem [resolvable:$true] %s6085_s21 }
  0x15   : > { %s6832_s1 = sld [smem:[#allocation30_spill]] }
  0x16   : > { %s6830_s16 = scalar_select %p6071_p4, 1, 0 }
  0x17   : > { %p5310_p5 = pneg %p6071_p4 }
  0x19   : > { %p6079_p6 = pnand %p5310_p5, %p6810_p1 }
  0x1b   : > { %s6831_s19 = scalar_select %p6079_p6, 1, 0 }
  0x1c   : > { %s5631_s24 = scalar_lea.hbm %s6832_s1, 2048  ;;  %p6095_p8 = pneg %p6079_p6 }
  0x1d   : > { %p5632_p7 = scmp.ne.s32.totalorder %s6832_s1, %s5631_s24  ;;  %p5638_p11 = scmp.lt.u32.totalorder %s5631_s24, %s6832_s1 }
  0x1f   : > { %p5634_p9 = pnand %p6095_p8, %p5632_p7 }
  0x21   : > { %p5635_p10 = pneg %p5634_p9 }
  0x23   : > { %p5640_p12 = pnand %p5638_p11, %p5635_p10 }
  0x25   : > { %5643 = shalt.err (!%p5640_p12)
}
  0x26   : > { %s5644_s13 = scalar_lea.vmem %s6069_s14, 2048  ;;  %p5652_p5 = scmp.lt.s32.totalorder %s6069_s14, %s6069_s14 }
  0x27   : > { %p5645_p13 = scmp.ne.s32.totalorder %s6069_s14, %s5644_s13  ;;  %p5653_p3 = scmp.lt.s32.totalorder %s5644_s13, %s5644_s13 }
  0x29   : > { %p5647_p0 = pnand %p5645_p13, %p6095_p8  ;;  %p5654_p7 = por %p5653_p3, %p5652_p5 }
  0x2b   : > { %p5648_p2 = pneg %p5647_p0 }
  0x2d   : > { %p5655_p9 = pnand %p5654_p7, %p5648_p2 }
  0x2f   : > { %5658 = shalt.err (!%p5655_p9)
}
  0x30   : > { %s5974_s17 = smov 128   ;;  %s5975_s20 = smov 8  }
  0x31   : > { %5316 = dma.hbm_to_vmem [thread:$0]  (!%p6079_p6), %s6832_s1, 2048, %s6069_s14, [#allocation8], %s5974_s17, %s5974_s17, %s5975_s20  }
  0x32   : > { %s6834_s3 = sld [smem:[#allocation31_spill]] }
  0x38   : > { %s5659_s26 = scalar_lea.hbm %s6834_s3, 8192 }
  0x39   : > { %p5660_p3 = scmp.ne.s32.totalorder %s6834_s3, %s5659_s26  ;;  %p5666_p12 = scmp.lt.u32.totalorder %s5659_s26, %s6834_s3 }
  0x3b   : > { %p5662_p10 = pnand %p5660_p3, %p6095_p8 }
  0x3d   : > { %p5663_p11 = pneg %p5662_p10 }
  0x3f   : > { %p5668_p13 = pnand %p5666_p12, %p5663_p11 }
  0x41   : > { %5671 = shalt.err (!%p5668_p13)
}
  0x42   : > { %s5672_s14 = scalar_lea.vmem %s6083_s18, 8192  ;;  %p5680_p7 = scmp.lt.s32.totalorder %s6083_s18, %s6083_s18 }
  0x43   : > { %p5673_p0 = scmp.ne.s32.totalorder %s6083_s18, %s5672_s14  ;;  %p5681_p9 = scmp.lt.s32.totalorder %s5672_s14, %s5672_s14 }
  0x45   : > { %p5675_p2 = pnand %p5673_p0, %p6095_p8  ;;  %p5682_p3 = por %p5681_p9, %p5680_p7 }
  0x47   : > { %p5676_p5 = pneg %p5675_p2 }
  0x49   : > { %p5683_p10 = pnand %p5682_p3, %p5676_p5 }
  0x4b   : > { %5686 = shalt.err (!%p5683_p10)
}
  0x4c   : > { %s5976_s17 = smov 256   ;;  %s5977_s9 = smov 16  }
  0x4d   : > { %5322 = dma.hbm_to_vmem [thread:$0]  (!%p6079_p6), %s6834_s3, 8192, %s6083_s18, [#allocation11], %s5976_s17, %s5976_s17, %s5977_s9  }
  0x4e   : > { %s6835_s5 = sld [smem:[#allocation32_spill]] }
  0x54   : > { %s5687_s25 = scalar_lea.hbm %s6835_s5, 32768 }
  0x55   : > { %p5688_p11 = scmp.ne.s32.totalorder %s6835_s5, %s5687_s25  ;;  %p5694_p0 = scmp.lt.u32.totalorder %s5687_s25, %s6835_s5 }
  0x57   : > { %p5690_p12 = pnand %p5688_p11, %p6095_p8 }
  0x59   : > { %p5691_p13 = pneg %p5690_p12 }
  0x5b   : > { %p5696_p2 = pnand %p5694_p0, %p5691_p13 }
  0x5d   : > { %5699 = shalt.err (!%p5696_p2)
}
  0x5e   : > { %s5700_s14 = scalar_lea.vmem %s331_s21, 32768  ;;  %p5708_p3 = scmp.lt.s32.totalorder %s331_s21, %s331_s21 }
  0x5f   : > { %p5701_p5 = scmp.ne.s32.totalorder %s331_s21, %s5700_s14  ;;  %p5709_p10 = scmp.lt.s32.totalorder %s5700_s14, %s5700_s14 }
  0x61   : > { %p5703_p7 = pnand %p5701_p5, %p6095_p8  ;;  %p5710_p1 = por %p5709_p10, %p5708_p3 }
  0x63   : > { %p5704_p9 = pneg %p5703_p7 }
  0x65   : > { %p5711_p4 = pnand %p5710_p1, %p5704_p9 }
  0x67   : > { %5714 = shalt.err (!%p5711_p4)
}
  0x68   : > { %s5978_s18 = smov 512   ;;  %s5979_s17 = smov 32  }
  0x69   : > { %5328 = dma.hbm_to_vmem [thread:$0]  (!%p6079_p6), %s6835_s5, 32768, %s331_s21, [#allocation14], %s5978_s18, %s5978_s18, %s5979_s17  }
  0x6a   : > { %s4719_s22 = sadd.s32 4294967294, %s5969_s12   ;;  %s6160_s23 = sadd.s32 1, %s5969_s12  }
  0x6b   : > { %6836 = sst [smem:[#allocation27_spill]] %s6160_s23  ;;  %s183_s24 = sadd.s32 1, %s5965_s11 }
  0x6c   : > { %s180_s25 = ssub.s32 %s5969_s12, %s6160_s23  ;;  %p190_p1 = scmp.ne.s32.totalorder %s5965_s11, %s5961_s10 }
  0x6d   : > { %p181_p4 = scmp.eq.s32.totalorder %s180_s25, 0  ;;  %p191_p11 = scmp.eq.s32.totalorder %s5969_s12, 0 }
  0x6e   : > { %p196_p12 = scmp.ne.s32.totalorder %s5961_s10, %s5957_s30  ;;  %p246_p13 = scmp.eq.s32.totalorder %s6063_s15, 6 }
  0x6f   : > { %s6172_s26 = scalar_select %p181_p4, %s5965_s11, %s183_s24  }
  0x70   : > { %p192_p0 = por %p191_p11, %p190_p1  ;;  %p6838_p2 = scmp.eq.s32.totalorder %s6063_s15, 0 }
  0x71   : > { %6837 = sst [smem:[#allocation28_spill]] %s6172_s26  ;;  %p6180_p7 = por %p246_p13, %p190_p1 }
  0x72   : > { %p6176_p5 = por %p6838_p2, %p196_p12  ;;  %p252_p9 = scmp.eq.s32.totalorder %s4719_s22, 6 }
  0x73   : > { %s6840_s28 = scalar_select %p6180_p7, 1, 0 }
  0x74   : > { %s6839_s21 = scalar_select %p6176_p5, 1, 0 }
  0x75   : > { %p5350_p3 = scmp.lt.s32.totalorder %s5969_s12, 7  ;;  %s355_s29 = sand.u32 1, %s5969_s12  }
  0x76   : > { %p6186_p10 = por %p252_p9, %p196_p12  ;;  %s6812_s14 = sand.u32 1, %s5965_s11  }
  0x77   : > { %s4730_s18 = sshll.u32 %s5969_s12, 6  ;;  %s4729_s17 = sshll.u32 %s6812_s14, 9 }
  0x78   : > { %s6841_s13 = scalar_select %p6186_p10, 1, 0 }
  0x79   : > { %s6843_s7 = sld [smem:[#allocation33_spill]]  ;;  %p6199_p1 = pnand %p5350_p3, %p192_p0 }
  0x7a   : > { %6842 = sst [smem:[#allocation29_spill]] %s6841_s13  ;;  %s359_s25 = scalar_lea.vmem [#allocation16], %s4729_s17 }
  0x7b   : > { %s6844_s22 = scalar_select %p6199_p1, 1, 0 }
  0x7c   : > { %s365_s1 = sshll.u32 %s359_s25, 4  ;;  %s6205_s14 = scalar_lea.sflag [#allocation17], %s355_s29  ;;  %s6203_s1 = int_to_ptr.vmem [resolvable:$true] %s365_s1 }
  0x7d   : > { %p6821_p11 = pneg %p6199_p1 }
  0x7f   : > { %s6197_s24 = scalar_lea.hbm %s6843_s7, %s4730_s18  ;;  %s5720_s20 = scalar_lea.hbm %s6843_s7, 57344 }
  0x80   : > { %s5715_s3 = scalar_lea.hbm %s6197_s24, 8192  ;;  %p5721_p0 = scmp.lt.u32.totalorder %s6197_s24, %s6843_s7 }
  0x81   : > { %p5716_p4 = scmp.ne.s32.totalorder %s6197_s24, %s5715_s3  ;;  %p5722_p2 = scmp.lt.u32.totalorder %s5720_s20, %s5715_s3 }
  0x82   : > { %p5724_p3 = scmp.lt.u32.totalorder %s5715_s3, %s6197_s24 }
  0x83   : > { %p5718_p12 = pnand %p6821_p11, %p5716_p4  ;;  %p5723_p9 = por %p5722_p2, %p5721_p0 }
  0x85   : > { %p5719_p13 = pneg %p5718_p12  ;;  %p5725_p10 = por %p5724_p3, %p5723_p9 }
  0x87   : > { %p5726_p7 = pnand %p5725_p10, %p5719_p13 }
  0x89   : > { %5729 = shalt.err (!%p5726_p7)
}
  0x8a   : > { %s5730_s29 = scalar_lea.vmem %s6203_s1, 8192  ;;  %s5980_s17 = smov [#allocation16]  }
  0x8b   : > { %p5731_p4 = scmp.ne.s32.totalorder %s6203_s1, %s5730_s29  ;;  %s5735_s25 = sshll.u32 %s5980_s17, 4  ;;  %s5736_s25 = int_to_ptr.vmem [resolvable:$false] %s5735_s25 }
  0x8c   : > { %s5737_s5 = scalar_lea.vmem %s5736_s25, 16384  ;;  %p5738_p6 = scmp.lt.s32.totalorder %s6203_s1, %s5736_s25 }
  0x8d   : > { %p5733_p12 = pnand %p5731_p4, %p6821_p11  ;;  %p5739_p0 = scmp.lt.s32.totalorder %s5737_s5, %s5730_s29 }
  0x8f   : > { %p5734_p5 = pneg %p5733_p12  ;;  %p5740_p2 = por %p5739_p0, %p5738_p6 }
  0x91   : > { %p5741_p9 = pnand %p5740_p2, %p5734_p5 }
  0x93   : > { %5744 = shalt.err (!%p5741_p9)
}
  0x94   : > { %s5981_s3 = smov 448   ;;  %s5982_s26 = smov 64  }
  0x95   : > { %s5983_s18 = smov 4   ;;  %s5984_s9 = smov [#allocation4]  }
  0x96   : > { %5335 = dma.hbm_to_vmem [thread:$0]  (!%p6199_p1), %s6197_s24, 8192, %s6203_s1, %s6205_s14, %s5981_s3, %s5982_s26, %s5983_s18  }
  0x97   : > { %s272_s20 = sshll.u32 %s5984_s9, 4  ;;  %s5985_s17 = smov [#allocation9]   ;;  %s273_s20 = int_to_ptr.vmem [resolvable:$true] %s272_s20 }
  0x98   : > { %s296_s7 = sshll.u32 %s5985_s17, 4  ;;  %s5745_s5 = scalar_lea.hbm %s6799_s0, 128  ;;  %s6233_s7 = int_to_ptr.vmem [resolvable:$true] %s296_s7 }
  0x99   : > { %p5746_p6 = scmp.ne.s32.totalorder %s6799_s0, %s5745_s5  ;;  %p5752_p10 = scmp.lt.u32.totalorder %s5745_s5, %s6799_s0 }
  0x9b   : > { %p5748_p5 = pnand %p5746_p6, %p6095_p8 }
  0x9d   : > { %p5749_p7 = pneg %p5748_p5 }
  0x9f   : > { %p5754_p13 = pnand %p5752_p10, %p5749_p7 }
  0xa1   : > { %5757 = shalt.err (!%p5754_p13)
}
  0xa2   : > { %s5758_s24 = scalar_lea.vmem %s273_s20, 128  ;;  %p5766_p0 = scmp.lt.s32.totalorder %s273_s20, %s273_s20 }
  0xa3   : > { %p5759_p3 = scmp.ne.s32.totalorder %s273_s20, %s5758_s24  ;;  %p5767_p2 = scmp.lt.s32.totalorder %s5758_s24, %s5758_s24 }
  0xa5   : > { %p5761_p4 = pnand %p5759_p3, %p6095_p8  ;;  %p5768_p9 = por %p5767_p2, %p5766_p0 }
  0xa7   : > { %p5762_p12 = pneg %p5761_p4 }
  0xa9   : > { %p5769_p11 = pnand %p5768_p9, %p5762_p12 }
  0xab   : > { %5772 = shalt.err (!%p5769_p11)
}
  0xac   : > { %p6845_p6 = scmp.ne.s32.totalorder %s6831_s19, 0  ;;  %s5773_s26 = scalar_lea.hbm %s6801_s2, 128 }
  0xad   : > { %p5774_p5 = scmp.ne.s32.totalorder %s6801_s2, %s5773_s26  ;;  %p5780_p11 = scmp.lt.u32.totalorder %s5773_s26, %s6801_s2 }
  0xae   : > { %5313 = dma.hbm_to_vmem [thread:$0]  (!%p6845_p6), %s6799_s0, 128, %s273_s20, [#allocation5]  }
  0xaf   : > { %p5776_p7 = pnand %p5774_p5, %p6095_p8 }
  0xb1   : > { %p5777_p10 = pneg %p5776_p7 }
  0xb3   : > { %p5782_p13 = pnand %p5780_p11, %p5777_p10 }
  0xb5   : > { %5785 = shalt.err (!%p5782_p13)
}
  0xb6   : > { %s5786_s20 = scalar_lea.vmem %s6233_s7, 128  ;;  %p5794_p0 = scmp.lt.s32.totalorder %s6233_s7, %s6233_s7 }
  0xb7   : > { %p5787_p3 = scmp.ne.s32.totalorder %s6233_s7, %s5786_s20  ;;  %p5795_p2 = scmp.lt.s32.totalorder %s5786_s20, %s5786_s20 }
  0xb9   : > { %p5789_p4 = pnand %p5787_p3, %p6095_p8  ;;  %p5796_p9 = por %p5795_p2, %p5794_p0 }
  0xbb   : > { %p5790_p12 = pneg %p5789_p4 }
  0xbd   : > { %p5797_p5 = pnand %p5796_p9, %p5790_p12 }
  0xbf   : > { %5800 = shalt.err (!%p5797_p5)
}
  0xc0   : > { %5319 = dma.hbm_to_vmem [thread:$0]  (!%p6845_p6), %s6801_s2, 128, %s6233_s7, [#allocation8]  }
  0xc1   : > { %s5986_s1 = smov [#allocation12]   ;;  %s5987_s23 = smov [#allocation15]  }
  0xc2   : > { %s320_s24 = sshll.u32 %s5986_s1, 4  ;;  %s344_s13 = sshll.u32 %s5987_s23, 4  ;;  %s321_s24 = int_to_ptr.vmem [resolvable:$true] %s320_s24  ;;  %s6276_s13 = int_to_ptr.vmem [resolvable:$true] %s344_s13 }
  0xc3   : > { %s5801_s26 = scalar_lea.hbm %s6803_s4, 256 }
  0xc4   : > { %p5802_p7 = scmp.ne.s32.totalorder %s6803_s4, %s5801_s26  ;;  %p5808_p13 = scmp.lt.u32.totalorder %s5801_s26, %s6803_s4 }
  0xc6   : > { %p5804_p10 = pnand %p5802_p7, %p6095_p8 }
  0xc8   : > { %p5805_p11 = pneg %p5804_p10 }
  0xca   : > { %p5810_p3 = pnand %p5808_p13, %p5805_p11 }
  0xcc   : > { %5813 = shalt.err (!%p5810_p3)
}
  0xcd   : > { %s5814_s29 = scalar_lea.vmem %s321_s24, 256  ;;  %p5822_p2 = scmp.lt.s32.totalorder %s321_s24, %s321_s24 }
  0xce   : > { %p5815_p4 = scmp.ne.s32.totalorder %s321_s24, %s5814_s29  ;;  %p5823_p9 = scmp.lt.s32.totalorder %s5814_s29, %s5814_s29 }
  0xd0   : > { %p5817_p12 = pnand %p5815_p4, %p6095_p8  ;;  %p5824_p5 = por %p5823_p9, %p5822_p2 }
  0xd2   : > { %p5818_p0 = pneg %p5817_p12 }
  0xd4   : > { %p5825_p1 = pnand %p5824_p5, %p5818_p0 }
  0xd6   : > { %5828 = shalt.err (!%p5825_p1)
}
  0xd7   : > { %5325 = dma.hbm_to_vmem [thread:$0]  (!%p6845_p6), %s6803_s4, 256, %s321_s24, [#allocation11]  }
  0xd8   : > { %s5829_s23 = scalar_lea.hbm %s6805_s6, 512 }
  0xd9   : > { %p5830_p7 = scmp.ne.s32.totalorder %s6805_s6, %s5829_s23  ;;  %p5836_p1 = scmp.lt.u32.totalorder %s5829_s23, %s6805_s6 }
  0xdb   : > { %p5832_p10 = pnand %p5830_p7, %p6095_p8 }
  0xdd   : > { %p5833_p11 = pneg %p5832_p10 }
  0xdf   : > { %p5838_p13 = pnand %p5836_p1, %p5833_p11 }
  0xe1   : > { %5841 = shalt.err (!%p5838_p13)
}
  0xe2   : > { %s5842_s24 = scalar_lea.vmem %s6276_s13, 512  ;;  %p5850_p0 = scmp.lt.s32.totalorder %s6276_s13, %s6276_s13 }
  0xe3   : > { %p5843_p3 = scmp.ne.s32.totalorder %s6276_s13, %s5842_s24  ;;  %p5851_p2 = scmp.lt.s32.totalorder %s5842_s24, %s5842_s24 }
  0xe5   : > { %p5845_p4 = pnand %p5843_p3, %p6095_p8  ;;  %p5852_p9 = por %p5851_p2, %p5850_p0 }
  0xe7   : > { %p5846_p12 = pneg %p5845_p4 }
  0xe9   : > { %p5853_p5 = pnand %p5852_p9, %p5846_p12 }
  0xeb   : > { %5856 = shalt.err (!%p5853_p5)
}
  0xec   : > { %5331 = dma.hbm_to_vmem [thread:$0]  (!%p6845_p6), %s6805_s6, 512, %s6276_s13, [#allocation14]  }
  0xed   : > { %s4731_s7 = sshll.u32 %s5969_s12, 4  ;;  %s6846_s25 = sand.u32 1, %s5965_s11  }
  0xee   : > { %s6323_s20 = scalar_lea.hbm %s6807_s8, %s4731_s7  ;;  %s378_s19 = scalar_lea.vmem [#allocation18], %s6846_s25 }
  0xef   : > { %s385_s5 = sshll.u32 %s378_s19, 4  ;;  %s5857_s1 = scalar_lea.hbm %s6323_s20, 16  ;;  %s386_s5 = int_to_ptr.vmem [resolvable:$true] %s385_s5 }
  0xf0   : > { %p5858_p8 = scmp.ne.s32.totalorder %s6323_s20, %s5857_s1  ;;  %p6847_p7 = scmp.ne.s32.totalorder %s6844_s22, 0 }
  0xf1   : > { %s5862_s30 = scalar_lea.hbm %s6807_s8, 112  ;;  %p5863_p1 = scmp.lt.u32.totalorder %s6323_s20, %s6807_s8 }
  0xf2   : > { %p6848_p10 = pneg %p6847_p7  ;;  %p5864_p13 = scmp.lt.u32.totalorder %s5862_s30, %s5857_s1 }
  0xf3   : > { %p5866_p4 = scmp.lt.u32.totalorder %s5857_s1, %s6323_s20 }
  0xf4   : > { %p5860_p11 = pnand %p5858_p8, %p6848_p10  ;;  %p5865_p3 = por %p5864_p13, %p5863_p1 }
  0xf6   : > { %p5861_p6 = pneg %p5860_p11  ;;  %p5867_p12 = por %p5866_p4, %p5865_p3 }
  0xf8   : > { %p5868_p0 = pnand %p5867_p12, %p5861_p6 }
  0xfa   : > { %5871 = shalt.err (!%p5868_p0)
}
  0xfb   : > { %s5872_s18 = scalar_lea.vmem %s386_s5, 16  ;;  %p6849_p9 = pmov %p6848_p10 }
  0xfc   : > { %p5873_p2 = scmp.ne.s32.totalorder %s386_s5, %s5872_s18  ;;  %s5988_s24 = smov [#allocation18]  }
  0xfd   : > { %s5877_s9 = sshll.u32 %s5988_s24, 4  ;;  %s5878_s9 = int_to_ptr.vmem [resolvable:$false] %s5877_s9 }
  0xfe   : > { %p5875_p5 = pnand %p5873_p2, %p6849_p9  ;;  %s5879_s17 = scalar_lea.vmem %s5878_s9, 32 }
  0xff   : > { %p5880_p10 = scmp.lt.s32.totalorder %s386_s5, %s5878_s9  ;;  %p5881_p11 = scmp.lt.s32.totalorder %s5879_s17, %s5872_s18 }
 0x100   : > { %p5876_p8 = pneg %p5875_p5 }
 0x101   : > { %p5882_p1 = por %p5881_p11, %p5880_p10 }
 0x103   : > { %p5883_p13 = pnand %p5882_p1, %p5876_p8 }
 0x105   : > { %5886 = shalt.err (!%p5883_p13)
}
 0x106   : > { %5338 = dma.hbm_to_vmem [thread:$0]  (!%p6847_p7), %s6323_s20, 16, %s386_s5, %s6205_s14  }
 0x107   : > { %p6850_p6 = scmp.ne.s32.totalorder %s6830_s16, 0 }
 0x108   : > { %p6851_p3 = scmp.eq.s32.totalorder (!%p6850_p6), %s6063_s15, 0 }
 0x109   : > { %394 = sbr.rel (%p6850_p6) target bundleno = 1653 (0x675), region = 56 }
 0x110   : > { %5932 = dma.done.wait (%p6851_p3), [#allocation5], 128   ;;  %p6852_p4 = pmov %p6851_p3 }
 0x111   : > { %p6853_p12 = pmov %p6851_p3 }
 0x112   : > { %5934 = vsyncadd (%p6852_p4), [#allocation5], 4294967168 }
 0x113   : > { %5936 = dma.done.wait (%p6853_p12), [#allocation8], 2176   ;;  %p6854_p0 = pmov %p6851_p3 }
 0x115   : > { %5938 = vsyncadd (%p6854_p0), [#allocation8], 4294965120  ;;  %p6855_p2 = pmov %p6854_p0 }
 0x116   : > { %p6856_p7 = pmov %p6854_p0 }
 0x117   : > { %5940 = dma.done.wait (%p6855_p2), [#allocation11], 8448  }
 0x118   : > { %5942 = vsyncadd (%p6856_p7), [#allocation11], 4294958848  ;;  %p6857_p9 = pmov %p6854_p0 }
 0x119   : > { %p6858_p5 = pmov %p6854_p0 }
 0x11a   : > { %5944 = dma.done.wait (%p6857_p9), [#allocation14], 33280  }
 0x11b   : > { %5946 = vsyncadd (%p6858_p5), [#allocation14], 4294934016  ;;  %s424_s16 = sand.u32 1, %s6063_s15   ;;  %s6367_s14 = sand.u32 1, %s5961_s10  }
 0x11c   : > { %s4740_s22 = sshll.u32 %s6367_s14, 9  ;;  %s425_s7 = scalar_lea.sflag [#allocation17], %s424_s16 }
 0x11d   : > { %s6370_s27 = scalar_lea.vmem [#allocation16], %s4740_s22  ;;  %p6859_p8 = scmp.ne.s32.totalorder %s6839_s21, 0 }
 0x11f   : > { %5948 = dma.done.wait (%p6859_p8), %s425_s7, 8208  }
 0x120   : > { %5950 = vsyncadd (%p6859_p8), %s425_s7, 4294959088  ;;  %s4741_s29 = sshll.u32 %s6367_s14, 3  ;;  %s436_s20 = scalar_lea.vmem [#allocation18], %s6367_s14 }
 0x121   : > { %s6378_s25 = scalar_lea.vmem [#allocation19], %s4741_s29  ;;  %p6860_p10 = scmp.ne.s32.totalorder %s6063_s15, 0 }
 0x122   : > { %v5409_v0 = vld [vmem:[#allocation7 + $0x4] ss:$8 sps:$4 sm:$0xff] (!%p6860_p10)   ;;  %v5411_v1 = vld [vmem:[#allocation7] ss:$8 sps:$4 sm:$0xff] (!%p6860_p10)   ;;  %v5989_v2 = vmov (!%p6860_p10), 0   ;;  %v5990_v3 = vmov (!%p6860_p10), 0.0  }
 0x123   : > { %479 = sbr.rel (%p6860_p10) target bundleno = 1343 (0x53f), region = 96  ;;  %634 = vmatprep.mubr.bf16.mxu0 (!%p6860_p10), %v5989_v2  ;;  %480 = vst [vmem:[#allocation2] sm:$0xff] (!%p6860_p10), %v5990_v3  ;;  %602 = vmatprep.subr.bf16.mxu0 (!%p6860_p10), %v5409_v0  ;;  %v5412_v4 = vld [vmem:[#allocation7 + $0x14] ss:$8 sps:$4 sm:$0xff] (!%p6860_p10)   ;;  %v5414_v5 = vld [vmem:[#allocation7 + $0x10] ss:$8 sps:$4 sm:$0xff] (!%p6860_p10)  }
 0x124   : > { %603 = vmatpush1.bf16.msra.mxu0 (!%p6860_p10), %v5411_v1  ;;  %v5415_v6 = vld [vmem:[#allocation7 + $0x24] ss:$8 sps:$4 sm:$0xff] (!%p6860_p10)   ;;  %v5417_v7 = vld [vmem:[#allocation7 + $0x20] ss:$8 sps:$4 sm:$0xff] (!%p6860_p10)   ;;  %v5418_v8 = vld [vmem:[#allocation7 + $0x34] ss:$8 sps:$4 sm:$0xff] (!%p6860_p10)  }
 0x125   : > { %604 = vmatprep.subr.bf16.mxu0 (!%p6860_p10), %v5412_v4  ;;  %vm482_vm0 = vcmask (!%p6860_p10), 818176   ;;  %v5420_v9 = vld [vmem:[#allocation7 + $0x30] ss:$8 sps:$4 sm:$0xff] (!%p6860_p10)   ;;  %v5433_v11 = vld [vmem:[#allocation10 + $0x4] ss:$16 sps:$4 sm:$0xff] (!%p6860_p10)  }
 0x126   : > { %v481_v10 = vld [vmem:[#allocation4] sm:$0xff] (!%p6860_p10)  ;;  %v5421_v12 = vld [vmem:[#allocation7 + $0x44] ss:$8 sps:$4 sm:$0xff] (!%p6860_p10)   ;;  %v5423_v13 = vld [vmem:[#allocation7 + $0x40] ss:$8 sps:$4 sm:$0xff] (!%p6860_p10)   ;;  %1170 = vmatprep.subr.bf16.mxu1 (!%p6860_p10), %v5433_v11 }
 0x127   : > { %483 = vst.msk [vmem:[#allocation2] sm:$0xff] (!%p6860_p10), %vm482_vm0, %v481_v10  ;;  %v5424_v14 = vld [vmem:[#allocation7 + $0x54] ss:$8 sps:$4 sm:$0xff] (!%p6860_p10)   ;;  %v5426_v15 = vld [vmem:[#allocation7 + $0x50] ss:$8 sps:$4 sm:$0xff] (!%p6860_p10)  }
 0x128   : > { %605 = vmatpush1.bf16.msra.mxu0 (!%p6860_p10), %v5414_v5  ;;  %v5427_v16 = vld [vmem:[#allocation7 + $0x64] ss:$8 sps:$4 sm:$0xff] (!%p6860_p10)   ;;  %v5429_v17 = vld [vmem:[#allocation7 + $0x60] ss:$8 sps:$4 sm:$0xff] (!%p6860_p10)   ;;  %v5430_v18 = vld [vmem:[#allocation7 + $0x74] ss:$8 sps:$4 sm:$0xff] (!%p6860_p10)  }
 0x129   : > { %606 = vmatprep.subr.bf16.mxu0 (!%p6860_p10), %v5415_v6  ;;  %v5432_v19 = vld [vmem:[#allocation7 + $0x70] ss:$8 sps:$4 sm:$0xff] (!%p6860_p10)   ;;  %v5437_v21 = vld [vmem:[#allocation10 + $0xc] ss:$16 sps:$4 sm:$0xff] (!%p6860_p10)   ;;  %v5439_v25 = vld [vmem:[#allocation10 + $0x24] ss:$16 sps:$4 sm:$0xff] (!%p6860_p10)  }
 0x12a   : > { %v5435_v22 = vld [vmem:[#allocation10 + $0x8] ss:$16 sps:$4 sm:$0xff]   ;;  %v5438_v24 = vld [vmem:[#allocation10] ss:$16 sps:$4 sm:$0xff]   ;;  %v5443_v26 = vld [vmem:[#allocation10 + $0x2c] ss:$16 sps:$4 sm:$0xff]  }
 0x12b   : > { %1171 = vmatpush1.bf16.msra.mxu1 %v5438_v24  ;;  %v5441_v27 = vld [vmem:[#allocation10 + $0x28] ss:$16 sps:$4 sm:$0xff]   ;;  %v5444_v28 = vld [vmem:[#allocation10 + $0x20] ss:$16 sps:$4 sm:$0xff]   ;;  %v5445_v29 = vld [vmem:[#allocation10 + $0x44] ss:$16 sps:$4 sm:$0xff]  }
 0x12c   : > { %607 = vmatpush1.bf16.msra.mxu0 %v5417_v7  ;;  %1172 = vmatprep.subr.bf16.mxu1 %v5439_v25  ;;  %v5449_v30 = vld [vmem:[#allocation10 + $0x4c] ss:$16 sps:$4 sm:$0xff]   ;;  %v5447_v31 = vld [vmem:[#allocation10 + $0x48] ss:$16 sps:$4 sm:$0xff]   ;;  %v5450_v32 = vld [vmem:[#allocation10 + $0x40] ss:$16 sps:$4 sm:$0xff]  }
 0x12d   : > { %608 = vmatprep.subr.bf16.mxu0 %v5418_v8  ;;  %v5451_v33 = vld [vmem:[#allocation10 + $0x64] ss:$16 sps:$4 sm:$0xff]   ;;  %v5455_v34 = vld [vmem:[#allocation10 + $0x6c] ss:$16 sps:$4 sm:$0xff]   ;;  %v5453_v35 = vld [vmem:[#allocation10 + $0x68] ss:$16 sps:$4 sm:$0xff]  }
 0x12e   : > { %v484_v20 = vld [vmem:[#allocation2] sm:$0xff]  ;;  %v5456_v36 = vld [vmem:[#allocation10 + $0x60] ss:$16 sps:$4 sm:$0xff]   ;;  %v5457_v37 = vld [vmem:[#allocation10 + $0x84] ss:$16 sps:$4 sm:$0xff]  }
 0x12f   : > { %v485_v23 = vpack.c.bf16 %v484_v20, %v484_v20  ;;  %1173 = vmatpush1.bf16.msra.mxu1 %v5444_v28  ;;  %v5461_v38 = vld [vmem:[#allocation10 + $0x8c] ss:$16 sps:$4 sm:$0xff]   ;;  %v5459_v39 = vld [vmem:[#allocation10 + $0x88] ss:$16 sps:$4 sm:$0xff]   ;;  %v5462_v40 = vld [vmem:[#allocation10 + $0x80] ss:$16 sps:$4 sm:$0xff]  }
 0x130   : > { %609 = vmatpush1.bf16.msra.mxu0 %v5420_v9  ;;  %1174 = vmatprep.subr.bf16.mxu1 %v5445_v29  ;;  %v5463_v41 = vld [vmem:[#allocation10 + $0xa4] ss:$16 sps:$4 sm:$0xff]   ;;  %v5467_v42 = vld [vmem:[#allocation10 + $0xac] ss:$16 sps:$4 sm:$0xff]   ;;  %v5465_v43 = vld [vmem:[#allocation10 + $0xa8] ss:$16 sps:$4 sm:$0xff]   ;;  %v504_v29 = vlaneseq }
 0x131   : > { %610 = vmatprep.subr.bf16.mxu0 %v5421_v12  ;;  %v5468_v44 = vld [vmem:[#allocation10 + $0xa0] ss:$16 sps:$4 sm:$0xff]   ;;  %v5469_v45 = vld [vmem:[#allocation10 + $0xc4] ss:$16 sps:$4 sm:$0xff]   ;;  %v5473_v46 = vld [vmem:[#allocation10 + $0xcc] ss:$16 sps:$4 sm:$0xff]  }
 0x132   : > { %v5471_v47 = vld [vmem:[#allocation10 + $0xc8] ss:$16 sps:$4 sm:$0xff]   ;;  %v5474_v48 = vld [vmem:[#allocation10 + $0xc0] ss:$16 sps:$4 sm:$0xff]   ;;  %v5475_v49 = vld [vmem:[#allocation10 + $0xe4] ss:$16 sps:$4 sm:$0xff]  }
 0x133   : > { %1175 = vmatpush1.bf16.msra.mxu1 %v5450_v32  ;;  %v5479_v50 = vld [vmem:[#allocation10 + $0xec] ss:$16 sps:$4 sm:$0xff]   ;;  %v5477_v51 = vld [vmem:[#allocation10 + $0xe8] ss:$16 sps:$4 sm:$0xff]   ;;  %v5480_v52 = vld [vmem:[#allocation10 + $0xe0] ss:$16 sps:$4 sm:$0xff]  }
 0x134   : > { %611 = vmatpush1.bf16.msra.mxu0 %v5423_v13  ;;  %1176 = vmatprep.subr.bf16.mxu1 %v5451_v33  ;;  %v5481_v53 = vld [vmem:[#allocation10 + $0x104] ss:$16 sps:$4 sm:$0xff]   ;;  %v5485_v54 = vld [vmem:[#allocation10 + $0x10c] ss:$16 sps:$4 sm:$0xff]   ;;  %v5483_v55 = vld [vmem:[#allocation10 + $0x108] ss:$16 sps:$4 sm:$0xff]  }
 0x135   : > { %612 = vmatprep.subr.bf16.mxu0 %v5424_v14  ;;  %v5486_v56 = vld [vmem:[#allocation10 + $0x100] ss:$16 sps:$4 sm:$0xff]   ;;  %v5487_v57 = vld [vmem:[#allocation10 + $0x124] ss:$16 sps:$4 sm:$0xff]   ;;  %v5491_v58 = vld [vmem:[#allocation10 + $0x12c] ss:$16 sps:$4 sm:$0xff]  }
 0x136   : > { %v5489_v59 = vld [vmem:[#allocation10 + $0x128] ss:$16 sps:$4 sm:$0xff]   ;;  %v5492_v60 = vld [vmem:[#allocation10 + $0x120] ss:$16 sps:$4 sm:$0xff]   ;;  %v5493_v61 = vld [vmem:[#allocation10 + $0x144] ss:$16 sps:$4 sm:$0xff]  }
 0x137   : > { %1177 = vmatpush1.bf16.msra.mxu1 %v5456_v36  ;;  %v5497_v62 = vld [vmem:[#allocation10 + $0x14c] ss:$16 sps:$4 sm:$0xff]   ;;  %v5495_v63 = vld [vmem:[#allocation10 + $0x148] ss:$16 sps:$4 sm:$0xff]   ;;  %v5498_v0 = vld [vmem:[#allocation10 + $0x140] ss:$16 sps:$4 sm:$0xff]  }
 0x138   : > { %613 = vmatpush1.bf16.msra.mxu0 %v5426_v15  ;;  %1178 = vmatprep.subr.bf16.mxu1 %v5457_v37  ;;  %v5499_v1 = vld [vmem:[#allocation10 + $0x164] ss:$16 sps:$4 sm:$0xff]   ;;  %v5503_v2 = vld [vmem:[#allocation10 + $0x16c] ss:$16 sps:$4 sm:$0xff]   ;;  %v5501_v3 = vld [vmem:[#allocation10 + $0x168] ss:$16 sps:$4 sm:$0xff]  }
 0x139   : > { %614 = vmatprep.subr.bf16.mxu0 %v5427_v16  ;;  %v5504_v4 = vld [vmem:[#allocation10 + $0x160] ss:$16 sps:$4 sm:$0xff]   ;;  %v5505_v5 = vld [vmem:[#allocation10 + $0x184] ss:$16 sps:$4 sm:$0xff]   ;;  %v5509_v6 = vld [vmem:[#allocation10 + $0x18c] ss:$16 sps:$4 sm:$0xff]  }
 0x13a   : > { %v5507_v7 = vld [vmem:[#allocation10 + $0x188] ss:$16 sps:$4 sm:$0xff]   ;;  %v5510_v8 = vld [vmem:[#allocation10 + $0x180] ss:$16 sps:$4 sm:$0xff]   ;;  %v5511_v9 = vld [vmem:[#allocation10 + $0x1a4] ss:$16 sps:$4 sm:$0xff]  }
 0x13b   : > { %1179 = vmatpush1.bf16.msra.mxu1 %v5462_v40  ;;  %v5515_v10 = vld [vmem:[#allocation10 + $0x1ac] ss:$16 sps:$4 sm:$0xff]   ;;  %v5513_v11 = vld [vmem:[#allocation10 + $0x1a8] ss:$16 sps:$4 sm:$0xff]   ;;  %v5516_v12 = vld [vmem:[#allocation10 + $0x1a0] ss:$16 sps:$4 sm:$0xff]  }
 0x13c   : > { %615 = vmatpush1.bf16.msra.mxu0 %v5429_v17  ;;  %1180 = vmatprep.subr.bf16.mxu1 %v5463_v41  ;;  %v5517_v13 = vld [vmem:[#allocation10 + $0x1c4] ss:$16 sps:$4 sm:$0xff]   ;;  %v5521_v14 = vld [vmem:[#allocation10 + $0x1cc] ss:$16 sps:$4 sm:$0xff]   ;;  %v5519_v15 = vld [vmem:[#allocation10 + $0x1c8] ss:$16 sps:$4 sm:$0xff]  }
 0x13d   : > { %616 = vmatprep.subr.bf16.mxu0 %v5430_v18  ;;  %v5522_v16 = vld [vmem:[#allocation10 + $0x1c0] ss:$16 sps:$4 sm:$0xff]   ;;  %v5523_v17 = vld [vmem:[#allocation10 + $0x1e4] ss:$16 sps:$4 sm:$0xff]   ;;  %v5527_v18 = vld [vmem:[#allocation10 + $0x1ec] ss:$16 sps:$4 sm:$0xff]  }
 0x13e   : > { %v5528_v20 = vld [vmem:[#allocation10 + $0x1e0] ss:$16 sps:$4 sm:$0xff]   ;;  %v6403_v32 = vld [vmem:[#allocation9] sm:$0x77] }
 0x13f   : > { %1181 = vmatpush1.bf16.msra.mxu1 %v5468_v44 }
 0x140   : > { %617 = vmatpush1.bf16.msra.mxu0 %v5432_v19  ;;  %1182 = vmatprep.subr.bf16.mxu1 %v5469_v45  ;;  %v5525_v19 = vld [vmem:[#allocation10 + $0x1e8] ss:$16 sps:$4 sm:$0xff]  }
 0x141   : > { %1211 = vmatprep.subr.bf16.mxu0 %v5437_v21  ;;  %v6382_v21 = vld [vmem:[#allocation13] sm:$0xff] }
 0x143   : > { %635 = vmatmul.mubr.bf16.vlgmr.msra.gmra.mrb[0].mxu0 %v485_v23  ;;  %1183 = vmatpush1.bf16.msra.mxu1 %v5474_v48  ;;  %v6386_v23 = vld [vmem:[#allocation13 + $0x8] sm:$0xff] }
 0x144   : > { %1212 = vmatpush1.bf16.msra.mxu0 %v5435_v22  ;;  %1184 = vmatprep.subr.bf16.mxu1 %v5475_v49  ;;  %v6384_v22 = vld [vmem:[#allocation13 + $0x20] sm:$0xff] }
 0x145   : > { %1213 = vmatprep.subr.bf16.mxu0 %v5443_v26  ;;  %v4823_v24 = vcombine.low %v6382_v21, %v6384_v22  ;;  %v4824_v25 = vcombine.high %v6382_v21, %v6384_v22  ;;  %v6392_v26 = vld [vmem:[#allocation13 + $0x28] sm:$0xff] }
 0x146   : > { %v4826_v28 = vcombine.high %v6386_v23, %v6392_v26  ;;  %v1481_v22 = vld [vmem:[#allocation13 + $0xa8] sm:$0xff] }
 0x147   : > { %1185 = vmatpush1.bf16.msra.mxu1 %v5480_v52 }
 0x148   : > { %1214 = vmatpush1.bf16.msra.mxu0 %v5441_v27  ;;  %1186 = vmatprep.subr.bf16.mxu1 %v5481_v53  ;;  %v4825_v27 = vcombine.low %v6386_v23, %v6392_v26 }
 0x149   : > { %1215 = vmatprep.subr.bf16.mxu0 %v5449_v30  ;;  %v6398_v30 = vshrl.u32 %v504_v29, 7 }
 0x14b   : > { %1187 = vmatpush1.bf16.msra.mxu1 %v5486_v56  ;;  %v6406_v33 = vsub.s32 4, %v6398_v30 }
 0x14c   : > { %1216 = vmatpush1.bf16.msra.mxu0 %v5447_v31  ;;  %1188 = vmatprep.subr.bf16.mxu1 %v5487_v57  ;;  %v6401_v31 = vsub.s32 0, %v6398_v30 }
 0x14d   : > { %1217 = vmatprep.subr.bf16.mxu0 %v5455_v34 }
 0x14e   : > { %v507_v34 = vrot.slane %v6403_v32, %v6401_v31 }
 0x14f   : > { %1189 = vmatpush1.bf16.msra.mxu1 %v5492_v60 }
 0x150   : > { %1218 = vmatpush1.bf16.msra.mxu0 %v5453_v35  ;;  %1190 = vmatprep.subr.bf16.mxu1 %v5493_v61  ;;  %v511_v35 = vrot.slane %v6403_v32, %v6406_v33  ;;  %v517_v36 = vrot.slane %v507_v34, %v6401_v31  ;;  %v6415_v34 = vsub.s32 1, %v6398_v30 }
 0x151   : > { %1219 = vmatprep.subr.bf16.mxu0 %v5461_v38 }
 0x152   : > { %v521_v37 = vrot.slane %v511_v35, %v6401_v31  ;;  %v6418_v35 = vsub.s32 5, %v6398_v30 }
 0x153   : > { %1191 = vmatpush1.bf16.msra.mxu1 %v5498_v0 }
 0x154   : > { %1220 = vmatpush1.bf16.msra.mxu0 %v5459_v39  ;;  %1192 = vmatprep.subr.bf16.mxu1 %v5499_v1 }
 0x155   : > { %1221 = vmatprep.subr.bf16.mxu0 %v5467_v42 }
 0x157   : > { %1193 = vmatpush1.bf16.msra.mxu1 %v5504_v4 }
 0x158   : > { %1222 = vmatpush1.bf16.msra.mxu0 %v5465_v43  ;;  %1194 = vmatprep.subr.bf16.mxu1 %v5505_v5 }
 0x159   : > { %1223 = vmatprep.subr.bf16.mxu0 %v5473_v46 }
 0x15b   : > { %1195 = vmatpush1.bf16.msra.mxu1 %v5510_v8 }
 0x15c   : > { %1224 = vmatpush1.bf16.msra.mxu0 %v5471_v47  ;;  %1196 = vmatprep.subr.bf16.mxu1 %v5511_v9 }
 0x15d   : > { %1225 = vmatprep.subr.bf16.mxu0 %v5479_v50 }
 0x15f   : > { %1197 = vmatpush1.bf16.msra.mxu1 %v5516_v12 }
 0x160   : > { %1226 = vmatpush1.bf16.msra.mxu0 %v5477_v51  ;;  %1198 = vmatprep.subr.bf16.mxu1 %v5517_v13 }
 0x161   : > { %1227 = vmatprep.subr.bf16.mxu0 %v5485_v54 }
 0x163   : > { %1199 = vmatpush1.bf16.msra.mxu1 %v5522_v16 }
 0x164   : > { %1228 = vmatpush1.bf16.msra.mxu0 %v5483_v55  ;;  %1200 = vmatprep.subr.bf16.mxu1 %v5523_v17 }
 0x165   : > { %1229 = vmatprep.subr.bf16.mxu0 %v5491_v58 }
 0x167   : > { %1201 = vmatpush1.bf16.msra.mxu1 %v5528_v20 }
 0x168   : > { %1230 = vmatpush1.bf16.msra.mxu0 %v5489_v59  ;;  %3072 = vmatprep.subr.bf16.mxu1 %v4824_v25 }
 0x169   : > { %1231 = vmatprep.subr.bf16.mxu0 %v5497_v62 }
 0x16c   : > { %1232 = vmatpush1.bf16.msra.mxu0 %v5495_v63 }
 0x16d   : > { %1233 = vmatprep.subr.bf16.mxu0 %v5503_v2 }
 0x170   : > { %1234 = vmatpush1.bf16.msra.mxu0 %v5501_v3 }
 0x171   : > { %1235 = vmatprep.subr.bf16.mxu0 %v5509_v6 }
 0x174   : > { %1236 = vmatpush1.bf16.msra.mxu0 %v5507_v7 }
 0x175   : > { %1237 = vmatprep.subr.bf16.mxu0 %v5515_v10 }
 0x178   : > { %1238 = vmatpush1.bf16.msra.mxu0 %v5513_v11 }
 0x179   : > { %1239 = vmatprep.subr.bf16.mxu0 %v5521_v14 }
 0x17c   : > { %1240 = vmatpush1.bf16.msra.mxu0 %v5519_v15 }
 0x17d   : > { %1241 = vmatprep.subr.bf16.mxu0 %v5527_v18 }
 0x180   : > { %1242 = vmatpush1.bf16.msra.mxu0 %v5525_v19 }
 0x181   : > { %3154 = vmatprep.subr.bf16.mxu0 %v4826_v28 }
 0x216   : > { %v636_v38 = vpop.f32.mrb[0].mxu0 }
 0x217   : > { %v637_v39 = vadd.f32 %v636_v38, %v517_v36  ;;  %v638_v40 = vpop.f32.mrb[1].mxu0 }
 0x218   : > { %v639_v41 = vadd.f32 %v638_v40, %v521_v37  ;;  %v640_v42 = vpop.f32.mrb[2].mxu0 }
 0x219   : > { %vm643_vm1 = vcmp.gt.f32.partialorder %v637_v39, 0.0  ;;  %v645_v43 = vmul.f32 0.2, %v637_v39  ;;  %v641_v44 = vpop.f32.mrb[3].mxu0 }
 0x21a   : > { %vm644_vm2 = vcmp.gt.f32.partialorder %v639_v41, 0.0  ;;  %v646_v45 = vmul.f32 0.2, %v639_v41 }
 0x21b   : > { %v647_v46 = vsel %vm643_vm1, %v637_v39, %v645_v43 }
 0x21c   : > { %v649_v47 = vrot.slane %v647_v46, 4  ;;  %v664_v48 = vmul.f32 %v647_v46, %v647_v46  ;;  %v648_v49 = vsel %vm644_vm2, %v639_v41, %v646_v45 }
 0x21d   : > { %v655_v50 = vrot.slane %v648_v49, 4  ;;  %v665_v51 = vmul.f32 %v648_v49, %v648_v49 }
 0x21e   : > { %v650_v52 = vadd.f32 %v649_v47, %v647_v46  ;;  %v666_v53 = vrot.slane %v664_v48, 4 }
 0x21f   : > { %v656_v54 = vadd.f32 %v655_v50, %v648_v49  ;;  %v672_v55 = vrot.slane %v665_v51, 4  ;;  %v6429_v50 = vsub.s32 6, %v6398_v30 }
 0x220   : > { %v651_v56 = vrot.slane %v650_v52, 2  ;;  %v667_v57 = vadd.f32 %v666_v53, %v664_v48  ;;  %v6426_v48 = vsub.s32 2, %v6398_v30  ;;  %v1468_v30 = vld [vmem:[#allocation13 + $0x40] sm:$0xff] }
 0x221   : > { %v657_v58 = vrot.slane %v656_v54, 2  ;;  %v673_v59 = vadd.f32 %v672_v55, %v665_v51 }
 0x222   : > { %v652_v60 = vadd.f32 %v651_v56, %v650_v52  ;;  %v668_v61 = vrot.slane %v667_v57, 2 }
 0x223   : > { %v658_v62 = vadd.f32 %v657_v58, %v656_v54  ;;  %v674_v63 = vrot.slane %v673_v59, 2  ;;  %v1469_v58 = vld [vmem:[#allocation13 + $0x48] sm:$0xff] }
 0x224   : > { %v653_v0 = vrot.slane %v652_v60, 1  ;;  %v669_v1 = vadd.f32 %v668_v61, %v667_v57 }
 0x225   : > { %v659_v2 = vrot.slane %v658_v62, 1  ;;  %v675_v3 = vadd.f32 %v674_v63, %v673_v59 }
 0x226   : > { %v654_v4 = vadd.f32 %v653_v0, %v652_v60  ;;  %v670_v5 = vrot.slane %v669_v1, 1  ;;  %v1473_v60 = vld [vmem:[#allocation13 + $0x68] sm:$0xff]  ;;  %v1476_v0 = vld [vmem:[#allocation13 + $0x80] sm:$0xff] }
 0x227   : > { %v676_v6 = vrot.slane %v675_v3, 1  ;;  %v660_v7 = vadd.f32 %v659_v2, %v658_v62  ;;  %v4833_v62 = vcombine.low %v1469_v58, %v1473_v60  ;;  %v4834_v63 = vcombine.high %v1469_v58, %v1473_v60  ;;  %v1477_v2 = vld [vmem:[#allocation13 + $0x88] sm:$0xff] }
 0x228   : > { %v662_v8 = vmul.f32 0.125, %v654_v4  ;;  %v671_v9 = vadd.f32 %v670_v5, %v669_v1  ;;  %v1480_v1 = vld [vmem:[#allocation13 + $0xa0] sm:$0xff]  ;;  %v4841_v23 = vcombine.low %v1477_v2, %v1481_v22  ;;  %v4842_v26 = vcombine.high %v1477_v2, %v1481_v22  ;;  %v1485_v4 = vld [vmem:[#allocation13 + $0xc8] sm:$0xff] }
 0x229   : > { %v677_v10 = vadd.f32 %v676_v6, %v675_v3  ;;  %v663_v11 = vmul.f32 0.125, %v660_v7  ;;  %v4840_v21 = vcombine.high %v1476_v0, %v1480_v1  ;;  %v1488_v3 = vld [vmem:[#allocation13 + $0xe0] sm:$0xff]  ;;  %v1489_v6 = vld [vmem:[#allocation13 + $0xe8] sm:$0xff] }
 0x22a   : > { %v678_v12 = vmul.f32 0.125, %v671_v9  ;;  %v680_v13 = vmul.f32 %v662_v8, %v662_v8  ;;  %v4850_v9 = vcombine.high %v1485_v4, %v1489_v6  ;;  %v1529_v58 = vld [vmem:[#allocation13 + $0x228] sm:$0xff] }
 0x22b   : > { %v679_v14 = vmul.f32 0.125, %v677_v10  ;;  %v681_v15 = vmul.f32 %v663_v11, %v663_v11  ;;  %v1492_v10 = vld [vmem:[#allocation13 + $0x100] sm:$0xff]  ;;  %v1537_v2 = vld [vmem:[#allocation13 + $0x268] sm:$0xff] }
 0x22c   : > { %v682_v16 = vsub.f32 %v678_v12, %v680_v13  ;;  %v1493_v12 = vld [vmem:[#allocation13 + $0x108] sm:$0xff] }
 0x22d   : > { %v683_v17 = vsub.f32 %v679_v14, %v681_v15  ;;  %v1497_v14 = vld [vmem:[#allocation13 + $0x128] sm:$0xff] }
 0x22e   : > { %v684_v18 = vadd.f32 1e-05, %v682_v16  ;;  %v4857_v16 = vcombine.low %v1493_v12, %v1497_v14 }
 0x22f   : > { %v685_v19 = vadd.f32 1e-05, %v683_v17  ;;  %v4858_v17 = vcombine.high %v1493_v12, %v1497_v14  ;;  %v1553_v12 = vld [vmem:[#allocation13 + $0x2e8] sm:$0xff] }
 0x230   : > { %5529 = vrsqrt.f32 %v684_v18  ;;  %v1500_v18 = vld [vmem:[#allocation13 + $0x140] sm:$0xff] }
 0x231   : > { %5531 = vrsqrt.f32 %v685_v19  ;;  %v1504_v19 = vld [vmem:[#allocation13 + $0x160] sm:$0xff] }
 0x23a   : > { %v5530_v20 = vpop.eup %5529 }
 0x23b   : > { %v5532_v25 = vpop.eup %5531 }
 0x23c   : > { %v690_v28 = vcombine.low %v5530_v20, %v5532_v25  ;;  %v1501_v20 = vld [vmem:[#allocation13 + $0x148] sm:$0xff]  ;;  %v4864_v25 = vcombine.high %v1500_v18, %v1504_v19 }
 0x23e   : > { %v691_v29 = vrot.slane %v690_v28, 7  ;;  %v1505_v28 = vld [vmem:[#allocation13 + $0x168] sm:$0xff] }
 0x240   : > { %v693_v36 = vmul.f32 %v691_v29, %v6403_v32  ;;  %v4863_v29 = vcombine.low %v1500_v18, %v1504_v19  ;;  %v1557_v18 = vld [vmem:[#allocation13 + $0x308] sm:$0xff] }
 0x242   : > { %v698_v37 = vrot.slane %v693_v36, %v6415_v34  ;;  %v702_v38 = vrot.slane %v693_v36, %v6418_v35  ;;  %v4865_v36 = vcombine.low %v1501_v20, %v1505_v28 }
 0x244   : > { %v705_v39 = vmul.f32 %v698_v37, %v662_v8  ;;  %v706_v40 = vmul.f32 %v702_v38, %v663_v11  ;;  %v720_v41 = vrot.slane %v702_v38, %v6415_v34  ;;  %v716_v42 = vrot.slane %v698_v37, %v6415_v34  ;;  %v1496_v11 = vld [vmem:[#allocation13 + $0x120] sm:$0xff] }
 0x245   : > { %v4849_v8 = vcombine.low %v1485_v4, %v1489_v6  ;;  %v4856_v13 = vcombine.high %v1492_v10, %v1496_v11  ;;  %v4855_v15 = vcombine.low %v1492_v10, %v1496_v11  ;;  %v4866_v37 = vcombine.high %v1501_v20, %v1505_v28  ;;  %v1508_v38 = vld [vmem:[#allocation13 + $0x180] sm:$0xff]  ;;  %v1545_v4 = vld [vmem:[#allocation13 + $0x2a8] sm:$0xff] }
 0x246   : > { %v709_v43 = vcombine.low %v705_v39, %v706_v40  ;;  %v722_v44 = vmul.f32 %v720_v41, %v648_v49  ;;  %v721_v45 = vmul.f32 %v716_v42, %v647_v46  ;;  %v1512_v39 = vld [vmem:[#allocation13 + $0x1a0] sm:$0xff]  ;;  %v1509_v40 = vld [vmem:[#allocation13 + $0x188] sm:$0xff] }
 0x247   : > { %v4872_v41 = vcombine.high %v1508_v38, %v1512_v39  ;;  %v1513_v42 = vld [vmem:[#allocation13 + $0x1a8] sm:$0xff] }
 0x248   : > { %v710_v47 = vrot.slane %v709_v43, 6  ;;  %v4871_v43 = vcombine.low %v1508_v38, %v1512_v39  ;;  %v1549_v10 = vld [vmem:[#allocation13 + $0x2c8] sm:$0xff] }
 0x249   : > { %v4913_v14 = vcombine.low %v1549_v10, %v1553_v12  ;;  %v1561_v20 = vld [vmem:[#allocation13 + $0x328] sm:$0xff] }
 0x24a   : > { %v712_v51 = vsub.f32 %v6403_v32, %v710_v47  ;;  %v1472_v32 = vld [vmem:[#allocation13 + $0x60] sm:$0xff]  ;;  %v4921_v28 = vcombine.low %v1557_v18, %v1561_v20  ;;  %v1565_v38 = vld [vmem:[#allocation13 + $0x348] sm:$0xff] }
 0x24b   : > { %v4832_v59 = vcombine.high %v1468_v30, %v1472_v32  ;;  %v4831_v61 = vcombine.low %v1468_v30, %v1472_v32  ;;  %v1516_v47 = vld [vmem:[#allocation13 + $0x1c0] sm:$0xff]  ;;  %v1525_v30 = vld [vmem:[#allocation13 + $0x208] sm:$0xff] }
 0x24c   : > { %v731_v52 = vrot.slane %v712_v51, %v6429_v50  ;;  %v727_v53 = vrot.slane %v712_v51, %v6426_v48  ;;  %v1520_v51 = vld [vmem:[#allocation13 + $0x1e0] sm:$0xff]  ;;  %v4889_v60 = vcombine.low %v1525_v30, %v1529_v58 }
 0x24e   : > { %v741_v54 = vrot.slane %v731_v52, %v6426_v48  ;;  %v737_v55 = vrot.slane %v727_v53, %v6426_v48  ;;  %v1517_v52 = vld [vmem:[#allocation13 + $0x1c8] sm:$0xff]  ;;  %v4880_v53 = vcombine.high %v1516_v47, %v1520_v51 }
 0x250   : > { %v743_v56 = vadd.f32 %v741_v54, %v722_v44  ;;  %v742_v49 = vadd.f32 %v737_v55, %v721_v45  ;;  %v4873_v44 = vcombine.low %v1509_v40, %v1513_v42  ;;  %v4874_v45 = vcombine.high %v1509_v40, %v1513_v42  ;;  %v1521_v54 = vld [vmem:[#allocation13 + $0x1e8] sm:$0xff]  ;;  %v1572_v42 = vld [vmem:[#allocation13 + $0x380] sm:$0xff] }
 0x251   : > { %v4879_v55 = vcombine.low %v1516_v47, %v1520_v51  ;;  %v1573_v51 = vld [vmem:[#allocation13 + $0x388] sm:$0xff] }
 0x252   : > { %v745_v46 = vpack.c.bf16 %v743_v56, %v743_v56  ;;  %v744_v57 = vpack.c.bf16 %v742_v49, %v742_v49  ;;  %v4881_v56 = vcombine.low %v1517_v52, %v1521_v54  ;;  %v4882_v49 = vcombine.high %v1517_v52, %v1521_v54  ;;  %v1577_v52 = vld [vmem:[#allocation13 + $0x3a8] sm:$0xff] }
 0x253   : > { %v4938_v54 = vcombine.high %v1573_v51, %v1577_v52 }
 0x254   : > { %1202 = vmatprep.mubr.bf16.mxu1 %v745_v46  ;;  %1243 = vmatprep.mubr.bf16.mxu0 %v745_v46  ;;  %v1524_v46 = vld [vmem:[#allocation13 + $0x200] sm:$0xff] }
 0x255   : > { %1203 = vmatmul.mubr.bf16.vlgmr.msra.gmra.mrb[0].mxu1 %v744_v57  ;;  %1244 = vmatmul.mubr.bf16.vlgmr.msra.gmra.mrb[4].mxu0 %v744_v57  ;;  %v1528_v57 = vld [vmem:[#allocation13 + $0x220] sm:$0xff] }
 0x256   : > { %3073 = vmatpush1.bf16.msra.mxu1 %v4823_v24  ;;  %3155 = vmatpush1.bf16.msra.mxu0 %v4825_v27  ;;  %v4839_v24 = vcombine.low %v1476_v0, %v1480_v1  ;;  %v1484_v27 = vld [vmem:[#allocation13 + $0xc0] sm:$0xff]  ;;  %v4888_v32 = vcombine.high %v1524_v46, %v1528_v57  ;;  %v1533_v0 = vld [vmem:[#allocation13 + $0x248] sm:$0xff] }
 0x257   : > { %3074 = vmatprep.subr.bf16.mxu1 %v4832_v59  ;;  %3156 = vmatprep.subr.bf16.mxu0 %v4834_v63  ;;  %v4848_v5 = vcombine.high %v1484_v27, %v1488_v3  ;;  %v4847_v7 = vcombine.low %v1484_v27, %v1488_v3  ;;  %v4887_v59 = vcombine.low %v1524_v46, %v1528_v57  ;;  %v1536_v63 = vld [vmem:[#allocation13 + $0x260] sm:$0xff]  ;;  %v1541_v27 = vld [vmem:[#allocation13 + $0x288] sm:$0xff] }
 0x258   : > { %v4897_v22 = vcombine.low %v1533_v0, %v1537_v2  ;;  %v4905_v6 = vcombine.low %v1541_v27, %v1545_v4  ;;  %v4937_v57 = vcombine.low %v1573_v51, %v1577_v52 }
 0x25a   : > { %3075 = vmatpush1.bf16.msra.mxu1 %v4831_v61  ;;  %3157 = vmatpush1.bf16.msra.mxu0 %v4833_v62  ;;  %v4890_v61 = vcombine.high %v1525_v30, %v1529_v58  ;;  %v1532_v62 = vld [vmem:[#allocation13 + $0x240] sm:$0xff] }
 0x25b   : > { %3076 = vmatprep.subr.bf16.mxu1 %v4840_v21  ;;  %3158 = vmatprep.subr.bf16.mxu0 %v4842_v26  ;;  %v4896_v1 = vcombine.high %v1532_v62, %v1536_v63  ;;  %v4895_v21 = vcombine.low %v1532_v62, %v1536_v63  ;;  %v1544_v26 = vld [vmem:[#allocation13 + $0x2a0] sm:$0xff]  ;;  %v6446_v62 = vld [vmem:[#allocation13 + $0x408] sm:$0xff] }
 0x25e   : > { %3077 = vmatpush1.bf16.msra.mxu1 %v4839_v24  ;;  %3159 = vmatpush1.bf16.msra.mxu0 %v4841_v23  ;;  %v4898_v24 = vcombine.high %v1533_v0, %v1537_v2  ;;  %v1540_v23 = vld [vmem:[#allocation13 + $0x280] sm:$0xff]  ;;  %v6450_v0 = vld [vmem:[#allocation13 + $0x428] sm:$0xff] }
 0x25f   : > { %3078 = vmatprep.subr.bf16.mxu1 %v4848_v5  ;;  %3160 = vmatprep.subr.bf16.mxu0 %v4850_v9  ;;  %v4904_v3 = vcombine.high %v1540_v23, %v1544_v26  ;;  %v4903_v5 = vcombine.low %v1540_v23, %v1544_v26  ;;  %v1552_v9 = vld [vmem:[#allocation13 + $0x2e0] sm:$0xff]  ;;  %v4953_v2 = vcombine.low %v6446_v62, %v6450_v0 }
 0x262   : > { %3079 = vmatpush1.bf16.msra.mxu1 %v4847_v7  ;;  %3161 = vmatpush1.bf16.msra.mxu0 %v4849_v8  ;;  %v4906_v7 = vcombine.high %v1541_v27, %v1545_v4  ;;  %v1548_v8 = vld [vmem:[#allocation13 + $0x2c0] sm:$0xff] }
 0x263   : > { %3080 = vmatprep.subr.bf16.mxu1 %v4856_v13  ;;  %3162 = vmatprep.subr.bf16.mxu0 %v4858_v17  ;;  %v4912_v11 = vcombine.high %v1548_v8, %v1552_v9  ;;  %v4911_v13 = vcombine.low %v1548_v8, %v1552_v9  ;;  %v1560_v17 = vld [vmem:[#allocation13 + $0x320] sm:$0xff] }
 0x266   : > { %3081 = vmatpush1.bf16.msra.mxu1 %v4855_v15  ;;  %3163 = vmatpush1.bf16.msra.mxu0 %v4857_v16  ;;  %v4914_v15 = vcombine.high %v1549_v10, %v1553_v12  ;;  %v1556_v16 = vld [vmem:[#allocation13 + $0x300] sm:$0xff] }
 0x267   : > { %3082 = vmatprep.subr.bf16.mxu1 %v4864_v25  ;;  %3164 = vmatprep.subr.bf16.mxu0 %v4866_v37  ;;  %v4920_v19 = vcombine.high %v1556_v16, %v1560_v17  ;;  %v4919_v25 = vcombine.low %v1556_v16, %v1560_v17  ;;  %v1568_v37 = vld [vmem:[#allocation13 + $0x360] sm:$0xff] }
 0x26a   : > { %3083 = vmatpush1.bf16.msra.mxu1 %v4863_v29  ;;  %3165 = vmatpush1.bf16.msra.mxu0 %v4865_v36  ;;  %v4922_v29 = vcombine.high %v1557_v18, %v1561_v20  ;;  %v1564_v36 = vld [vmem:[#allocation13 + $0x340] sm:$0xff] }
 0x26b   : > { %3084 = vmatprep.subr.bf16.mxu1 %v4872_v41  ;;  %3166 = vmatprep.subr.bf16.mxu0 %v4874_v45  ;;  %v4927_v39 = vcombine.low %v1564_v36, %v1568_v37  ;;  %v4928_v40 = vcombine.high %v1564_v36, %v1568_v37  ;;  %v1569_v41 = vld [vmem:[#allocation13 + $0x368] sm:$0xff] }
 0x26c   : > { %v4930_v45 = vcombine.high %v1565_v38, %v1569_v41 }
 0x26e   : > { %3085 = vmatpush1.bf16.msra.mxu1 %v4871_v43  ;;  %3167 = vmatpush1.bf16.msra.mxu0 %v4873_v44  ;;  %v1576_v43 = vld [vmem:[#allocation13 + $0x3a0] sm:$0xff]  ;;  %v4929_v44 = vcombine.low %v1565_v38, %v1569_v41 }
 0x26f   : > { %3086 = vmatprep.subr.bf16.mxu1 %v4880_v53  ;;  %3168 = vmatprep.subr.bf16.mxu0 %v4882_v49  ;;  %v4936_v47 = vcombine.high %v1572_v42, %v1576_v43  ;;  %v1580_v53 = vld [vmem:[#allocation13 + $0x3c0] sm:$0xff]  ;;  %v1585_v49 = vld [vmem:[#allocation13 + $0x3e8] sm:$0xff]  ;;  %v4935_v46 = vcombine.low %v1572_v42, %v1576_v43 }
 0x272   : > { %3087 = vmatpush1.bf16.msra.mxu1 %v4879_v55  ;;  %3169 = vmatpush1.bf16.msra.mxu0 %v4881_v56  ;;  %v1584_v55 = vld [vmem:[#allocation13 + $0x3e0] sm:$0xff]  ;;  %v1581_v56 = vld [vmem:[#allocation13 + $0x3c8] sm:$0xff] }
 0x273   : > { %3088 = vmatprep.subr.bf16.mxu1 %v4888_v32  ;;  %3170 = vmatprep.subr.bf16.mxu0 %v4890_v61  ;;  %v4944_v30 = vcombine.high %v1580_v53, %v1584_v55  ;;  %v4946_v32 = vcombine.high %v1581_v56, %v1585_v49  ;;  %v4943_v58 = vcombine.low %v1580_v53, %v1584_v55  ;;  %v6444_v61 = vld [vmem:[#allocation13 + $0x420] sm:$0xff] }
 0x276   : > { %3089 = vmatpush1.bf16.msra.mxu1 %v4887_v59  ;;  %3171 = vmatpush1.bf16.msra.mxu0 %v4889_v60  ;;  %v4945_v59 = vcombine.low %v1581_v56, %v1585_v49  ;;  %v6442_v60 = vld [vmem:[#allocation13 + $0x400] sm:$0xff] }
 0x277   : > { %3090 = vmatprep.subr.bf16.mxu1 %v4896_v1  ;;  %3172 = vmatprep.subr.bf16.mxu0 %v4898_v24  ;;  %v4952_v63 = vcombine.high %v6442_v60, %v6444_v61  ;;  %v4951_v1 = vcombine.low %v6442_v60, %v6444_v61  ;;  %v6460_v24 = vld [vmem:[#allocation12 + $0x8] sm:$0x77] }
 0x278   : > { %v825_v26 = vrot.slane %v6460_v24, %v6401_v31 }
 0x27a   : > { %3091 = vmatpush1.bf16.msra.mxu1 %v4895_v21  ;;  %3173 = vmatpush1.bf16.msra.mxu0 %v4897_v22  ;;  %v4954_v21 = vcombine.high %v6446_v62, %v6450_v0  ;;  %v6458_v22 = vld [vmem:[#allocation12] sm:$0x77] }
 0x27b   : > { %3092 = vmatprep.subr.bf16.mxu1 %v4904_v3  ;;  %3174 = vmatprep.subr.bf16.mxu0 %v4906_v7  ;;  %v817_v23 = vrot.slane %v6458_v22, %v6401_v31  ;;  %v821_v27 = vrot.slane %v6458_v22, %v6406_v33  ;;  %v829_v3 = vrot.slane %v6460_v24, %v6406_v33 }
 0x27d   : > { %v837_v4 = vrot.slane %v817_v23, %v6401_v31  ;;  %v849_v7 = vrot.slane %v829_v3, %v6401_v31 }
 0x27e   : > { %3093 = vmatpush1.bf16.msra.mxu1 %v4903_v5  ;;  %3175 = vmatpush1.bf16.msra.mxu0 %v4905_v6  ;;  %v845_v5 = vrot.slane %v825_v26, %v6401_v31  ;;  %v841_v6 = vrot.slane %v821_v27, %v6401_v31 }
 0x27f   : > { %3094 = vmatprep.subr.bf16.mxu1 %v4912_v11  ;;  %3176 = vmatprep.subr.bf16.mxu0 %v4914_v15 }
 0x282   : > { %3095 = vmatpush1.bf16.msra.mxu1 %v4911_v13  ;;  %3177 = vmatpush1.bf16.msra.mxu0 %v4913_v14 }
 0x283   : > { %3096 = vmatprep.subr.bf16.mxu1 %v4920_v19  ;;  %3178 = vmatprep.subr.bf16.mxu0 %v4922_v29 }
 0x286   : > { %3097 = vmatpush1.bf16.msra.mxu1 %v4919_v25  ;;  %3179 = vmatpush1.bf16.msra.mxu0 %v4921_v28 }
 0x287   : > { %3098 = vmatprep.subr.bf16.mxu1 %v4928_v40  ;;  %3180 = vmatprep.subr.bf16.mxu0 %v4930_v45 }
 0x28a   : > { %3099 = vmatpush1.bf16.msra.mxu1 %v4927_v39  ;;  %3181 = vmatpush1.bf16.msra.mxu0 %v4929_v44 }
 0x28b   : > { %3100 = vmatprep.subr.bf16.mxu1 %v4936_v47  ;;  %3182 = vmatprep.subr.bf16.mxu0 %v4938_v54 }
 0x28e   : > { %3101 = vmatpush1.bf16.msra.mxu1 %v4935_v46  ;;  %3183 = vmatpush1.bf16.msra.mxu0 %v4937_v57 }
 0x28f   : > { %3102 = vmatprep.subr.bf16.mxu1 %v4944_v30  ;;  %3184 = vmatprep.subr.bf16.mxu0 %v4946_v32 }
 0x292   : > { %3103 = vmatpush1.bf16.msra.mxu1 %v4943_v58  ;;  %3185 = vmatpush1.bf16.msra.mxu0 %v4945_v59 }
 0x293   : > { %3113 = vmatprep.subr.bf16.mxu1 %v4952_v63  ;;  %3195 = vmatprep.subr.bf16.mxu0 %v4954_v21 }
 0x328   : > { %v1204_v8 = vpop.f32.mrb[0].mxu1  ;;  %v1245_v9 = vpop.f32.mrb[4].mxu0 }
 0x329   : > { %v1205_v10 = vadd.f32 %v1204_v8, %v837_v4  ;;  %v1246_v11 = vadd.f32 %v1245_v9, %v845_v5  ;;  %v1206_v12 = vpop.f32.mrb[1].mxu1  ;;  %v1247_v13 = vpop.f32.mrb[5].mxu0 }
 0x32a   : > { %v1207_v14 = vadd.f32 %v1206_v12, %v841_v6  ;;  %v1248_v15 = vadd.f32 %v1247_v13, %v849_v7  ;;  %v1208_v16 = vpop.f32.mrb[2].mxu1  ;;  %v1249_v17 = vpop.f32.mrb[6].mxu0 }
 0x32b   : > { %vm1252_vm3 = vcmp.gt.f32.partialorder %v1205_v10, 0.0  ;;  %v1256_v18 = vmul.f32 0.2, %v1205_v10  ;;  %vm1254_vm4 = vcmp.gt.f32.partialorder %v1246_v11, 0.0  ;;  %v1258_v19 = vmul.f32 0.2, %v1246_v11 }
 0x32c   : > { %vm1253_vm5 = vcmp.gt.f32.partialorder %v1207_v14, 0.0  ;;  %v1257_v20 = vmul.f32 0.2, %v1207_v14  ;;  %vm1255_vm6 = vcmp.gt.f32.partialorder %v1248_v15, 0.0  ;;  %v1259_v25 = vmul.f32 0.2, %v1248_v15 }
 0x32d   : > { %v6474_v28 = vsel %vm1252_vm3, %v1205_v10, %v1256_v18  ;;  %v6476_v29 = vsel %vm1254_vm4, %v1246_v11, %v1258_v19  ;;  %v1209_v36 = vpop.f32.mrb[3].mxu1  ;;  %v1250_v37 = vpop.f32.mrb[7].mxu0 }
 0x32e   : > { %v1264_v38 = vrot.slane %v6474_v28, 4  ;;  %v1292_v39 = vmul.f32 %v6474_v28, %v6474_v28  ;;  %v1276_v40 = vrot.slane %v6476_v29, 4  ;;  %v1294_v41 = vmul.f32 %v6476_v29, %v6476_v29 }
 0x32f   : > { %v6484_v42 = vsel %vm1253_vm5, %v1207_v14, %v1257_v20  ;;  %v6486_v43 = vsel %vm1255_vm6, %v1248_v15, %v1259_v25 }
 0x330   : > { %v1265_v44 = vadd.f32 %v1264_v38, %v6474_v28  ;;  %v1296_v45 = vrot.slane %v1292_v39, 4  ;;  %v1277_v47 = vadd.f32 %v1276_v40, %v6476_v29  ;;  %v1308_v51 = vrot.slane %v1294_v41, 4 }
 0x331   : > { %v1270_v52 = vrot.slane %v6484_v42, 4  ;;  %v1293_v53 = vmul.f32 %v6484_v42, %v6484_v42  ;;  %v1282_v54 = vrot.slane %v6486_v43, 4  ;;  %v1295_v55 = vmul.f32 %v6486_v43, %v6486_v43 }
 0x332   : > { %v1266_v56 = vrot.slane %v1265_v44, 2  ;;  %v1297_v49 = vadd.f32 %v1296_v45, %v1292_v39  ;;  %v1278_v46 = vrot.slane %v1277_v47, 2  ;;  %v1309_v57 = vadd.f32 %v1308_v51, %v1294_v41 }
 0x333   : > { %v1271_v30 = vadd.f32 %v1270_v52, %v6484_v42  ;;  %v1302_v32 = vrot.slane %v1293_v53, 4  ;;  %v1283_v58 = vadd.f32 %v1282_v54, %v6486_v43  ;;  %v1314_v59 = vrot.slane %v1295_v55, 4 }
 0x334   : > { %v1267_v63 = vadd.f32 %v1266_v56, %v1265_v44  ;;  %v1298_v21 = vrot.slane %v1297_v49, 2  ;;  %v1279_v23 = vadd.f32 %v1278_v46, %v1277_v47  ;;  %v1310_v26 = vrot.slane %v1309_v57, 2 }
 0x335   : > { %v1272_v27 = vrot.slane %v1271_v30, 2  ;;  %v1303_v3 = vadd.f32 %v1302_v32, %v1293_v53  ;;  %v1284_v4 = vrot.slane %v1283_v58, 2  ;;  %v1315_v5 = vadd.f32 %v1314_v59, %v1295_v55 }
 0x336   : > { %v1268_v6 = vrot.slane %v1267_v63, 1  ;;  %v1299_v7 = vadd.f32 %v1298_v21, %v1297_v49  ;;  %v1280_v8 = vrot.slane %v1279_v23, 1  ;;  %v1311_v9 = vadd.f32 %v1310_v26, %v1309_v57 }
 0x337   : > { %v1273_v10 = vadd.f32 %v1272_v27, %v1271_v30  ;;  %v1304_v11 = vrot.slane %v1303_v3, 2  ;;  %v1285_v12 = vadd.f32 %v1284_v4, %v1283_v58  ;;  %v1316_v13 = vrot.slane %v1315_v5, 2 }
 0x338   : > { %v1269_v14 = vadd.f32 %v1268_v6, %v1267_v63  ;;  %v1300_v15 = vrot.slane %v1299_v7, 1  ;;  %v1281_v16 = vadd.f32 %v1280_v8, %v1279_v23  ;;  %v1312_v17 = vrot.slane %v1311_v9, 1 }
 0x339   : > { %v1274_v18 = vrot.slane %v1273_v10, 1  ;;  %v1305_v19 = vadd.f32 %v1304_v11, %v1303_v3  ;;  %v1286_v20 = vrot.slane %v1285_v12, 1  ;;  %v1317_v25 = vadd.f32 %v1316_v13, %v1315_v5 }
 0x33a   : > { %v1288_v36 = vmul.f32 0.125, %v1269_v14  ;;  %v1301_v37 = vadd.f32 %v1300_v15, %v1299_v7  ;;  %v1290_v38 = vmul.f32 0.125, %v1281_v16  ;;  %v1313_v39 = vadd.f32 %v1312_v17, %v1311_v9 }
 0x33b   : > { %v1275_v40 = vadd.f32 %v1274_v18, %v1273_v10  ;;  %v1306_v41 = vrot.slane %v1305_v19, 1  ;;  %v1287_v44 = vadd.f32 %v1286_v20, %v1285_v12  ;;  %v1318_v45 = vrot.slane %v1317_v25, 1 }
 0x33c   : > { %v1320_v47 = vmul.f32 0.125, %v1301_v37  ;;  %v1324_v51 = vmul.f32 %v1288_v36, %v1288_v36  ;;  %v1322_v52 = vmul.f32 0.125, %v1313_v39  ;;  %v1326_v53 = vmul.f32 %v1290_v38, %v1290_v38 }
 0x33d   : > { %v1289_v54 = vmul.f32 0.125, %v1275_v40  ;;  %v1307_v55 = vadd.f32 %v1306_v41, %v1305_v19  ;;  %v1291_v56 = vmul.f32 0.125, %v1287_v44  ;;  %v1319_v49 = vadd.f32 %v1318_v45, %v1317_v25 }
 0x33e   : > { %v1328_v46 = vsub.f32 %v1320_v47, %v1324_v51  ;;  %v1330_v57 = vsub.f32 %v1322_v52, %v1326_v53 }
 0x33f   : > { %v1321_v30 = vmul.f32 0.125, %v1307_v55  ;;  %v1325_v32 = vmul.f32 %v1289_v54, %v1289_v54  ;;  %v1323_v58 = vmul.f32 0.125, %v1319_v49  ;;  %v1327_v59 = vmul.f32 %v1291_v56, %v1291_v56 }
 0x340   : > { %v1332_v63 = vadd.f32 1e-05, %v1328_v46  ;;  %v1334_v21 = vadd.f32 1e-05, %v1330_v57 }
 0x341   : > { %v1329_v23 = vsub.f32 %v1321_v30, %v1325_v32  ;;  %v1331_v26 = vsub.f32 %v1323_v58, %v1327_v59  ;;  %v1596_v32 = vld [vmem:[#allocation13 + $0x440] sm:$0xff]  ;;  %v1597_v59 = vld [vmem:[#allocation13 + $0x448] sm:$0xff] }
 0x342   : > { %5533 = vrsqrt.f32 %v1332_v63  ;;  %v1600_v58 = vld [vmem:[#allocation13 + $0x460] sm:$0xff]  ;;  %v1601_v63 = vld [vmem:[#allocation13 + $0x468] sm:$0xff] }
 0x343   : > { %v1333_v27 = vadd.f32 1e-05, %v1329_v23  ;;  %v1335_v3 = vadd.f32 1e-05, %v1331_v26  ;;  %5535 = vrsqrt.f32 %v1334_v21 }
 0x345   : > { %5537 = vrsqrt.f32 %v1333_v27  ;;  %v1604_v27 = vld [vmem:[#allocation13 + $0x480] sm:$0xff] }
 0x346   : > { %5539 = vrsqrt.f32 %v1335_v3  ;;  %v4960_v3 = vcombine.high %v1596_v32, %v1600_v58 }
 0x34c   : > { %v5534_v4 = vpop.eup %5533 }
 0x34d   : > { %v5536_v5 = vpop.eup %5535 }
 0x34f   : > { %v5538_v6 = vpop.eup %5537 }
 0x350   : > { %v5540_v7 = vpop.eup %5539  ;;  %v1344_v8 = vcombine.low %v5534_v4, %v5538_v6  ;;  %v4962_v4 = vcombine.high %v1597_v59, %v1601_v63  ;;  %v1605_v6 = vld [vmem:[#allocation13 + $0x488] sm:$0xff] }
 0x351   : > { %v1345_v9 = vcombine.low %v5536_v5, %v5540_v7  ;;  %v1608_v5 = vld [vmem:[#allocation13 + $0x4a0] sm:$0xff]  ;;  %v1609_v7 = vld [vmem:[#allocation13 + $0x4a8] sm:$0xff] }
 0x352   : > { %v1346_v10 = vrot.slane %v1344_v8, 7  ;;  %v4967_v60 = vcombine.low %v1604_v27, %v1608_v5  ;;  %v4969_v61 = vcombine.low %v1605_v6, %v1609_v7 }
 0x353   : > { %v1347_v11 = vrot.slane %v1345_v9, 7  ;;  %v4959_v9 = vcombine.low %v1596_v32, %v1600_v58  ;;  %v1656_v58 = vld [vmem:[#allocation13 + $0x620] sm:$0xff] }
 0x354   : > { %v1350_v12 = vmul.f32 %v1346_v10, %v6458_v22  ;;  %v4961_v10 = vcombine.low %v1597_v59, %v1601_v63  ;;  %v1653_v59 = vld [vmem:[#allocation13 + $0x608] sm:$0xff] }
 0x355   : > { %v1351_v13 = vmul.f32 %v1347_v11, %v6460_v24  ;;  %v4968_v11 = vcombine.high %v1604_v27, %v1608_v5  ;;  %v1657_v63 = vld [vmem:[#allocation13 + $0x628] sm:$0xff] }
 0x356   : > { %v1357_v14 = vrot.slane %v1350_v12, %v6415_v34  ;;  %v1361_v15 = vrot.slane %v1350_v12, %v6418_v35  ;;  %v4970_v12 = vcombine.high %v1605_v6, %v1609_v7  ;;  %v5018_v5 = vcombine.high %v1653_v59, %v1657_v63  ;;  %v1660_v6 = vld [vmem:[#allocation13 + $0x640] sm:$0xff] }
 0x357   : > { %v1365_v16 = vrot.slane %v1351_v13, %v6415_v34  ;;  %v1369_v17 = vrot.slane %v1351_v13, %v6418_v35  ;;  %v1612_v13 = vld [vmem:[#allocation13 + $0x4c0] sm:$0xff] }
 0x358   : > { %v1375_v18 = vmul.f32 %v1361_v15, %v1289_v54  ;;  %v1397_v19 = vrot.slane %v1361_v15, %v6415_v34  ;;  %v1374_v20 = vmul.f32 %v1357_v14, %v1288_v36  ;;  %v1393_v25 = vrot.slane %v1357_v14, %v6415_v34  ;;  %v1616_v14 = vld [vmem:[#allocation13 + $0x4e0] sm:$0xff]  ;;  %v1613_v15 = vld [vmem:[#allocation13 + $0x4c8] sm:$0xff] }
 0x359   : > { %v1377_v37 = vmul.f32 %v1369_v17, %v1291_v56  ;;  %v1405_v39 = vrot.slane %v1369_v17, %v6415_v34  ;;  %v1376_v40 = vmul.f32 %v1365_v16, %v1290_v38  ;;  %v1401_v41 = vrot.slane %v1365_v16, %v6415_v34  ;;  %v1617_v16 = vld [vmem:[#allocation13 + $0x4e8] sm:$0xff]  ;;  %v1664_v7 = vld [vmem:[#allocation13 + $0x660] sm:$0xff] }
 0x35a   : > { %v1407_v44 = vmul.f32 %v1397_v19, %v6484_v42  ;;  %v1382_v45 = vcombine.low %v1374_v20, %v1375_v18  ;;  %v1406_v47 = vmul.f32 %v1393_v25, %v6474_v28  ;;  %v4976_v62 = vcombine.high %v1612_v13, %v1616_v14  ;;  %v1621_v17 = vld [vmem:[#allocation13 + $0x508] sm:$0xff] }
 0x35b   : > { %v1409_v51 = vmul.f32 %v1405_v39, %v6486_v43  ;;  %v1383_v52 = vcombine.low %v1376_v40, %v1377_v37  ;;  %v1408_v53 = vmul.f32 %v1401_v41, %v6476_v29  ;;  %v4978_v0 = vcombine.high %v1613_v15, %v1617_v16  ;;  %v1625_v18 = vld [vmem:[#allocation13 + $0x528] sm:$0xff]  ;;  %v1628_v39 = vld [vmem:[#allocation13 + $0x540] sm:$0xff] }
 0x35c   : > { %v1384_v54 = vrot.slane %v1382_v45, 6  ;;  %v4975_v19 = vcombine.low %v1612_v13, %v1616_v14  ;;  %v4977_v20 = vcombine.low %v1613_v15, %v1617_v16  ;;  %v4986_v37 = vcombine.high %v1621_v17, %v1625_v18  ;;  %v1632_v40 = vld [vmem:[#allocation13 + $0x560] sm:$0xff]  ;;  %v1629_v41 = vld [vmem:[#allocation13 + $0x548] sm:$0xff] }
 0x35d   : > { %v1385_v36 = vrot.slane %v1383_v52, 6  ;;  %v5024_v13 = vcombine.high %v1660_v6, %v1664_v7  ;;  %v1668_v15 = vld [vmem:[#allocation13 + $0x680] sm:$0xff] }
 0x35e   : > { %v1388_v55 = vsub.f32 %v6458_v22, %v1384_v54  ;;  %v1640_v54 = vld [vmem:[#allocation13 + $0x5a0] sm:$0xff] }
 0x35f   : > { %v1389_v56 = vsub.f32 %v6460_v24, %v1385_v36  ;;  %v1637_v36 = vld [vmem:[#allocation13 + $0x588] sm:$0xff]  ;;  %v1672_v16 = vld [vmem:[#allocation13 + $0x6a0] sm:$0xff] }
 0x360   : > { %v1419_v38 = vrot.slane %v1388_v55, %v6429_v50  ;;  %v1415_v49 = vrot.slane %v1388_v55, %v6426_v48  ;;  %v1641_v55 = vld [vmem:[#allocation13 + $0x5a8] sm:$0xff] }
 0x361   : > { %v1427_v42 = vrot.slane %v1389_v56, %v6429_v50  ;;  %v1423_v46 = vrot.slane %v1389_v56, %v6426_v48  ;;  %v4991_v56 = vcombine.low %v1628_v39, %v1632_v40 }
 0x362   : > { %v1439_v28 = vrot.slane %v1419_v38, %v6426_v48  ;;  %v1435_v43 = vrot.slane %v1415_v49, %v6426_v48 }
 0x363   : > { %v1447_v29 = vrot.slane %v1427_v42, %v6426_v48  ;;  %v1443_v57 = vrot.slane %v1423_v46, %v6426_v48  ;;  %v5002_v42 = vcombine.high %v1637_v36, %v1641_v55  ;;  %v1644_v46 = vld [vmem:[#allocation13 + $0x5c0] sm:$0xff] }
 0x364   : > { %v1449_v30 = vadd.f32 %v1439_v28, %v1407_v44  ;;  %v1448_v22 = vadd.f32 %v1435_v43, %v1406_v47  ;;  %v1633_v44 = vld [vmem:[#allocation13 + $0x568] sm:$0xff]  ;;  %v4985_v47 = vcombine.low %v1621_v17, %v1625_v18  ;;  %v1648_v28 = vld [vmem:[#allocation13 + $0x5e0] sm:$0xff] }
 0x365   : > { %v1451_v24 = vadd.f32 %v1447_v29, %v1409_v51  ;;  %v6522_v21 = vadd.f32 %v1443_v57, %v1408_v53  ;;  %v4992_v51 = vcombine.high %v1628_v39, %v1632_v40  ;;  %v4994_v52 = vcombine.high %v1629_v41, %v1633_v44  ;;  %v1636_v53 = vld [vmem:[#allocation13 + $0x580] sm:$0xff]  ;;  %v1645_v43 = vld [vmem:[#allocation13 + $0x5c8] sm:$0xff] }
 0x366   : > { %v6524_v23 = vpack.c.bf16 %v1449_v30, %v1449_v30  ;;  %v6526_v26 = vpack.c.bf16 %v1448_v22, %v1448_v22  ;;  %v4993_v38 = vcombine.low %v1629_v41, %v1633_v44  ;;  %v5000_v49 = vcombine.high %v1636_v53, %v1640_v54  ;;  %v1649_v29 = vld [vmem:[#allocation13 + $0x5e8] sm:$0xff]  ;;  %v1676_v17 = vld [vmem:[#allocation13 + $0x6c0] sm:$0xff] }
 0x367   : > { %v6532_v8 = vpack.c.bf16 %v1451_v24, %v1451_v24  ;;  %v4999_v57 = vcombine.low %v1636_v53, %v1640_v54  ;;  %v5001_v30 = vcombine.low %v1637_v36, %v1641_v55  ;;  %v5008_v22 = vcombine.high %v1644_v46, %v1648_v28  ;;  %v1652_v24 = vld [vmem:[#allocation13 + $0x600] sm:$0xff] }
 0x368   : > { %3104 = vmatprep.mubr.bf16.mxu1 %v6524_v23  ;;  %3186 = vmatprep.mubr.bf16.mxu0 %v6524_v23  ;;  %v5010_v32 = vcombine.high %v1645_v43, %v1649_v29  ;;  %v5007_v27 = vcombine.low %v1644_v46, %v1648_v28  ;;  %v1680_v18 = vld [vmem:[#allocation13 + $0x6e0] sm:$0xff] }
 0x369   : > { %3105 = vmatmul.mubr.bf16.vlgmr.msra.gmra.mrb[4].mxu1 %v6526_v26  ;;  %3187 = vmatmul.mubr.bf16.vlgmr.msra.gmra.mrb[8].mxu0 %v6526_v26  ;;  %v5040_v39 = vcombine.high %v1676_v17, %v1680_v18  ;;  %v1684_v41 = vld [vmem:[#allocation13 + $0x700] sm:$0xff] }
 0x36a   : > { %3114 = vmatpush1.bf16.msra.mxu1 %v4951_v1  ;;  %3196 = vmatpush1.bf16.msra.mxu0 %v4953_v2  ;;  %v1620_v1 = vld [vmem:[#allocation13 + $0x500] sm:$0xff] }
 0x36b   : > { %3145 = vmatprep.mubr.bf16.mxu1 %v6532_v8  ;;  %3227 = vmatprep.mubr.bf16.mxu0 %v6532_v8  ;;  %v1624_v2 = vld [vmem:[#allocation13 + $0x520] sm:$0xff] }
 0x36c   : > { %3115 = vmatprep.subr.bf16.mxu1 %v4960_v3  ;;  %3197 = vmatprep.subr.bf16.mxu0 %v4962_v4  ;;  %v4984_v25 = vcombine.high %v1620_v1, %v1624_v2  ;;  %v4983_v45 = vcombine.low %v1620_v1, %v1624_v2  ;;  %v5009_v3 = vcombine.low %v1645_v43, %v1649_v29  ;;  %v1688_v44 = vld [vmem:[#allocation13 + $0x720] sm:$0xff] }
 0x36d   : > { %v5016_v4 = vcombine.high %v1652_v24, %v1656_v58  ;;  %v5032_v1 = vcombine.high %v1668_v15, %v1672_v16  ;;  %v5048_v53 = vcombine.high %v1684_v41, %v1688_v44  ;;  %v1692_v36 = vld [vmem:[#allocation13 + $0x740] sm:$0xff] }
 0x36e   : > { %3116 = vmatpush1.bf16.msra.mxu1 %v4959_v9  ;;  %3198 = vmatpush1.bf16.msra.mxu0 %v4961_v10  ;;  %v1661_v9 = vld [vmem:[#allocation13 + $0x648] sm:$0xff]  ;;  %v1696_v55 = vld [vmem:[#allocation13 + $0x760] sm:$0xff] }
 0x36f   : > { %3117 = vmatprep.subr.bf16.mxu1 %v4968_v11  ;;  %3199 = vmatprep.subr.bf16.mxu0 %v4970_v12  ;;  %v1665_v10 = vld [vmem:[#allocation13 + $0x668] sm:$0xff]  ;;  %v5015_v11 = vcombine.low %v1652_v24, %v1656_v58  ;;  %v5017_v12 = vcombine.low %v1653_v59, %v1657_v63  ;;  %v5056_v46 = vcombine.high %v1692_v36, %v1696_v55  ;;  %v1700_v43 = vld [vmem:[#allocation13 + $0x780] sm:$0xff] }
 0x370   : > { %v5026_v14 = vcombine.high %v1661_v9, %v1665_v10  ;;  %v1704_v29 = vld [vmem:[#allocation13 + $0x7a0] sm:$0xff] }
 0x371   : > { %v5064_v24 = vcombine.high %v1700_v43, %v1704_v29  ;;  %v1708_v59 = vld [vmem:[#allocation13 + $0x7c0] sm:$0xff] }
 0x372   : > { %3118 = vmatpush1.bf16.msra.mxu1 %v4967_v60  ;;  %3200 = vmatpush1.bf16.msra.mxu0 %v4969_v61  ;;  %v1669_v60 = vld [vmem:[#allocation13 + $0x688] sm:$0xff]  ;;  %v1712_v63 = vld [vmem:[#allocation13 + $0x7e0] sm:$0xff] }
 0x373   : > { %3119 = vmatprep.subr.bf16.mxu1 %v4976_v62  ;;  %3201 = vmatprep.subr.bf16.mxu0 %v4978_v0  ;;  %v1673_v61 = vld [vmem:[#allocation13 + $0x6a8] sm:$0xff]  ;;  %v5023_v62 = vcombine.low %v1660_v6, %v1664_v7  ;;  %v5025_v0 = vcombine.low %v1661_v9, %v1665_v10  ;;  %v5072_v6 = vcombine.high %v1708_v59, %v1712_v63  ;;  %v1462_v9 = vld [vmem:[#allocation13 + $0x10] sm:$0xff] }
 0x374   : > { %v5034_v2 = vcombine.high %v1669_v60, %v1673_v61  ;;  %v1466_v10 = vld [vmem:[#allocation13 + $0x30] sm:$0xff] }
 0x376   : > { %3120 = vmatpush1.bf16.msra.mxu1 %v4975_v19  ;;  %3202 = vmatpush1.bf16.msra.mxu0 %v4977_v20  ;;  %v1677_v19 = vld [vmem:[#allocation13 + $0x6c8] sm:$0xff] }
 0x377   : > { %3121 = vmatprep.subr.bf16.mxu1 %v4984_v25  ;;  %3203 = vmatprep.subr.bf16.mxu0 %v4986_v37  ;;  %v1681_v20 = vld [vmem:[#allocation13 + $0x6e8] sm:$0xff]  ;;  %v5031_v25 = vcombine.low %v1668_v15, %v1672_v16  ;;  %v5033_v37 = vcombine.low %v1669_v60, %v1673_v61  ;;  %v4828_v15 = vcombine.high %v1462_v9, %v1466_v10  ;;  %v1470_v60 = vld [vmem:[#allocation13 + $0x50] sm:$0xff] }
 0x378   : > { %v5042_v40 = vcombine.high %v1677_v19, %v1681_v20  ;;  %v1474_v61 = vld [vmem:[#allocation13 + $0x70] sm:$0xff] }
 0x37a   : > { %3122 = vmatpush1.bf16.msra.mxu1 %v4983_v45  ;;  %3204 = vmatpush1.bf16.msra.mxu0 %v4985_v47  ;;  %v1685_v45 = vld [vmem:[#allocation13 + $0x708] sm:$0xff] }
 0x37b   : > { %3123 = vmatprep.subr.bf16.mxu1 %v4992_v51  ;;  %3205 = vmatprep.subr.bf16.mxu0 %v4994_v52  ;;  %v1689_v47 = vld [vmem:[#allocation13 + $0x728] sm:$0xff]  ;;  %v5039_v51 = vcombine.low %v1676_v17, %v1680_v18  ;;  %v5041_v52 = vcombine.low %v1677_v19, %v1681_v20  ;;  %v4836_v18 = vcombine.high %v1470_v60, %v1474_v61  ;;  %v1478_v20 = vld [vmem:[#allocation13 + $0x90] sm:$0xff] }
 0x37c   : > { %v5050_v54 = vcombine.high %v1685_v45, %v1689_v47 }
 0x37e   : > { %3124 = vmatpush1.bf16.msra.mxu1 %v4991_v56  ;;  %3206 = vmatpush1.bf16.msra.mxu0 %v4993_v38  ;;  %v1693_v56 = vld [vmem:[#allocation13 + $0x748] sm:$0xff] }
 0x37f   : > { %3125 = vmatprep.subr.bf16.mxu1 %v5000_v49  ;;  %3207 = vmatprep.subr.bf16.mxu0 %v5002_v42  ;;  %v1697_v38 = vld [vmem:[#allocation13 + $0x768] sm:$0xff]  ;;  %v5047_v49 = vcombine.low %v1684_v41, %v1688_v44  ;;  %v5049_v42 = vcombine.low %v1685_v45, %v1689_v47  ;;  %v1486_v45 = vld [vmem:[#allocation13 + $0xd0] sm:$0xff] }
 0x380   : > { %v5058_v28 = vcombine.high %v1693_v56, %v1697_v38  ;;  %v1490_v47 = vld [vmem:[#allocation13 + $0xf0] sm:$0xff] }
 0x382   : > { %3126 = vmatpush1.bf16.msra.mxu1 %v4999_v57  ;;  %3208 = vmatpush1.bf16.msra.mxu0 %v5001_v30  ;;  %v1701_v57 = vld [vmem:[#allocation13 + $0x788] sm:$0xff] }
 0x383   : > { %3127 = vmatprep.subr.bf16.mxu1 %v5008_v22  ;;  %3209 = vmatprep.subr.bf16.mxu0 %v5010_v32  ;;  %v1705_v30 = vld [vmem:[#allocation13 + $0x7a8] sm:$0xff]  ;;  %v5055_v22 = vcombine.low %v1692_v36, %v1696_v55  ;;  %v5057_v32 = vcombine.low %v1693_v56, %v1697_v38  ;;  %v4852_v36 = vcombine.high %v1486_v45, %v1490_v47  ;;  %v1494_v56 = vld [vmem:[#allocation13 + $0x110] sm:$0xff] }
 0x384   : > { %v5066_v58 = vcombine.high %v1701_v57, %v1705_v30  ;;  %v1498_v38 = vld [vmem:[#allocation13 + $0x130] sm:$0xff] }
 0x386   : > { %3128 = vmatpush1.bf16.msra.mxu1 %v5007_v27  ;;  %3210 = vmatpush1.bf16.msra.mxu0 %v5009_v3  ;;  %v1709_v27 = vld [vmem:[#allocation13 + $0x7c8] sm:$0xff] }
 0x387   : > { %3129 = vmatprep.subr.bf16.mxu1 %v5016_v4  ;;  %3211 = vmatprep.subr.bf16.mxu0 %v5018_v5  ;;  %v1713_v3 = vld [vmem:[#allocation13 + $0x7e8] sm:$0xff]  ;;  %v5063_v4 = vcombine.low %v1700_v43, %v1704_v29  ;;  %v5065_v5 = vcombine.low %v1701_v57, %v1705_v30  ;;  %v1502_v29 = vld [vmem:[#allocation13 + $0x150] sm:$0xff]  ;;  %v1503_v30 = vld [vmem:[#allocation13 + $0x158] sm:$0xff] }
 0x388   : > { %v5074_v7 = vcombine.high %v1709_v27, %v1713_v3  ;;  %v1506_v57 = vld [vmem:[#allocation13 + $0x170] sm:$0xff] }
 0x38a   : > { %3130 = vmatpush1.bf16.msra.mxu1 %v5015_v11  ;;  %3212 = vmatpush1.bf16.msra.mxu0 %v5017_v12  ;;  %v1463_v11 = vld [vmem:[#allocation13 + $0x18] sm:$0xff] }
 0x38b   : > { %3131 = vmatprep.subr.bf16.mxu1 %v5024_v13  ;;  %3213 = vmatprep.subr.bf16.mxu0 %v5026_v14  ;;  %v1467_v12 = vld [vmem:[#allocation13 + $0x38] sm:$0xff]  ;;  %v5071_v13 = vcombine.low %v1708_v59, %v1712_v63  ;;  %v5073_v14 = vcombine.low %v1709_v27, %v1713_v3  ;;  %v1510_v63 = vld [vmem:[#allocation13 + $0x190] sm:$0xff] }
 0x38c   : > { %v4830_v16 = vcombine.high %v1463_v11, %v1467_v12  ;;  %v4829_v17 = vcombine.low %v1463_v11, %v1467_v12  ;;  %v1514_v27 = vld [vmem:[#allocation13 + $0x1b0] sm:$0xff]  ;;  %v1511_v3 = vld [vmem:[#allocation13 + $0x198] sm:$0xff] }
 0x38d   : > { %v1522_v11 = vld [vmem:[#allocation13 + $0x1f0] sm:$0xff]  ;;  %v1519_v12 = vld [vmem:[#allocation13 + $0x1d8] sm:$0xff] }
 0x38e   : > { %3132 = vmatpush1.bf16.msra.mxu1 %v5023_v62  ;;  %3214 = vmatpush1.bf16.msra.mxu0 %v5025_v0  ;;  %v1471_v62 = vld [vmem:[#allocation13 + $0x58] sm:$0xff] }
 0x38f   : > { %3133 = vmatprep.subr.bf16.mxu1 %v5032_v1  ;;  %3215 = vmatprep.subr.bf16.mxu0 %v5034_v2  ;;  %v1475_v0 = vld [vmem:[#allocation13 + $0x78] sm:$0xff]  ;;  %v4827_v1 = vcombine.low %v1462_v9, %v1466_v10  ;;  %v6544_v2 = vpack.c.bf16 %v6522_v21, %v6522_v21  ;;  %v1518_v10 = vld [vmem:[#allocation13 + $0x1d0] sm:$0xff] }
 0x390   : > { %v4838_v19 = vcombine.high %v1471_v62, %v1475_v0  ;;  %v4837_v21 = vcombine.low %v1471_v62, %v1475_v0  ;;  %v1530_v62 = vld [vmem:[#allocation13 + $0x230] sm:$0xff]  ;;  %v1527_v0 = vld [vmem:[#allocation13 + $0x218] sm:$0xff] }
 0x392   : > { %3134 = vmatpush1.bf16.msra.mxu1 %v5031_v25  ;;  %3216 = vmatpush1.bf16.msra.mxu0 %v5033_v37  ;;  %v1482_v25 = vld [vmem:[#allocation13 + $0xb0] sm:$0xff]  ;;  %v1479_v37 = vld [vmem:[#allocation13 + $0x98] sm:$0xff] }
 0x393   : > { %3135 = vmatprep.subr.bf16.mxu1 %v5040_v39  ;;  %3217 = vmatprep.subr.bf16.mxu0 %v5042_v40  ;;  %v1483_v39 = vld [vmem:[#allocation13 + $0xb8] sm:$0xff]  ;;  %v4835_v40 = vcombine.low %v1470_v60, %v1474_v61  ;;  %v4844_v41 = vcombine.high %v1478_v20, %v1482_v25  ;;  %v1526_v61 = vld [vmem:[#allocation13 + $0x210] sm:$0xff] }
 0x394   : > { %v4846_v44 = vcombine.high %v1479_v37, %v1483_v39 }
 0x396   : > { %3136 = vmatpush1.bf16.msra.mxu1 %v5039_v51  ;;  %3218 = vmatpush1.bf16.msra.mxu0 %v5041_v52  ;;  %v1487_v51 = vld [vmem:[#allocation13 + $0xd8] sm:$0xff] }
 0x397   : > { %3137 = vmatprep.subr.bf16.mxu1 %v5048_v53  ;;  %3219 = vmatprep.subr.bf16.mxu0 %v5050_v54  ;;  %v1491_v52 = vld [vmem:[#allocation13 + $0xf8] sm:$0xff]  ;;  %v4843_v53 = vcombine.low %v1478_v20, %v1482_v25  ;;  %v4845_v54 = vcombine.low %v1479_v37, %v1483_v39  ;;  %v1534_v25 = vld [vmem:[#allocation13 + $0x250] sm:$0xff] }
 0x398   : > { %v4854_v55 = vcombine.high %v1487_v51, %v1491_v52  ;;  %v1538_v37 = vld [vmem:[#allocation13 + $0x270] sm:$0xff]  ;;  %v1535_v39 = vld [vmem:[#allocation13 + $0x258] sm:$0xff] }
 0x39a   : > { %3138 = vmatpush1.bf16.msra.mxu1 %v5047_v49  ;;  %3220 = vmatpush1.bf16.msra.mxu0 %v5049_v42  ;;  %v1499_v49 = vld [vmem:[#allocation13 + $0x138] sm:$0xff]  ;;  %v4851_v42 = vcombine.low %v1486_v45, %v1490_v47  ;;  %v1542_v47 = vld [vmem:[#allocation13 + $0x290] sm:$0xff] }
 0x39b   : > { %3139 = vmatprep.subr.bf16.mxu1 %v5056_v46  ;;  %3221 = vmatprep.subr.bf16.mxu0 %v5058_v28  ;;  %v4853_v46 = vcombine.low %v1487_v51, %v1491_v52  ;;  %v4860_v28 = vcombine.high %v1494_v56, %v1498_v38  ;;  %v1546_v51 = vld [vmem:[#allocation13 + $0x2b0] sm:$0xff]  ;;  %v1543_v52 = vld [vmem:[#allocation13 + $0x298] sm:$0xff] }
 0x39e   : > { %3140 = vmatpush1.bf16.msra.mxu1 %v5055_v22  ;;  %3222 = vmatpush1.bf16.msra.mxu0 %v5057_v32  ;;  %v1507_v22 = vld [vmem:[#allocation13 + $0x178] sm:$0xff]  ;;  %v4859_v32 = vcombine.low %v1494_v56, %v1498_v38  ;;  %v1550_v38 = vld [vmem:[#allocation13 + $0x2d0] sm:$0xff] }
 0x39f   : > { %3141 = vmatprep.subr.bf16.mxu1 %v5064_v24  ;;  %3223 = vmatprep.subr.bf16.mxu0 %v5066_v58  ;;  %v4868_v58 = vcombine.high %v1502_v29, %v1506_v57  ;;  %v4870_v59 = vcombine.high %v1503_v30, %v1507_v22 }
 0x3a2   : > { %3142 = vmatpush1.bf16.msra.mxu1 %v5063_v4  ;;  %3224 = vmatpush1.bf16.msra.mxu0 %v5065_v5  ;;  %v1515_v4 = vld [vmem:[#allocation13 + $0x1b8] sm:$0xff]  ;;  %v4867_v5 = vcombine.low %v1502_v29, %v1506_v57  ;;  %v1558_v57 = vld [vmem:[#allocation13 + $0x310] sm:$0xff] }
 0x3a3   : > { %3143 = vmatprep.subr.bf16.mxu1 %v5072_v6  ;;  %3225 = vmatprep.subr.bf16.mxu0 %v5074_v7  ;;  %v4869_v6 = vcombine.low %v1503_v30, %v1507_v22  ;;  %v4876_v7 = vcombine.high %v1510_v63, %v1514_v27  ;;  %v4878_v9 = vcombine.high %v1511_v3, %v1515_v4  ;;  %v1562_v30 = vld [vmem:[#allocation13 + $0x330] sm:$0xff]  ;;  %v1559_v22 = vld [vmem:[#allocation13 + $0x318] sm:$0xff] }
 0x3a6   : > { %3144 = vmatpush1.bf16.msra.mxu1 %v5071_v13  ;;  %3226 = vmatpush1.bf16.msra.mxu0 %v5073_v14  ;;  %v1523_v13 = vld [vmem:[#allocation13 + $0x1f8] sm:$0xff]  ;;  %v4875_v14 = vcombine.low %v1510_v63, %v1514_v27  ;;  %v1566_v27 = vld [vmem:[#allocation13 + $0x350] sm:$0xff] }
 0x3a7   : > { %3236 = vmatprep.subr.bf16.mxu1 %v4828_v15  ;;  %3318 = vmatprep.subr.bf16.mxu0 %v4830_v16  ;;  %v4877_v15 = vcombine.low %v1511_v3, %v1515_v4  ;;  %v4884_v16 = vcombine.high %v1518_v10, %v1522_v11  ;;  %v4886_v60 = vcombine.high %v1519_v12, %v1523_v13  ;;  %v1570_v3 = vld [vmem:[#allocation13 + $0x370] sm:$0xff]  ;;  %v1567_v4 = vld [vmem:[#allocation13 + $0x358] sm:$0xff] }
 0x3a9   : > { %3146 = vmatmul.mubr.bf16.vlgmr.msra.gmra.mrb[4].mxu1 %v6544_v2  ;;  %3228 = vmatmul.mubr.bf16.vlgmr.msra.gmra.mrb[8].mxu0 %v6544_v2 }
 0x3aa   : > { %3237 = vmatpush1.bf16.msra.mxu1 %v4827_v1  ;;  %3268 = vmatprep.mubr.bf16.mxu1 %v6524_v23  ;;  %v1531_v1 = vld [vmem:[#allocation13 + $0x238] sm:$0xff] }
 0x3ab   : > { %3319 = vmatpush1.bf16.msra.mxu0 %v4829_v17  ;;  %3350 = vmatprep.mubr.bf16.mxu0 %v6524_v23  ;;  %v1495_v23 = vld [vmem:[#allocation13 + $0x118] sm:$0xff]  ;;  %v4883_v17 = vcombine.low %v1518_v10, %v1522_v11  ;;  %v4894_v20 = vcombine.high %v1527_v0, %v1531_v1  ;;  %v1574_v11 = vld [vmem:[#allocation13 + $0x390] sm:$0xff] }
 0x3ac   : > { %3238 = vmatprep.subr.bf16.mxu1 %v4836_v18  ;;  %3320 = vmatprep.subr.bf16.mxu0 %v4838_v19  ;;  %v4862_v43 = vcombine.high %v1495_v23, %v1499_v49  ;;  %v4861_v24 = vcombine.low %v1495_v23, %v1499_v49  ;;  %v4885_v18 = vcombine.low %v1519_v12, %v1523_v13  ;;  %v1554_v23 = vld [vmem:[#allocation13 + $0x2f0] sm:$0xff]  ;;  %v1551_v49 = vld [vmem:[#allocation13 + $0x2d8] sm:$0xff] }
 0x3ad   : > { %v4892_v19 = vcombine.high %v1526_v61, %v1530_v62  ;;  %v1578_v12 = vld [vmem:[#allocation13 + $0x3b0] sm:$0xff]  ;;  %v1575_v13 = vld [vmem:[#allocation13 + $0x398] sm:$0xff] }
 0x3ae   : > { %3239 = vmatpush1.bf16.msra.mxu1 %v4835_v40  ;;  %v1539_v40 = vld [vmem:[#allocation13 + $0x278] sm:$0xff] }
 0x3af   : > { %3321 = vmatpush1.bf16.msra.mxu0 %v4837_v21  ;;  %3240 = vmatprep.subr.bf16.mxu1 %v4844_v41  ;;  %v4891_v21 = vcombine.low %v1526_v61, %v1530_v62  ;;  %v4893_v41 = vcombine.low %v1527_v0, %v1531_v1  ;;  %v4902_v45 = vcombine.high %v1535_v39, %v1539_v40  ;;  %v1582_v62 = vld [vmem:[#allocation13 + $0x3d0] sm:$0xff]  ;;  %v1583_v1 = vld [vmem:[#allocation13 + $0x3d8] sm:$0xff] }
 0x3b0   : > { %3322 = vmatprep.subr.bf16.mxu0 %v4846_v44  ;;  %v4900_v44 = vcombine.high %v1534_v25, %v1538_v37  ;;  %v1586_v0 = vld [vmem:[#allocation13 + $0x3f0] sm:$0xff] }
 0x3b2   : > { %3241 = vmatpush1.bf16.msra.mxu1 %v4843_v53  ;;  %v1547_v53 = vld [vmem:[#allocation13 + $0x2b8] sm:$0xff] }
 0x3b3   : > { %3323 = vmatpush1.bf16.msra.mxu0 %v4845_v54  ;;  %3242 = vmatprep.subr.bf16.mxu1 %v4852_v36  ;;  %v4899_v54 = vcombine.low %v1534_v25, %v1538_v37  ;;  %v4901_v36 = vcombine.low %v1535_v39, %v1539_v40  ;;  %v4910_v56 = vcombine.high %v1543_v52, %v1547_v53  ;;  %v1590_v37 = vld [vmem:[#allocation13 + $0x410] sm:$0xff]  ;;  %v1591_v40 = vld [vmem:[#allocation13 + $0x418] sm:$0xff] }
 0x3b4   : > { %3324 = vmatprep.subr.bf16.mxu0 %v4854_v55  ;;  %v4908_v55 = vcombine.high %v1542_v47, %v1546_v51  ;;  %v1594_v39 = vld [vmem:[#allocation13 + $0x430] sm:$0xff] }
 0x3b6   : > { %3243 = vmatpush1.bf16.msra.mxu1 %v4851_v42  ;;  %v1555_v42 = vld [vmem:[#allocation13 + $0x2f8] sm:$0xff] }
 0x3b7   : > { %3325 = vmatpush1.bf16.msra.mxu0 %v4853_v46  ;;  %3244 = vmatprep.subr.bf16.mxu1 %v4860_v28  ;;  %v4907_v46 = vcombine.low %v1542_v47, %v1546_v51  ;;  %v4909_v28 = vcombine.low %v1543_v52, %v1547_v53  ;;  %v4918_v29 = vcombine.high %v1551_v49, %v1555_v42  ;;  %v1598_v51 = vld [vmem:[#allocation13 + $0x450] sm:$0xff] }
 0x3b8   : > { %3326 = vmatprep.subr.bf16.mxu0 %v4862_v43  ;;  %v4916_v43 = vcombine.high %v1550_v38, %v1554_v23  ;;  %v1602_v52 = vld [vmem:[#allocation13 + $0x470] sm:$0xff]  ;;  %v4955_v53 = vcombine.low %v1590_v37, %v1594_v39 }
 0x3ba   : > { %3245 = vmatpush1.bf16.msra.mxu1 %v4859_v32  ;;  %v1563_v32 = vld [vmem:[#allocation13 + $0x338] sm:$0xff] }
 0x3bb   : > { %3327 = vmatpush1.bf16.msra.mxu0 %v4861_v24  ;;  %3246 = vmatprep.subr.bf16.mxu1 %v4868_v58  ;;  %v4915_v24 = vcombine.low %v1550_v38, %v1554_v23  ;;  %v4917_v58 = vcombine.low %v1551_v49, %v1555_v42  ;;  %v4926_v63 = vcombine.high %v1559_v22, %v1563_v32  ;;  %v1606_v38 = vld [vmem:[#allocation13 + $0x490] sm:$0xff]  ;;  %v1607_v42 = vld [vmem:[#allocation13 + $0x498] sm:$0xff] }
 0x3bc   : > { %3328 = vmatprep.subr.bf16.mxu0 %v4870_v59  ;;  %v4924_v59 = vcombine.high %v1558_v57, %v1562_v30  ;;  %v1610_v23 = vld [vmem:[#allocation13 + $0x4b0] sm:$0xff] }
 0x3be   : > { %3247 = vmatpush1.bf16.msra.mxu1 %v4867_v5  ;;  %v1571_v5 = vld [vmem:[#allocation13 + $0x378] sm:$0xff] }
 0x3bf   : > { %3329 = vmatpush1.bf16.msra.mxu0 %v4869_v6  ;;  %3248 = vmatprep.subr.bf16.mxu1 %v4876_v7  ;;  %v4923_v6 = vcombine.low %v1558_v57, %v1562_v30  ;;  %v4925_v7 = vcombine.low %v1559_v22, %v1563_v32  ;;  %v4934_v10 = vcombine.high %v1567_v4, %v1571_v5  ;;  %v1614_v30 = vld [vmem:[#allocation13 + $0x4d0] sm:$0xff]  ;;  %v1615_v32 = vld [vmem:[#allocation13 + $0x4d8] sm:$0xff] }
 0x3c0   : > { %3330 = vmatprep.subr.bf16.mxu0 %v4878_v9  ;;  %v4932_v9 = vcombine.high %v1566_v27, %v1570_v3  ;;  %v1618_v22 = vld [vmem:[#allocation13 + $0x4f0] sm:$0xff] }
 0x3c2   : > { %3249 = vmatpush1.bf16.msra.mxu1 %v4875_v14  ;;  %v1579_v14 = vld [vmem:[#allocation13 + $0x3b8] sm:$0xff] }
 0x3c3   : > { %3331 = vmatpush1.bf16.msra.mxu0 %v4877_v15  ;;  %3250 = vmatprep.subr.bf16.mxu1 %v4884_v16  ;;  %v4931_v15 = vcombine.low %v1566_v27, %v1570_v3  ;;  %v4933_v16 = vcombine.low %v1567_v4, %v1571_v5  ;;  %v4942_v61 = vcombine.high %v1575_v13, %v1579_v14  ;;  %v1622_v27 = vld [vmem:[#allocation13 + $0x510] sm:$0xff]  ;;  %v1623_v4 = vld [vmem:[#allocation13 + $0x518] sm:$0xff] }
 0x3c4   : > { %3332 = vmatprep.subr.bf16.mxu0 %v4886_v60  ;;  %v4940_v60 = vcombine.high %v1574_v11, %v1578_v12  ;;  %v1626_v3 = vld [vmem:[#allocation13 + $0x530] sm:$0xff]  ;;  %v1627_v5 = vld [vmem:[#allocation13 + $0x538] sm:$0xff] }
 0x3c6   : > { %3251 = vmatpush1.bf16.msra.mxu1 %v4883_v17  ;;  %v1587_v17 = vld [vmem:[#allocation13 + $0x3f8] sm:$0xff] }
 0x3c7   : > { %3333 = vmatpush1.bf16.msra.mxu0 %v4885_v18  ;;  %3252 = vmatprep.subr.bf16.mxu1 %v4892_v19  ;;  %v4939_v18 = vcombine.low %v1574_v11, %v1578_v12  ;;  %v4941_v19 = vcombine.low %v1575_v13, %v1579_v14  ;;  %v4950_v25 = vcombine.high %v1583_v1, %v1587_v17  ;;  %v1634_v11 = vld [vmem:[#allocation13 + $0x570] sm:$0xff]  ;;  %v1631_v12 = vld [vmem:[#allocation13 + $0x558] sm:$0xff] }
 0x3c8   : > { %3334 = vmatprep.subr.bf16.mxu0 %v4894_v20  ;;  %v4948_v20 = vcombine.high %v1582_v62, %v1586_v0  ;;  %v1635_v13 = vld [vmem:[#allocation13 + $0x578] sm:$0xff]  ;;  %v4987_v14 = vcombine.low %v1622_v27, %v1626_v3 }
 0x3ca   : > { %3253 = vmatpush1.bf16.msra.mxu1 %v4891_v21  ;;  %v1595_v21 = vld [vmem:[#allocation13 + $0x438] sm:$0xff] }
 0x3cb   : > { %3335 = vmatpush1.bf16.msra.mxu0 %v4893_v41  ;;  %3254 = vmatprep.subr.bf16.mxu1 %v4900_v44  ;;  %v4947_v41 = vcombine.low %v1582_v62, %v1586_v0  ;;  %v4949_v44 = vcombine.low %v1583_v1, %v1587_v17  ;;  %v4958_v47 = vcombine.high %v1591_v40, %v1595_v21  ;;  %v1642_v62 = vld [vmem:[#allocation13 + $0x5b0] sm:$0xff]  ;;  %v1639_v0 = vld [vmem:[#allocation13 + $0x598] sm:$0xff] }
 0x3cc   : > { %3336 = vmatprep.subr.bf16.mxu0 %v4902_v45  ;;  %v4956_v45 = vcombine.high %v1590_v37, %v1594_v39  ;;  %v1643_v1 = vld [vmem:[#allocation13 + $0x5b8] sm:$0xff]  ;;  %v1650_v37 = vld [vmem:[#allocation13 + $0x5f0] sm:$0xff] }
 0x3cd   : > { %v1647_v39 = vld [vmem:[#allocation13 + $0x5d8] sm:$0xff] }
 0x3ce   : > { %3255 = vmatpush1.bf16.msra.mxu1 %v4899_v54  ;;  %v1599_v54 = vld [vmem:[#allocation13 + $0x458] sm:$0xff] }
 0x3cf   : > { %3337 = vmatpush1.bf16.msra.mxu0 %v4901_v36  ;;  %3256 = vmatprep.subr.bf16.mxu1 %v4908_v55  ;;  %v1603_v36 = vld [vmem:[#allocation13 + $0x478] sm:$0xff]  ;;  %v4957_v55 = vcombine.low %v1591_v40, %v1595_v21 }
 0x3d0   : > { %3338 = vmatprep.subr.bf16.mxu0 %v4910_v56  ;;  %v4964_v56 = vcombine.high %v1598_v51, %v1602_v52  ;;  %v4966_v49 = vcombine.high %v1599_v54, %v1603_v36  ;;  %v1651_v40 = vld [vmem:[#allocation13 + $0x5f8] sm:$0xff] }
 0x3d2   : > { %3257 = vmatpush1.bf16.msra.mxu1 %v4907_v46  ;;  %v1611_v46 = vld [vmem:[#allocation13 + $0x4b8] sm:$0xff] }
 0x3d3   : > { %3339 = vmatpush1.bf16.msra.mxu0 %v4909_v28  ;;  %3258 = vmatprep.subr.bf16.mxu1 %v4916_v43  ;;  %v4963_v28 = vcombine.low %v1598_v51, %v1602_v52  ;;  %v4965_v43 = vcombine.low %v1599_v54, %v1603_v36  ;;  %v4974_v57 = vcombine.high %v1607_v42, %v1611_v46  ;;  %v1658_v51 = vld [vmem:[#allocation13 + $0x630] sm:$0xff]  ;;  %v1655_v52 = vld [vmem:[#allocation13 + $0x618] sm:$0xff] }
 0x3d4   : > { %3340 = vmatprep.subr.bf16.mxu0 %v4918_v29  ;;  %v4972_v29 = vcombine.high %v1606_v38, %v1610_v23  ;;  %v5013_v36 = vcombine.low %v1647_v39, %v1651_v40 }
 0x3d6   : > { %3259 = vmatpush1.bf16.msra.mxu1 %v4915_v24  ;;  %v1619_v24 = vld [vmem:[#allocation13 + $0x4f8] sm:$0xff] }
 0x3d7   : > { %3341 = vmatpush1.bf16.msra.mxu0 %v4917_v58  ;;  %3260 = vmatprep.subr.bf16.mxu1 %v4924_v59  ;;  %v4971_v58 = vcombine.low %v1606_v38, %v1610_v23  ;;  %v4980_v59 = vcombine.high %v1614_v30, %v1618_v22  ;;  %v1662_v38 = vld [vmem:[#allocation13 + $0x650] sm:$0xff] }
 0x3d8   : > { %3342 = vmatprep.subr.bf16.mxu0 %v4926_v63  ;;  %v4982_v63 = vcombine.high %v1615_v32, %v1619_v24  ;;  %v1666_v23 = vld [vmem:[#allocation13 + $0x670] sm:$0xff] }
 0x3da   : > { %3261 = vmatpush1.bf16.msra.mxu1 %v4923_v6  ;;  %v4981_v6 = vcombine.low %v1615_v32, %v1619_v24  ;;  %v1675_v32 = vld [vmem:[#allocation13 + $0x6b8] sm:$0xff]  ;;  %v5027_v24 = vcombine.low %v1662_v38, %v1666_v23 }
 0x3db   : > { %3343 = vmatpush1.bf16.msra.mxu0 %v4925_v7  ;;  %3262 = vmatprep.subr.bf16.mxu1 %v4932_v9  ;;  %v4988_v7 = vcombine.high %v1622_v27, %v1626_v3  ;;  %v4990_v9 = vcombine.high %v1623_v4, %v1627_v5  ;;  %v1682_v27 = vld [vmem:[#allocation13 + $0x6f0] sm:$0xff]  ;;  %v1679_v3 = vld [vmem:[#allocation13 + $0x6d8] sm:$0xff] }
 0x3dc   : > { %3344 = vmatprep.subr.bf16.mxu0 %v4934_v10  ;;  %v1630_v10 = vld [vmem:[#allocation13 + $0x550] sm:$0xff] }
 0x3dd   : > { %v4995_v17 = vcombine.low %v1630_v10, %v1634_v11 }
 0x3de   : > { %3263 = vmatpush1.bf16.msra.mxu1 %v4931_v15  ;;  %v4989_v15 = vcombine.low %v1623_v4, %v1627_v5  ;;  %v1683_v4 = vld [vmem:[#allocation13 + $0x6f8] sm:$0xff] }
 0x3df   : > { %3345 = vmatpush1.bf16.msra.mxu0 %v4933_v16  ;;  %3264 = vmatprep.subr.bf16.mxu1 %v4940_v60  ;;  %v4996_v16 = vcombine.high %v1630_v10, %v1634_v11  ;;  %v4998_v60 = vcombine.high %v1631_v12, %v1635_v13  ;;  %v1690_v10 = vld [vmem:[#allocation13 + $0x730] sm:$0xff]  ;;  %v1687_v11 = vld [vmem:[#allocation13 + $0x718] sm:$0xff] }
 0x3e0   : > { %3346 = vmatprep.subr.bf16.mxu0 %v4942_v61  ;;  %v1638_v61 = vld [vmem:[#allocation13 + $0x590] sm:$0xff] }
 0x3e1   : > { %v5003_v21 = vcombine.low %v1638_v61, %v1642_v62 }
 0x3e2   : > { %3265 = vmatpush1.bf16.msra.mxu1 %v4939_v18  ;;  %v4997_v18 = vcombine.low %v1631_v12, %v1635_v13  ;;  %v1691_v12 = vld [vmem:[#allocation13 + $0x738] sm:$0xff] }
 0x3e3   : > { %3347 = vmatpush1.bf16.msra.mxu0 %v4941_v19  ;;  %3266 = vmatprep.subr.bf16.mxu1 %v4948_v20  ;;  %v5004_v19 = vcombine.high %v1638_v61, %v1642_v62  ;;  %v5006_v20 = vcombine.high %v1639_v0, %v1643_v1  ;;  %v1698_v61 = vld [vmem:[#allocation13 + $0x770] sm:$0xff]  ;;  %v1695_v62 = vld [vmem:[#allocation13 + $0x758] sm:$0xff] }
 0x3e4   : > { %3348 = vmatprep.subr.bf16.mxu0 %v4950_v25  ;;  %v1646_v25 = vld [vmem:[#allocation13 + $0x5d0] sm:$0xff] }
 0x3e5   : > { %v5011_v54 = vcombine.low %v1646_v25, %v1650_v37 }
 0x3e6   : > { %3267 = vmatpush1.bf16.msra.mxu1 %v4947_v41  ;;  %v5005_v41 = vcombine.low %v1639_v0, %v1643_v1  ;;  %v1699_v0 = vld [vmem:[#allocation13 + $0x778] sm:$0xff] }
 0x3e7   : > { %3349 = vmatpush1.bf16.msra.mxu0 %v4949_v44  ;;  %3277 = vmatprep.subr.bf16.mxu1 %v4956_v45  ;;  %v5012_v44 = vcombine.high %v1646_v25, %v1650_v37  ;;  %v5014_v45 = vcombine.high %v1647_v39, %v1651_v40  ;;  %v1706_v25 = vld [vmem:[#allocation13 + $0x7b0] sm:$0xff]  ;;  %v1703_v37 = vld [vmem:[#allocation13 + $0x798] sm:$0xff] }
 0x3e8   : > { %3359 = vmatprep.subr.bf16.mxu0 %v4958_v47  ;;  %v1654_v47 = vld [vmem:[#allocation13 + $0x610] sm:$0xff]  ;;  %v1707_v39 = vld [vmem:[#allocation13 + $0x7b8] sm:$0xff] }
 0x3e9   : > { %3269 = vmatmul.mubr.bf16.vlgmr.msra.gmra.mrb[8].mxu1 %v6526_v26 }
 0x3ea   : > { %3351 = vmatmul.mubr.bf16.vlgmr.msra.gmra.mrb[12].mxu0 %v6526_v26  ;;  %3278 = vmatpush1.bf16.msra.mxu1 %v4955_v53  ;;  %v4973_v26 = vcombine.low %v1607_v42, %v1611_v46  ;;  %v1659_v53 = vld [vmem:[#allocation13 + $0x638] sm:$0xff]  ;;  %v5019_v46 = vcombine.low %v1654_v47, %v1658_v51 }
 0x3eb   : > { %3309 = vmatprep.mubr.bf16.mxu1 %v6532_v8  ;;  %3360 = vmatpush1.bf16.msra.mxu0 %v4957_v55  ;;  %v5020_v55 = vcombine.high %v1654_v47, %v1658_v51  ;;  %v1667_v42 = vld [vmem:[#allocation13 + $0x678] sm:$0xff]  ;;  %v1714_v47 = vld [vmem:[#allocation13 + $0x7f0] sm:$0xff] }
 0x3ec   : > { %3391 = vmatprep.mubr.bf16.mxu0 %v6532_v8  ;;  %3279 = vmatprep.subr.bf16.mxu1 %v4964_v56  ;;  %v4979_v8 = vcombine.low %v1614_v30, %v1618_v22  ;;  %v5022_v56 = vcombine.high %v1655_v52, %v1659_v53  ;;  %v1674_v30 = vld [vmem:[#allocation13 + $0x6b0] sm:$0xff]  ;;  %v1671_v22 = vld [vmem:[#allocation13 + $0x698] sm:$0xff] }
 0x3ed   : > { %3361 = vmatprep.subr.bf16.mxu0 %v4966_v49  ;;  %v1663_v49 = vld [vmem:[#allocation13 + $0x658] sm:$0xff] }
 0x3ee   : > { %3280 = vmatpush1.bf16.msra.mxu1 %v4963_v28  ;;  %v5021_v28 = vcombine.low %v1655_v52, %v1659_v53  ;;  %v1711_v51 = vld [vmem:[#allocation13 + $0x7d8] sm:$0xff] }
 0x3ef   : > { %3362 = vmatpush1.bf16.msra.mxu0 %v4965_v43  ;;  %3281 = vmatprep.subr.bf16.mxu1 %v4972_v29  ;;  %v5028_v43 = vcombine.high %v1662_v38, %v1666_v23  ;;  %v5030_v29 = vcombine.high %v1663_v49, %v1667_v42  ;;  %v1715_v52 = vld [vmem:[#allocation13 + $0x7f8] sm:$0xff]  ;;  %v6556_v23 = vld [vmem:[#allocation15] sm:$0x77] }
 0x3f0   : > { %3363 = vmatprep.subr.bf16.mxu0 %v4974_v57  ;;  %v1670_v57 = vld [vmem:[#allocation13 + $0x690] sm:$0xff]  ;;  %v5077_v38 = vcombine.low %v1711_v51, %v1715_v52 }
 0x3f1   : > { %v5035_v5 = vcombine.low %v1670_v57, %v1674_v30 }
 0x3f2   : > { %3282 = vmatpush1.bf16.msra.mxu1 %v4971_v58  ;;  %v5029_v58 = vcombine.low %v1663_v49, %v1667_v42  ;;  %v6558_v49 = vld [vmem:[#allocation15 + $0x8] sm:$0x77]  ;;  %v1723_v42 = vrot.slane %v6556_v23, %v6401_v31 }
 0x3f3   : > { %3364 = vmatpush1.bf16.msra.mxu0 %v4973_v26  ;;  %3283 = vmatprep.subr.bf16.mxu1 %v4980_v59  ;;  %v5036_v26 = vcombine.high %v1670_v57, %v1674_v30  ;;  %v5038_v59 = vcombine.high %v1671_v22, %v1675_v32 }
 0x3f4   : > { %3365 = vmatprep.subr.bf16.mxu0 %v4982_v63  ;;  %v1678_v63 = vld [vmem:[#allocation13 + $0x6d0] sm:$0xff] }
 0x3f5   : > { %v5043_v13 = vcombine.low %v1678_v63, %v1682_v27 }
 0x3f6   : > { %3284 = vmatpush1.bf16.msra.mxu1 %v4979_v8  ;;  %v5037_v8 = vcombine.low %v1671_v22, %v1675_v32 }
 0x3f7   : > { %3366 = vmatpush1.bf16.msra.mxu0 %v4981_v6  ;;  %3285 = vmatprep.subr.bf16.mxu1 %v4988_v7  ;;  %v5044_v6 = vcombine.high %v1678_v63, %v1682_v27  ;;  %v5046_v7 = vcombine.high %v1679_v3, %v1683_v4 }
 0x3f8   : > { %3367 = vmatprep.subr.bf16.mxu0 %v4990_v9  ;;  %v1686_v9 = vld [vmem:[#allocation13 + $0x710] sm:$0xff] }
 0x3f9   : > { %v5051_v1 = vcombine.low %v1686_v9, %v1690_v10 }
 0x3fa   : > { %3286 = vmatpush1.bf16.msra.mxu1 %v4987_v14  ;;  %v5045_v14 = vcombine.low %v1679_v3, %v1683_v4 }
 0x3fb   : > { %3368 = vmatpush1.bf16.msra.mxu0 %v4989_v15  ;;  %3287 = vmatprep.subr.bf16.mxu1 %v4996_v16  ;;  %v5052_v15 = vcombine.high %v1686_v9, %v1690_v10  ;;  %v5054_v16 = vcombine.high %v1687_v11, %v1691_v12 }
 0x3fc   : > { %3369 = vmatprep.subr.bf16.mxu0 %v4998_v60  ;;  %v1694_v60 = vld [vmem:[#allocation13 + $0x750] sm:$0xff] }
 0x3fd   : > { %v5059_v40 = vcombine.low %v1694_v60, %v1698_v61 }
 0x3fe   : > { %3288 = vmatpush1.bf16.msra.mxu1 %v4995_v17  ;;  %v5053_v17 = vcombine.low %v1687_v11, %v1691_v12 }
 0x3ff   : > { %3370 = vmatpush1.bf16.msra.mxu0 %v4997_v18  ;;  %3289 = vmatprep.subr.bf16.mxu1 %v5004_v19  ;;  %v5060_v18 = vcombine.high %v1694_v60, %v1698_v61  ;;  %v5062_v19 = vcombine.high %v1695_v62, %v1699_v0 }
 0x400   : > { %3371 = vmatprep.subr.bf16.mxu0 %v5006_v20  ;;  %v1702_v20 = vld [vmem:[#allocation13 + $0x790] sm:$0xff] }
 0x401   : > { %v5067_v53 = vcombine.low %v1702_v20, %v1706_v25 }
 0x402   : > { %3290 = vmatpush1.bf16.msra.mxu1 %v5003_v21  ;;  %v5061_v21 = vcombine.low %v1695_v62, %v1699_v0 }
 0x403   : > { %3372 = vmatpush1.bf16.msra.mxu0 %v5005_v41  ;;  %3291 = vmatprep.subr.bf16.mxu1 %v5012_v44  ;;  %v5068_v41 = vcombine.high %v1702_v20, %v1706_v25  ;;  %v5070_v44 = vcombine.high %v1703_v37, %v1707_v39 }
 0x404   : > { %3373 = vmatprep.subr.bf16.mxu0 %v5014_v45  ;;  %v1710_v45 = vld [vmem:[#allocation13 + $0x7d0] sm:$0xff] }
 0x406   : > { %3292 = vmatpush1.bf16.msra.mxu1 %v5011_v54  ;;  %v5069_v54 = vcombine.low %v1703_v37, %v1707_v39 }
 0x407   : > { %3374 = vmatpush1.bf16.msra.mxu0 %v5013_v36  ;;  %3293 = vmatprep.subr.bf16.mxu1 %v5020_v55  ;;  %v5076_v36 = vcombine.high %v1710_v45, %v1714_v47  ;;  %v5078_v55 = vcombine.high %v1711_v51, %v1715_v52 }
 0x408   : > { %3375 = vmatprep.subr.bf16.mxu0 %v5022_v56  ;;  %v5075_v56 = vcombine.low %v1710_v45, %v1714_v47 }
 0x40a   : > { %3294 = vmatpush1.bf16.msra.mxu1 %v5019_v46  ;;  %v1731_v46 = vrot.slane %v6558_v49, %v6401_v31 }
 0x40b   : > { %3376 = vmatpush1.bf16.msra.mxu0 %v5021_v28  ;;  %3295 = vmatprep.subr.bf16.mxu1 %v5028_v43  ;;  %v1727_v28 = vrot.slane %v6556_v23, %v6406_v33  ;;  %v1735_v43 = vrot.slane %v6558_v49, %v6406_v33 }
 0x40c   : > { %3377 = vmatprep.subr.bf16.mxu0 %v5030_v29  ;;  %v1763_v29 = vrot.slane %v1723_v42, %v6401_v31 }
 0x40d   : > { %v1767_v57 = vrot.slane %v1727_v28, %v6401_v31  ;;  %v1775_v30 = vrot.slane %v1735_v43, %v6401_v31 }
 0x40e   : > { %3296 = vmatpush1.bf16.msra.mxu1 %v5027_v24 }
 0x40f   : > { %3378 = vmatpush1.bf16.msra.mxu0 %v5029_v58  ;;  %3297 = vmatprep.subr.bf16.mxu1 %v5036_v26 }
 0x410   : > { %3379 = vmatprep.subr.bf16.mxu0 %v5038_v59 }
 0x412   : > { %3298 = vmatpush1.bf16.msra.mxu1 %v5035_v5 }
 0x413   : > { %3380 = vmatpush1.bf16.msra.mxu0 %v5037_v8  ;;  %3299 = vmatprep.subr.bf16.mxu1 %v5044_v6 }
 0x414   : > { %3381 = vmatprep.subr.bf16.mxu0 %v5046_v7 }
 0x416   : > { %3300 = vmatpush1.bf16.msra.mxu1 %v5043_v13 }
 0x417   : > { %3382 = vmatpush1.bf16.msra.mxu0 %v5045_v14  ;;  %3301 = vmatprep.subr.bf16.mxu1 %v5052_v15 }
 0x418   : > { %3383 = vmatprep.subr.bf16.mxu0 %v5054_v16 }
 0x41a   : > { %3302 = vmatpush1.bf16.msra.mxu1 %v5051_v1 }
 0x41b   : > { %3384 = vmatpush1.bf16.msra.mxu0 %v5053_v17  ;;  %3303 = vmatprep.subr.bf16.mxu1 %v5060_v18 }
 0x41c   : > { %3385 = vmatprep.subr.bf16.mxu0 %v5062_v19 }
 0x41e   : > { %3304 = vmatpush1.bf16.msra.mxu1 %v5059_v40 }
 0x41f   : > { %3386 = vmatpush1.bf16.msra.mxu0 %v5061_v21  ;;  %3305 = vmatprep.subr.bf16.mxu1 %v5068_v41 }
 0x420   : > { %3387 = vmatprep.subr.bf16.mxu0 %v5070_v44 }
 0x422   : > { %3306 = vmatpush1.bf16.msra.mxu1 %v5067_v53 }
 0x423   : > { %3388 = vmatpush1.bf16.msra.mxu0 %v5069_v54  ;;  %3307 = vmatprep.subr.bf16.mxu1 %v5076_v36 }
 0x424   : > { %3389 = vmatprep.subr.bf16.mxu0 %v5078_v55 }
 0x426   : > { %3308 = vmatpush1.bf16.msra.mxu1 %v5075_v56 }
 0x427   : > { %3390 = vmatpush1.bf16.msra.mxu0 %v5077_v38 }
 0x429   : > { %3310 = vmatmul.mubr.bf16.vlgmr.msra.gmra.mrb[8].mxu1 %v6544_v2 }
 0x42a   : > { %3392 = vmatmul.mubr.bf16.vlgmr.msra.gmra.mrb[12].mxu0 %v6544_v2  ;;  %v1771_v2 = vrot.slane %v1731_v46, %v6401_v31 }
 0x47c   : > { %v3147_v22 = vpop.f32.mrb[4].mxu1  ;;  %v3229_v32 = vpop.f32.mrb[8].mxu0 }
 0x47d   : > { %v5252_v24 = vadd.f32 %v3147_v22, %v1763_v29  ;;  %v5254_v58 = vadd.f32 %v3229_v32, %v1771_v2  ;;  %v3149_v26 = vpop.f32.mrb[5].mxu1  ;;  %v3231_v59 = vpop.f32.mrb[9].mxu0 }
 0x47e   : > { %v5253_v63 = vadd.f32 %v3149_v26, %v1767_v57  ;;  %v5255_v27 = vadd.f32 %v3231_v59, %v1775_v30  ;;  %v3151_v3 = vpop.f32.mrb[6].mxu1  ;;  %v3233_v4 = vpop.f32.mrb[10].mxu0 }
 0x47f   : > { %vm3400_vm7 = vcmp.gt.f32.partialorder %v5252_v24, 0.0  ;;  %v3408_v5 = vmul.f32 0.2, %v5252_v24  ;;  %vm3402_vm8 = vcmp.gt.f32.partialorder %v5254_v58, 0.0  ;;  %v3410_v8 = vmul.f32 0.2, %v5254_v58 }
 0x480   : > { %vm3401_vm9 = vcmp.gt.f32.partialorder %v5253_v63, 0.0  ;;  %v3409_v6 = vmul.f32 0.2, %v5253_v63  ;;  %vm3403_vm10 = vcmp.gt.f32.partialorder %v5255_v27, 0.0  ;;  %v3411_v7 = vmul.f32 0.2, %v5255_v27 }
 0x481   : > { %v6572_v9 = vsel %vm3400_vm7, %v5252_v24, %v3408_v5  ;;  %v6574_v10 = vsel %vm3402_vm8, %v5254_v58, %v3410_v8  ;;  %v3152_v11 = vpop.f32.mrb[7].mxu1  ;;  %v3234_v12 = vpop.f32.mrb[11].mxu0 }
 0x482   : > { %v3424_v13 = vrot.slane %v6572_v9, 4  ;;  %v3480_v14 = vmul.f32 %v6572_v9, %v6572_v9  ;;  %v3436_v15 = vrot.slane %v6574_v10, 4  ;;  %v3482_v16 = vmul.f32 %v6574_v10, %v6574_v10 }
 0x483   : > { %v6582_v60 = vsel %vm3401_vm9, %v5253_v63, %v3409_v6  ;;  %v6584_v61 = vsel %vm3403_vm10, %v5255_v27, %v3411_v7 }
 0x484   : > { %v3425_v62 = vadd.f32 %v3424_v13, %v6572_v9  ;;  %v3488_v0 = vrot.slane %v3480_v14, 4  ;;  %v3437_v1 = vadd.f32 %v3436_v15, %v6574_v10  ;;  %v3500_v17 = vrot.slane %v3482_v16, 4 }
 0x485   : > { %v3430_v18 = vrot.slane %v6582_v60, 4  ;;  %v3481_v19 = vmul.f32 %v6582_v60, %v6582_v60  ;;  %v3442_v20 = vrot.slane %v6584_v61, 4  ;;  %v3483_v25 = vmul.f32 %v6584_v61, %v6584_v61 }
 0x486   : > { %v3426_v37 = vrot.slane %v3425_v62, 2  ;;  %v3489_v39 = vadd.f32 %v3488_v0, %v3480_v14  ;;  %v3438_v40 = vrot.slane %v3437_v1, 2  ;;  %v3501_v21 = vadd.f32 %v3500_v17, %v3482_v16 }
 0x487   : > { %v3431_v41 = vadd.f32 %v3430_v18, %v6582_v60  ;;  %v3494_v44 = vrot.slane %v3481_v19, 4  ;;  %v3443_v45 = vadd.f32 %v3442_v20, %v6584_v61  ;;  %v3506_v47 = vrot.slane %v3483_v25, 4 }
 0x488   : > { %v3427_v51 = vadd.f32 %v3426_v37, %v3425_v62  ;;  %v3490_v52 = vrot.slane %v3489_v39, 2  ;;  %v3439_v53 = vadd.f32 %v3438_v40, %v3437_v1  ;;  %v3502_v54 = vrot.slane %v3501_v21, 2 }
 0x489   : > { %v3432_v36 = vrot.slane %v3431_v41, 2  ;;  %v3495_v55 = vadd.f32 %v3494_v44, %v3481_v19  ;;  %v3444_v56 = vrot.slane %v3443_v45, 2  ;;  %v3507_v38 = vadd.f32 %v3506_v47, %v3483_v25 }
 0x48a   : > { %v3428_v42 = vrot.slane %v3427_v51, 1  ;;  %v3491_v46 = vadd.f32 %v3490_v52, %v3489_v39  ;;  %v3440_v28 = vrot.slane %v3439_v53, 1  ;;  %v3503_v43 = vadd.f32 %v3502_v54, %v3501_v21 }
 0x48b   : > { %v3433_v29 = vadd.f32 %v3432_v36, %v3431_v41  ;;  %v3496_v2 = vrot.slane %v3495_v55, 2  ;;  %v3445_v57 = vadd.f32 %v3444_v56, %v3443_v45  ;;  %v3508_v30 = vrot.slane %v3507_v38, 2 }
 0x48c   : > { %v3429_v22 = vadd.f32 %v3428_v42, %v3427_v51  ;;  %v3492_v32 = vrot.slane %v3491_v46, 1  ;;  %v3441_v24 = vadd.f32 %v3440_v28, %v3439_v53  ;;  %v3504_v58 = vrot.slane %v3503_v43, 1 }
 0x48d   : > { %v3434_v26 = vrot.slane %v3433_v29, 1  ;;  %v3497_v59 = vadd.f32 %v3496_v2, %v3495_v55  ;;  %v3446_v63 = vrot.slane %v3445_v57, 1  ;;  %v3509_v27 = vadd.f32 %v3508_v30, %v3507_v38 }
 0x48e   : > { %v3472_v3 = vmul.f32 0.125, %v3429_v22  ;;  %v3493_v4 = vadd.f32 %v3492_v32, %v3491_v46  ;;  %v3474_v5 = vmul.f32 0.125, %v3441_v24  ;;  %v3505_v8 = vadd.f32 %v3504_v58, %v3503_v43 }
 0x48f   : > { %v3435_v6 = vadd.f32 %v3434_v26, %v3433_v29  ;;  %v3498_v7 = vrot.slane %v3497_v59, 1  ;;  %v3447_v11 = vadd.f32 %v3446_v63, %v3445_v57  ;;  %v3510_v12 = vrot.slane %v3509_v27, 1 }
 0x490   : > { %v3536_v13 = vmul.f32 0.125, %v3493_v4  ;;  %v3544_v14 = vmul.f32 %v3472_v3, %v3472_v3  ;;  %v3538_v15 = vmul.f32 0.125, %v3505_v8  ;;  %v3546_v16 = vmul.f32 %v3474_v5, %v3474_v5 }
 0x491   : > { %v3473_v62 = vmul.f32 0.125, %v3435_v6  ;;  %v3499_v0 = vadd.f32 %v3498_v7, %v3497_v59  ;;  %v3475_v1 = vmul.f32 0.125, %v3447_v11  ;;  %v3511_v17 = vadd.f32 %v3510_v12, %v3509_v27 }
 0x492   : > { %v3552_v18 = vsub.f32 %v3536_v13, %v3544_v14  ;;  %v3554_v19 = vsub.f32 %v3538_v15, %v3546_v16 }
 0x493   : > { %v3537_v20 = vmul.f32 0.125, %v3499_v0  ;;  %v3545_v25 = vmul.f32 %v3473_v62, %v3473_v62  ;;  %v3539_v37 = vmul.f32 0.125, %v3511_v17  ;;  %v3547_v39 = vmul.f32 %v3475_v1, %v3475_v1 }
 0x494   : > { %v3560_v40 = vadd.f32 1e-05, %v3552_v18  ;;  %v3562_v21 = vadd.f32 1e-05, %v3554_v19  ;;  %v6620_v18 = vld [vmem:[#allocation15 + $0x10] sm:$0x77] }
 0x495   : > { %v3553_v41 = vsub.f32 %v3537_v20, %v3545_v25  ;;  %v3555_v44 = vsub.f32 %v3539_v37, %v3547_v39  ;;  %v6622_v19 = vld [vmem:[#allocation15 + $0x18] sm:$0x77]  ;;  %v1739_v20 = vrot.slane %v6620_v18, %v6401_v31  ;;  %v1743_v37 = vrot.slane %v6620_v18, %v6406_v33 }
 0x496   : > { %5541 = vrsqrt.f32 %v3560_v40  ;;  %v1747_v25 = vrot.slane %v6622_v19, %v6401_v31  ;;  %v1751_v39 = vrot.slane %v6622_v19, %v6406_v33 }
 0x497   : > { %v3561_v45 = vadd.f32 1e-05, %v3553_v41  ;;  %v3563_v47 = vadd.f32 1e-05, %v3555_v44  ;;  %5543 = vrsqrt.f32 %v3562_v21  ;;  %v1779_v40 = vrot.slane %v1739_v20, %v6401_v31 }
 0x498   : > { %v1787_v21 = vrot.slane %v1747_v25, %v6401_v31  ;;  %v1783_v41 = vrot.slane %v1743_v37, %v6401_v31  ;;  %v1791_v44 = vrot.slane %v1751_v39, %v6401_v31 }
 0x499   : > { %5545 = vrsqrt.f32 %v3561_v45 }
 0x49a   : > { %5547 = vrsqrt.f32 %v3563_v47 }
 0x4a0   : > { %v5542_v51 = vpop.eup %5541 }
 0x4a1   : > { %v5544_v52 = vpop.eup %5543 }
 0x4a3   : > { %v5546_v53 = vpop.eup %5545 }
 0x4a4   : > { %v5548_v54 = vpop.eup %5547  ;;  %v3584_v36 = vcombine.low %v5542_v51, %v5546_v53 }
 0x4a5   : > { %v3585_v55 = vcombine.low %v5544_v52, %v5548_v54 }
 0x4a6   : > { %v3588_v56 = vrot.slane %v3584_v36, 7 }
 0x4a7   : > { %v3589_v38 = vrot.slane %v3585_v55, 7 }
 0x4a8   : > { %v3596_v42 = vmul.f32 %v3588_v56, %v6556_v23 }
 0x4a9   : > { %v3597_v46 = vmul.f32 %v3589_v38, %v6558_v49 }
 0x4aa   : > { %v3607_v28 = vrot.slane %v3596_v42, %v6415_v34  ;;  %v3611_v43 = vrot.slane %v3596_v42, %v6418_v35 }
 0x4ab   : > { %v3615_v29 = vrot.slane %v3597_v46, %v6415_v34  ;;  %v3619_v2 = vrot.slane %v3597_v46, %v6418_v35 }
 0x4ac   : > { %v3644_v57 = vmul.f32 %v3607_v28, %v3472_v3  ;;  %v3645_v30 = vmul.f32 %v3611_v43, %v3473_v62  ;;  %v3679_v22 = vrot.slane %v3607_v28, %v6415_v34  ;;  %v3683_v32 = vrot.slane %v3611_v43, %v6415_v34 }
 0x4ad   : > { %v3646_v24 = vmul.f32 %v3615_v29, %v3474_v5  ;;  %v3647_v58 = vmul.f32 %v3619_v2, %v3475_v1  ;;  %v3687_v26 = vrot.slane %v3615_v29, %v6415_v34  ;;  %v3691_v59 = vrot.slane %v3619_v2, %v6415_v34 }
 0x4ae   : > { %v3660_v63 = vcombine.low %v3644_v57, %v3645_v30  ;;  %v3708_v27 = vmul.f32 %v3679_v22, %v6572_v9  ;;  %v3709_v4 = vmul.f32 %v3683_v32, %v6582_v60 }
 0x4af   : > { %v3661_v8 = vcombine.low %v3646_v24, %v3647_v58  ;;  %v3710_v6 = vmul.f32 %v3687_v26, %v6574_v10  ;;  %v3711_v3 = vmul.f32 %v3691_v59, %v6584_v61 }
 0x4b0   : > { %v3664_v7 = vrot.slane %v3660_v63, 6 }
 0x4b1   : > { %v3665_v11 = vrot.slane %v3661_v8, 6 }
 0x4b2   : > { %v3672_v12 = vsub.f32 %v6556_v23, %v3664_v7 }
 0x4b3   : > { %v3673_v5 = vsub.f32 %v6558_v49, %v3665_v11 }
 0x4b4   : > { %v3723_v13 = vrot.slane %v3672_v12, %v6426_v48  ;;  %v3727_v14 = vrot.slane %v3672_v12, %v6429_v50 }
 0x4b5   : > { %v3731_v15 = vrot.slane %v3673_v5, %v6426_v48  ;;  %v3735_v9 = vrot.slane %v3673_v5, %v6429_v50 }
 0x4b6   : > { %v3763_v60 = vrot.slane %v3723_v13, %v6426_v48  ;;  %v3767_v10 = vrot.slane %v3727_v14, %v6426_v48 }
 0x4b7   : > { %v3771_v61 = vrot.slane %v3731_v15, %v6426_v48  ;;  %v3775_v16 = vrot.slane %v3735_v9, %v6426_v48 }
 0x4b8   : > { %v3792_v62 = vadd.f32 %v3763_v60, %v3708_v27  ;;  %v3793_v23 = vadd.f32 %v3767_v10, %v3709_v4 }
 0x4b9   : > { %v3794_v0 = vadd.f32 %v3771_v61, %v3710_v6  ;;  %v3795_v49 = vadd.f32 %v3775_v16, %v3711_v3 }
 0x4ba   : > { %v5160_v1 = vpack.c.bf16 %v3793_v23, %v3792_v62 }
 0x4bb   : > { %v5161_v17 = vpack.c.bf16 %v3795_v49, %v3794_v0 }
 0x4bc   : > { %3832 = vst [vmem:[#allocation3] sm:$0xff] %v5160_v1 }
 0x4bd   : > { %3833 = vst [vmem:[#allocation3 + $0x8] sm:$0xff] %v5161_v17 }
 0x4fc   : > { %v3311_v45 = vpop.f32.mrb[8].mxu1 }
 0x4fd   : > { %v5256_v47 = vadd.f32 %v3311_v45, %v1779_v40  ;;  %v3393_v51 = vpop.f32.mrb[12].mxu0  ;;  %v3313_v52 = vpop.f32.mrb[9].mxu1 }
 0x4fe   : > { %v5258_v53 = vadd.f32 %v3393_v51, %v1787_v21  ;;  %v5257_v54 = vadd.f32 %v3313_v52, %v1783_v41  ;;  %v3395_v36 = vpop.f32.mrb[13].mxu0  ;;  %v3315_v55 = vpop.f32.mrb[10].mxu1 }
 0x4ff   : > { %vm3404_vm11 = vcmp.gt.f32.partialorder %v5256_v47, 0.0  ;;  %v3412_v56 = vmul.f32 0.2, %v5256_v47  ;;  %v5259_v38 = vadd.f32 %v3395_v36, %v1791_v44  ;;  %v3397_v33 = vpop.f32.mrb[14].mxu0  ;;  %v3316_v42 = vpop.f32.mrb[11].mxu1 }
 0x500   : > { %vm3406_vm12 = vcmp.gt.f32.partialorder %v5258_v53, 0.0  ;;  %v3414_v46 = vmul.f32 0.2, %v5258_v53  ;;  %vm3405_vm13 = vcmp.gt.f32.partialorder %v5257_v54, 0.0  ;;  %v3413_v28 = vmul.f32 0.2, %v5257_v54 }
 0x501   : > { %v6636_v43 = vsel %vm3404_vm11, %v5256_v47, %v3412_v56  ;;  %vm3407_vm14 = vcmp.gt.f32.partialorder %v5259_v38, 0.0  ;;  %v3415_v31 = vmul.f32 0.2, %v5259_v38  ;;  %v3398_v29 = vpop.f32.mrb[15].mxu0 }
 0x502   : > { %v3448_v2 = vrot.slane %v6636_v43, 4  ;;  %v3484_v57 = vmul.f32 %v6636_v43, %v6636_v43  ;;  %v6641_v30 = vsel %vm3406_vm12, %v5258_v53, %v3414_v46  ;;  %v6643_v22 = vsel %vm3405_vm13, %v5257_v54, %v3413_v28 }
 0x503   : > { %v3460_v32 = vrot.slane %v6641_v30, 4  ;;  %v3486_v24 = vmul.f32 %v6641_v30, %v6641_v30  ;;  %v3454_v58 = vrot.slane %v6643_v22, 4  ;;  %v3485_v26 = vmul.f32 %v6643_v22, %v6643_v22 }
 0x504   : > { %v3449_v59 = vadd.f32 %v3448_v2, %v6636_v43  ;;  %v3512_v63 = vrot.slane %v3484_v57, 4  ;;  %v6652_v27 = vsel %vm3407_vm14, %v5259_v38, %v3415_v31 }
 0x505   : > { %v3461_v4 = vadd.f32 %v3460_v32, %v6641_v30  ;;  %v3524_v8 = vrot.slane %v3486_v24, 4  ;;  %v3455_v6 = vadd.f32 %v3454_v58, %v6643_v22  ;;  %v3518_v3 = vrot.slane %v3485_v26, 4 }
 0x506   : > { %v3450_v7 = vrot.slane %v3449_v59, 2  ;;  %v3513_v11 = vadd.f32 %v3512_v63, %v3484_v57  ;;  %v3466_v12 = vrot.slane %v6652_v27, 4  ;;  %v3487_v5 = vmul.f32 %v6652_v27, %v6652_v27 }
 0x507   : > { %v3462_v13 = vrot.slane %v3461_v4, 2  ;;  %v3525_v14 = vadd.f32 %v3524_v8, %v3486_v24  ;;  %v3456_v15 = vrot.slane %v3455_v6, 2  ;;  %v3519_v9 = vadd.f32 %v3518_v3, %v3485_v26 }
 0x508   : > { %v3451_v60 = vadd.f32 %v3450_v7, %v3449_v59  ;;  %v3514_v10 = vrot.slane %v3513_v11, 2  ;;  %v3467_v61 = vadd.f32 %v3466_v12, %v6652_v27  ;;  %v3530_v16 = vrot.slane %v3487_v5, 4 }
 0x509   : > { %v3463_v62 = vadd.f32 %v3462_v13, %v3461_v4  ;;  %v3526_v23 = vrot.slane %v3525_v14, 2  ;;  %v3457_v0 = vadd.f32 %v3456_v15, %v3455_v6  ;;  %v3520_v49 = vrot.slane %v3519_v9, 2 }
 0x50a   : > { %v3452_v1 = vrot.slane %v3451_v60, 1  ;;  %v3515_v17 = vadd.f32 %v3514_v10, %v3513_v11  ;;  %v3468_v20 = vrot.slane %v3467_v61, 2  ;;  %v3531_v25 = vadd.f32 %v3530_v16, %v3487_v5 }
 0x50b   : > { %v3464_v37 = vrot.slane %v3463_v62, 1  ;;  %v3527_v39 = vadd.f32 %v3526_v23, %v3525_v14  ;;  %v3458_v40 = vrot.slane %v3457_v0, 1  ;;  %v3521_v21 = vadd.f32 %v3520_v49, %v3519_v9 }
 0x50c   : > { %v3453_v41 = vadd.f32 %v3452_v1, %v3451_v60  ;;  %v3516_v44 = vrot.slane %v3515_v17, 1  ;;  %v3469_v45 = vadd.f32 %v3468_v20, %v3467_v61  ;;  %v3532_v47 = vrot.slane %v3531_v25, 2 }
 0x50d   : > { %v3465_v51 = vadd.f32 %v3464_v37, %v3463_v62  ;;  %v3528_v52 = vrot.slane %v3527_v39, 1  ;;  %v3459_v53 = vadd.f32 %v3458_v40, %v3457_v0  ;;  %v3522_v54 = vrot.slane %v3521_v21, 1 }
 0x50e   : > { %v3476_v36 = vmul.f32 0.125, %v3453_v41  ;;  %v3517_v55 = vadd.f32 %v3516_v44, %v3515_v17  ;;  %v3470_v56 = vrot.slane %v3469_v45, 1  ;;  %v3533_v38 = vadd.f32 %v3532_v47, %v3531_v25 }
 0x50f   : > { %v3478_v33 = vmul.f32 0.125, %v3465_v51  ;;  %v3529_v42 = vadd.f32 %v3528_v52, %v3527_v39  ;;  %v3477_v46 = vmul.f32 0.125, %v3459_v53  ;;  %v3523_v28 = vadd.f32 %v3522_v54, %v3521_v21 }
 0x510   : > { %v3540_v31 = vmul.f32 0.125, %v3517_v55  ;;  %v3548_v29 = vmul.f32 %v3476_v36, %v3476_v36  ;;  %v3471_v2 = vadd.f32 %v3470_v56, %v3469_v45  ;;  %v3534_v57 = vrot.slane %v3533_v38, 1 }
 0x511   : > { %v3542_v32 = vmul.f32 0.125, %v3529_v42  ;;  %v3550_v24 = vmul.f32 %v3478_v33, %v3478_v33  ;;  %v3541_v58 = vmul.f32 0.125, %v3523_v28  ;;  %v3549_v26 = vmul.f32 %v3477_v46, %v3477_v46 }
 0x512   : > { %v3556_v59 = vsub.f32 %v3540_v31, %v3548_v29  ;;  %v3479_v63 = vmul.f32 0.125, %v3471_v2  ;;  %v3535_v4 = vadd.f32 %v3534_v57, %v3533_v38 }
 0x513   : > { %v3558_v8 = vsub.f32 %v3542_v32, %v3550_v24  ;;  %v3557_v6 = vsub.f32 %v3541_v58, %v3549_v26 }
 0x514   : > { %v3564_v3 = vadd.f32 1e-05, %v3556_v59  ;;  %v3543_v7 = vmul.f32 0.125, %v3535_v4  ;;  %v3551_v11 = vmul.f32 %v3479_v63, %v3479_v63 }
 0x515   : > { %v3566_v12 = vadd.f32 1e-05, %v3558_v8  ;;  %v3565_v5 = vadd.f32 1e-05, %v3557_v6 }
 0x516   : > { %5549 = vrsqrt.f32 %v3564_v3  ;;  %v3559_v13 = vsub.f32 %v3543_v7, %v3551_v11 }
 0x517   : > { %5551 = vrsqrt.f32 %v3566_v12 }
 0x518   : > { %5553 = vrsqrt.f32 %v3565_v5  ;;  %v3567_v14 = vadd.f32 1e-05, %v3559_v13 }
 0x51a   : > { %5555 = vrsqrt.f32 %v3567_v14 }
 0x520   : > { %v5550_v15 = vpop.eup %5549 }
 0x521   : > { %v5552_v9 = vpop.eup %5551 }
 0x522   : > { %v5554_v60 = vpop.eup %5553 }
 0x523   : > { %v3586_v10 = vcombine.low %v5550_v15, %v5554_v60 }
 0x524   : > { %v5556_v61 = vpop.eup %5555 }
 0x525   : > { %v3590_v16 = vrot.slane %v3586_v10, 7  ;;  %v3587_v62 = vcombine.low %v5552_v9, %v5556_v61 }
 0x527   : > { %v3598_v23 = vmul.f32 %v3590_v16, %v6620_v18  ;;  %v3591_v0 = vrot.slane %v3587_v62, 7 }
 0x529   : > { %v3623_v49 = vrot.slane %v3598_v23, %v6415_v34  ;;  %v3627_v1 = vrot.slane %v3598_v23, %v6418_v35  ;;  %v3599_v17 = vmul.f32 %v3591_v0, %v6622_v19 }
 0x52b   : > { %v3648_v20 = vmul.f32 %v3623_v49, %v3476_v36  ;;  %v3649_v25 = vmul.f32 %v3627_v1, %v3477_v46  ;;  %v3695_v37 = vrot.slane %v3623_v49, %v6415_v34  ;;  %v3699_v39 = vrot.slane %v3627_v1, %v6415_v34 }
 0x52c   : > { %v3631_v40 = vrot.slane %v3599_v17, %v6415_v34  ;;  %v3635_v21 = vrot.slane %v3599_v17, %v6418_v35 }
 0x52d   : > { %v3662_v41 = vcombine.low %v3648_v20, %v3649_v25  ;;  %v3712_v44 = vmul.f32 %v3695_v37, %v6636_v43  ;;  %v3713_v45 = vmul.f32 %v3699_v39, %v6643_v22 }
 0x52e   : > { %v3650_v47 = vmul.f32 %v3631_v40, %v3478_v33  ;;  %v3651_v51 = vmul.f32 %v3635_v21, %v3479_v63  ;;  %v3703_v52 = vrot.slane %v3631_v40, %v6415_v34  ;;  %v3707_v53 = vrot.slane %v3635_v21, %v6415_v34 }
 0x52f   : > { %v3666_v54 = vrot.slane %v3662_v41, 6 }
 0x530   : > { %v3663_v36 = vcombine.low %v3650_v47, %v3651_v51  ;;  %v3714_v55 = vmul.f32 %v3703_v52, %v6641_v30  ;;  %v3715_v56 = vmul.f32 %v3707_v53, %v6652_v27 }
 0x531   : > { %v3674_v38 = vsub.f32 %v6620_v18, %v3666_v54 }
 0x532   : > { %v3667_v35 = vrot.slane %v3663_v36, 6 }
 0x533   : > { %v3739_v42 = vrot.slane %v3674_v38, %v6426_v48  ;;  %v3743_v43 = vrot.slane %v3674_v38, %v6429_v50 }
 0x534   : > { %v3675_v22 = vsub.f32 %v6622_v19, %v3667_v35 }
 0x535   : > { %v3779_v33 = vrot.slane %v3739_v42, %v6426_v48  ;;  %v3783_v46 = vrot.slane %v3743_v43, %v6426_v48 }
 0x536   : > { %v3747_v34 = vrot.slane %v3675_v22, %v6426_v48  ;;  %v3751_v28 = vrot.slane %v3675_v22, %v6429_v50 }
 0x537   : > { %v3796_v30 = vadd.f32 %v3779_v33, %v3712_v44  ;;  %v3797_v31 = vadd.f32 %v3783_v46, %v3713_v45 }
 0x538   : > { %v3787_v27 = vrot.slane %v3747_v34, %v6426_v48  ;;  %v3791_v18 = vrot.slane %v3751_v28, %v6426_v48 }
 0x539   : > { %v5162_v29 = vpack.c.bf16 %v3797_v31, %v3796_v30 }
 0x53a   : > { %v3798_v2 = vadd.f32 %v3787_v27, %v3714_v55  ;;  %v3799_v57 = vadd.f32 %v3791_v18, %v3715_v56 }
 0x53b   : > { %3834 = vst [vmem:[#allocation3 + $0x10] sm:$0xff] %v5162_v29 }
 0x53c   : > { %v5163_v32 = vpack.c.bf16 %v3799_v57, %v3798_v2 }
 0x53e   : > { %3835 = vst [vmem:[#allocation3 + $0x18] sm:$0xff] %v5163_v32 }
 0x53f PF: > { %v5557_v50 = vld [vmem:[%s6370_s27 + $0x40] sm:$0xff]   ;;  %v5561_v58 = vld [vmem:[%s6370_s27 + $0x48] sm:$0xff]   ;;  %v5565_v4 = vld [vmem:[%s6370_s27 + $0x50] sm:$0xff]   ;;  %s5157_s21 = sshll.u32 %s6063_s15, 7  ;;  %s4563_s19 = sshll.u32 %s6378_s25, 4  ;;  %s6757_s19 = int_to_ptr.vmem [resolvable:$true] %s4563_s19 }
 0x540   : > { %v5558_v19 = vld [vmem:[%s6370_s27 + $0xc0] sm:$0xff]   ;;  %5164 = vmatprep.subr.bf16.mxu0 %v5557_v50  ;;  %v5562_v26 = vld [vmem:[%s6370_s27 + $0xc8] sm:$0xff]   ;;  %v5566_v8 = vld [vmem:[%s6370_s27 + $0xd0] sm:$0xff]   ;;  %s6861_s13 = sld [smem:[#allocation34_spill]]  ;;  %s4550_s30 = scalar_lea.sflag [#allocation6], %s6367_s14 }
 0x541   : > { %v5559_v48 = vld [vmem:[%s6370_s27] sm:$0xff]   ;;  %5186 = vmatprep.subr.bf16.mxu1 %v5558_v19  ;;  %v5563_v59 = vld [vmem:[%s6370_s27 + $0x8] sm:$0xff]   ;;  %v5567_v6 = vld [vmem:[%s6370_s27 + $0x10] sm:$0xff]   ;;  %s5887_s3 = scalar_lea.vmem %s6757_s19, 128  ;;  %p6862_p1 = scmp.ne.s32.totalorder %s6840_s28, 0 }
 0x542   : > { %v5560_v24 = vld [vmem:[%s6370_s27 + $0x80] sm:$0xff]   ;;  %5165 = vmatpush3.bf16.msra.mxu0 %v5559_v48  ;;  %v5564_v63 = vld [vmem:[%s6370_s27 + $0x88] sm:$0xff]   ;;  %v5568_v3 = vld [vmem:[%s6370_s27 + $0x90] sm:$0xff]   ;;  %p5888_p11 = scmp.ne.s32.totalorder %s6757_s19, %s5887_s3  ;;  %s5991_s15 = smov [#allocation19]  }
 0x543   : > { %5187 = vmatpush3.bf16.msra.mxu1 %v5560_v24  ;;  %5166 = vmatprep.subr.bf16.mxu0 %v5561_v58  ;;  %v5569_v7 = vld [vmem:[%s6370_s27 + $0x58] sm:$0xff]   ;;  %v5573_v13 = vld [vmem:[%s6370_s27 + $0x60] sm:$0xff]   ;;  %v5577_v60 = vld [vmem:[%s6370_s27 + $0x68] sm:$0xff]   ;;  %s5891_s26 = sshll.u32 %s5991_s15, 4  ;;  %s5892_s26 = int_to_ptr.vmem [resolvable:$false] %s5891_s26 }
 0x544   : > { %5188 = vmatprep.subr.bf16.mxu1 %v5562_v26  ;;  %v5570_v11 = vld [vmem:[%s6370_s27 + $0xd8] sm:$0xff]   ;;  %v5574_v14 = vld [vmem:[%s6370_s27 + $0xe0] sm:$0xff]   ;;  %v5578_v10 = vld [vmem:[%s6370_s27 + $0xe8] sm:$0xff]   ;;  %p5889_p13 = pnand %p5888_p11, %p6862_p1  ;;  %s5893_s18 = scalar_lea.vmem %s5892_s26, 256 }
 0x545   : > { %v5571_v12 = vld [vmem:[%s6370_s27 + $0x18] sm:$0xff]   ;;  %v5575_v15 = vld [vmem:[%s6370_s27 + $0x20] sm:$0xff]   ;;  %v5579_v61 = vld [vmem:[%s6370_s27 + $0x28] sm:$0xff]   ;;  %p5894_p3 = scmp.lt.s32.totalorder %s6757_s19, %s5892_s26  ;;  %p5895_p4 = scmp.lt.s32.totalorder %s5893_s18, %s5887_s3 }
 0x546   : > { %5167 = vmatpush3.bf16.msra.mxu0 %v5563_v59  ;;  %v5572_v5 = vld [vmem:[%s6370_s27 + $0x98] sm:$0xff]   ;;  %v5576_v9 = vld [vmem:[%s6370_s27 + $0xa0] sm:$0xff]   ;;  %v5580_v16 = vld [vmem:[%s6370_s27 + $0xa8] sm:$0xff]   ;;  %s6755_s23 = scalar_lea.hbm %s6861_s13, %s5157_s21  ;;  %p5890_p6 = pneg %p5889_p13 }
 0x547   : > { %5189 = vmatpush3.bf16.msra.mxu1 %v5564_v63  ;;  %5168 = vmatprep.subr.bf16.mxu0 %v5565_v4  ;;  %v5581_v62 = vld [vmem:[%s6370_s27 + $0x70] sm:$0xff]   ;;  %v5585_v1 = vld [vmem:[%s6370_s27 + $0x78] sm:$0xff]   ;;  %v3836_v37 = vld [vmem:[#allocation3] sm:$0xff]  ;;  %p5896_p12 = por %p5895_p4, %p5894_p3 }
 0x548   : > { %5190 = vmatprep.subr.bf16.mxu1 %v5566_v8  ;;  %v5582_v23 = vld [vmem:[%s6370_s27 + $0xf0] sm:$0xff]   ;;  %v5586_v17 = vld [vmem:[%s6370_s27 + $0xf8] sm:$0xff]   ;;  %v3837_v39 = vld [vmem:[#allocation3 + $0x8] sm:$0xff]  ;;  %v5084_v40 = vcombine.low %v3836_v37, %v3836_v37  ;;  %v5085_v21 = vcombine.high %v3836_v37, %v3836_v37 }
 0x549   : > { %v5583_v0 = vld [vmem:[%s6370_s27 + $0x30] sm:$0xff]   ;;  %v5587_v20 = vld [vmem:[%s6370_s27 + $0x38] sm:$0xff]   ;;  %v5086_v41 = vcombine.low %v3837_v39, %v3837_v39  ;;  %v5087_v44 = vcombine.high %v3837_v39, %v3837_v39  ;;  %v5593_v45 = vld [vmem:[%s6370_s27 + $0x140] sm:$0xff]   ;;  %p5897_p0 = pnand %p5896_p12, %p5890_p6 }
 0x54a   : > { %5169 = vmatpush3.bf16.msra.mxu0 %v5567_v6  ;;  %v5584_v49 = vld [vmem:[%s6370_s27 + $0xb0] sm:$0xff]   ;;  %v5588_v25 = vld [vmem:[%s6370_s27 + $0xb8] sm:$0xff]   ;;  %v5594_v47 = vld [vmem:[%s6370_s27 + $0x1c0] sm:$0xff]   ;;  %4419 = vmatprep.mubr.bf16.mxu0 %v5085_v21 }
 0x54b   : > { %5191 = vmatpush3.bf16.msra.mxu1 %v5568_v3  ;;  %5170 = vmatprep.subr.bf16.mxu0 %v5569_v7  ;;  %v5595_v51 = vld [vmem:[%s6370_s27 + $0x100] sm:$0xff]   ;;  %v5597_v53 = vld [vmem:[%s6370_s27 + $0x148] sm:$0xff]   ;;  %v5601_v56 = vld [vmem:[%s6370_s27 + $0x150] sm:$0xff]  }
 0x54c   : > { %5192 = vmatprep.subr.bf16.mxu1 %v5570_v11  ;;  %4459 = vmatprep.mubr.bf16.mxu1 %v5087_v44  ;;  %v5596_v52 = vld [vmem:[%s6370_s27 + $0x180] sm:$0xff]   ;;  %v5598_v54 = vld [vmem:[%s6370_s27 + $0x1c8] sm:$0xff]   ;;  %v5602_v38 = vld [vmem:[%s6370_s27 + $0x1d0] sm:$0xff]  }
 0x54d   : > { %v5599_v36 = vld [vmem:[%s6370_s27 + $0x108] sm:$0xff]   ;;  %v5603_v35 = vld [vmem:[%s6370_s27 + $0x110] sm:$0xff]   ;;  %v5605_v43 = vld [vmem:[%s6370_s27 + $0x158] sm:$0xff]  }
 0x54e   : > { %5171 = vmatpush3.bf16.msra.mxu0 %v5571_v12  ;;  %v5600_v55 = vld [vmem:[%s6370_s27 + $0x188] sm:$0xff]   ;;  %v5604_v42 = vld [vmem:[%s6370_s27 + $0x190] sm:$0xff]   ;;  %v5606_v22 = vld [vmem:[%s6370_s27 + $0x1d8] sm:$0xff]  }
 0x54f   : > { %5193 = vmatpush3.bf16.msra.mxu1 %v5572_v5  ;;  %5172 = vmatprep.subr.bf16.mxu0 %v5573_v13  ;;  %v5607_v33 = vld [vmem:[%s6370_s27 + $0x118] sm:$0xff]   ;;  %v5609_v34 = vld [vmem:[%s6370_s27 + $0x160] sm:$0xff]   ;;  %v5613_v27 = vld [vmem:[%s6370_s27 + $0x168] sm:$0xff]  }
 0x550   : > { %5194 = vmatprep.subr.bf16.mxu1 %v5574_v14  ;;  %v5608_v46 = vld [vmem:[%s6370_s27 + $0x198] sm:$0xff]   ;;  %v5610_v28 = vld [vmem:[%s6370_s27 + $0x1e0] sm:$0xff]   ;;  %v5614_v18 = vld [vmem:[%s6370_s27 + $0x1e8] sm:$0xff]  }
 0x551   : > { %v5611_v30 = vld [vmem:[%s6370_s27 + $0x120] sm:$0xff]   ;;  %v5615_v29 = vld [vmem:[%s6370_s27 + $0x128] sm:$0xff]   ;;  %v5617_v57 = vld [vmem:[%s6370_s27 + $0x170] sm:$0xff]  }
 0x552   : > { %5173 = vmatpush3.bf16.msra.mxu0 %v5575_v15  ;;  %v5612_v31 = vld [vmem:[%s6370_s27 + $0x1a0] sm:$0xff]   ;;  %v5616_v2 = vld [vmem:[%s6370_s27 + $0x1a8] sm:$0xff]   ;;  %v5618_v32 = vld [vmem:[%s6370_s27 + $0x1f0] sm:$0xff]  }
 0x553   : > { %5195 = vmatpush3.bf16.msra.mxu1 %v5576_v9  ;;  %5174 = vmatprep.subr.bf16.mxu0 %v5577_v60  ;;  %v5619_v50 = vld [vmem:[%s6370_s27 + $0x130] sm:$0xff]   ;;  %v5621_v48 = vld [vmem:[%s6370_s27 + $0x178] sm:$0xff]  }
 0x554   : > { %5196 = vmatprep.subr.bf16.mxu1 %v5578_v10  ;;  %v5620_v19 = vld [vmem:[%s6370_s27 + $0x1b0] sm:$0xff]   ;;  %v5622_v24 = vld [vmem:[%s6370_s27 + $0x1f8] sm:$0xff]  }
 0x555   : > { %v5623_v58 = vld [vmem:[%s6370_s27 + $0x138] sm:$0xff]   ;;  %v3838_v59 = vld [vmem:[#allocation3 + $0x10] sm:$0xff] }
 0x556   : > { %5175 = vmatpush3.bf16.msra.mxu0 %v5579_v61  ;;  %v5624_v26 = vld [vmem:[%s6370_s27 + $0x1b8] sm:$0xff]   ;;  %v5088_v63 = vcombine.low %v3838_v59, %v3838_v59  ;;  %v5089_v4 = vcombine.high %v3838_v59, %v3838_v59 }
 0x557   : > { %5197 = vmatpush3.bf16.msra.mxu1 %v5580_v16  ;;  %5176 = vmatprep.subr.bf16.mxu0 %v5581_v62  ;;  %v3839_v8 = vld [vmem:[#allocation3 + $0x18] sm:$0xff] }
 0x558   : > { %5198 = vmatprep.subr.bf16.mxu1 %v5582_v23  ;;  %v5090_v6 = vcombine.low %v3839_v8, %v3839_v8  ;;  %v5091_v3 = vcombine.high %v3839_v8, %v3839_v8  ;;  %v5083_v12 = vld [vmem:[%s436_s20] ss:$0 sm:$0xff] }
 0x55a   : > { %5177 = vmatpush3.bf16.msra.mxu0 %v5583_v0 }
 0x55b   : > { %5199 = vmatpush3.bf16.msra.mxu1 %v5584_v49  ;;  %5178 = vmatprep.subr.bf16.mxu0 %v5585_v1 }
 0x55c   : > { %5200 = vmatprep.subr.bf16.mxu1 %v5586_v17 }
 0x55e   : > { %5179 = vmatpush3.bf16.msra.mxu0 %v5587_v20 }
 0x55f   : > { %5201 = vmatpush3.bf16.msra.mxu1 %v5588_v25  ;;  %5208 = vmatprep.subr.bf16.mxu0 %v5593_v45 }
 0x560   : > { %5230 = vmatprep.subr.bf16.mxu1 %v5594_v47 }
 0x561   : > { %4420 = vmatmul.mubr.bf16.vlgmr.msra.gmra.mrb[0].mxu0 %v5084_v40 }
 0x562   : > { %4460 = vmatmul.mubr.bf16.vlgmr.msra.gmra.mrb[0].mxu1 %v5086_v41  ;;  %5209 = vmatpush3.bf16.msra.mxu0 %v5595_v51 }
 0x563   : > { %5231 = vmatpush3.bf16.msra.mxu1 %v5596_v52  ;;  %5210 = vmatprep.subr.bf16.mxu0 %v5597_v53 }
 0x564   : > { %5232 = vmatprep.subr.bf16.mxu1 %v5598_v54  ;;  %4499 = vmatprep.mubr.bf16.mxu0 %v5089_v4 }
 0x565   : > { %4539 = vmatprep.mubr.bf16.mxu1 %v5091_v3 }
 0x566   : > { %5211 = vmatpush3.bf16.msra.mxu0 %v5599_v36 }
 0x567   : > { %5233 = vmatpush3.bf16.msra.mxu1 %v5600_v55  ;;  %5212 = vmatprep.subr.bf16.mxu0 %v5601_v56 }
 0x568   : > { %5234 = vmatprep.subr.bf16.mxu1 %v5602_v38 }
 0x56a   : > { %5213 = vmatpush3.bf16.msra.mxu0 %v5603_v35 }
 0x56b   : > { %5235 = vmatpush3.bf16.msra.mxu1 %v5604_v42  ;;  %5214 = vmatprep.subr.bf16.mxu0 %v5605_v43 }
 0x56c   : > { %5236 = vmatprep.subr.bf16.mxu1 %v5606_v22 }
 0x56e   : > { %5215 = vmatpush3.bf16.msra.mxu0 %v5607_v33 }
 0x56f   : > { %5237 = vmatpush3.bf16.msra.mxu1 %v5608_v46  ;;  %5216 = vmatprep.subr.bf16.mxu0 %v5609_v34 }
 0x570   : > { %5238 = vmatprep.subr.bf16.mxu1 %v5610_v28 }
 0x572   : > { %5217 = vmatpush3.bf16.msra.mxu0 %v5611_v30 }
 0x573   : > { %5239 = vmatpush3.bf16.msra.mxu1 %v5612_v31  ;;  %5218 = vmatprep.subr.bf16.mxu0 %v5613_v27 }
 0x574   : > { %5240 = vmatprep.subr.bf16.mxu1 %v5614_v18 }
 0x576   : > { %5219 = vmatpush3.bf16.msra.mxu0 %v5615_v29 }
 0x577   : > { %5241 = vmatpush3.bf16.msra.mxu1 %v5616_v2  ;;  %5220 = vmatprep.subr.bf16.mxu0 %v5617_v57 }
 0x578   : > { %5242 = vmatprep.subr.bf16.mxu1 %v5618_v32 }
 0x57a   : > { %5221 = vmatpush3.bf16.msra.mxu0 %v5619_v50 }
 0x57b   : > { %5243 = vmatpush3.bf16.msra.mxu1 %v5620_v19  ;;  %5222 = vmatprep.subr.bf16.mxu0 %v5621_v48 }
 0x57c   : > { %5244 = vmatprep.subr.bf16.mxu1 %v5622_v24 }
 0x57e   : > { %5223 = vmatpush3.bf16.msra.mxu0 %v5623_v58 }
 0x57f   : > { %5245 = vmatpush3.bf16.msra.mxu1 %v5624_v26 }
 0x581   : > { %4500 = vmatmul.mubr.bf16.vlgmr.msra.gmra.mrb[4].mxu0 %v5088_v63 }
 0x582   : > { %4540 = vmatmul.mubr.bf16.vlgmr.msra.gmra.mrb[4].mxu1 %v5090_v6 }
 0x634   : > { %v5180_v7 = vpop.f32.mrb[0].mxu0 }
 0x635   : > { %v5202_v11 = vpop.f32.mrb[0].mxu1  ;;  %v5181_v5 = vpop.f32.mrb[1].mxu0 }
 0x636   : > { %v5203_v13 = vpop.f32.mrb[1].mxu1  ;;  %v5182_v14 = vadd.f32 %v5181_v5, %v5180_v7  ;;  %v5183_v9 = vpop.f32.mrb[2].mxu0 }
 0x637   : > { %v5204_v15 = vadd.f32 %v5203_v13, %v5202_v11  ;;  %v5205_v60 = vpop.f32.mrb[2].mxu1  ;;  %v5184_v10 = vpop.f32.mrb[3].mxu0 }
 0x638   : > { %v5206_v61 = vpop.f32.mrb[3].mxu1  ;;  %v4422_v16 = vadd.f32 %v5182_v14, %v5083_v12 }
 0x63a   : > { %v4462_v62 = vadd.f32 %v5204_v15, %v4422_v16 }
 0x654   : > { %v5224_v23 = vpop.f32.mrb[4].mxu0 }
 0x655   : > { %v5246_v0 = vpop.f32.mrb[4].mxu1  ;;  %v5225_v49 = vpop.f32.mrb[5].mxu0 }
 0x656   : > { %v5247_v1 = vpop.f32.mrb[5].mxu1  ;;  %v5226_v17 = vadd.f32 %v5225_v49, %v5224_v23  ;;  %v5227_v25 = vpop.f32.mrb[6].mxu0 }
 0x657   : > { %v5248_v20 = vadd.f32 %v5247_v1, %v5246_v0  ;;  %v5249_v37 = vpop.f32.mrb[6].mxu1  ;;  %v5228_v39 = vpop.f32.mrb[7].mxu0 }
 0x658   : > { %v5250_v40 = vpop.f32.mrb[7].mxu1  ;;  %v4502_v21 = vadd.f32 %v5226_v17, %v4462_v62 }
 0x65a   : > { %v4542_v41 = vadd.f32 %v5248_v20, %v4502_v21 }
 0x65c   : > { %5629 = vtanh.f32 %v4542_v41 }
 0x666   : > { %v5630_v44 = vpop.eup %5629 }
 0x667   : > { %4548 = vst [vmem:[%s6378_s25] sm:$0xff] %v5630_v44 }
 0x668   : > { %5900 = shalt.err (!%p5897_p0)
}
 0x669   : > { %s5901_s24 = scalar_lea.hbm %s6755_s23, 128  ;;  %s5905_s16 = scalar_lea.hbm %s6861_s13, 896 }
 0x66a   : > { %p5902_p2 = scmp.ne.s32.totalorder %s6755_s23, %s5901_s24  ;;  %p5906_p5 = scmp.lt.u32.totalorder %s6755_s23, %s6861_s13 }
 0x66b   : > { %p5907_p8 = scmp.lt.u32.totalorder %s5905_s16, %s5901_s24  ;;  %p5909_p11 = scmp.lt.u32.totalorder %s5901_s24, %s6755_s23 }
 0x66c   : > { %p5903_p7 = pnand %p5902_p2, %p6862_p1 }
 0x66d   : > { %p5908_p10 = por %p5907_p8, %p5906_p5 }
 0x66e   : > { %p5904_p9 = pneg %p5903_p7 }
 0x66f   : > { %p5910_p13 = por %p5909_p11, %p5908_p10 }
 0x671   : > { %p5911_p6 = pnand %p5910_p13, %p5904_p9 }
 0x673   : > { %5914 = shalt.err (!%p5911_p6)
}
 0x674   : > { %5308 = dma.vmem_to_hbm [thread:$0]  (%p6862_p1), %s6757_s19, 128, %s6755_s23, %s4550_s30  }
 0x675 PF: > { %s6863_s7 = sld [smem:[#allocation26_spill]]  ;;  %s6864_s27 = sld [smem:[#allocation29_spill]] }
 0x676   : > { %p5358_p3 = scmp.ge.s32.totalorder %s5969_s12, 2 }
 0x67b   : > { %s4575_s29 = sand.u32 1, %s6863_s7   ;;  %p6865_p4 = scmp.ne.s32.totalorder %s6864_s27, 0 }
 0x67c   : > { %s4576_s20 = scalar_lea.sflag [#allocation6], %s4575_s29 }
 0x67d   : > { %p5340_p12 = pnand %p5358_p3, %p6865_p4 }
 0x67f   : > { %5952 = dma.done.wait (!%p5340_p12), %s4576_s20, 128  }
 0x680   : > { %5954 = vsyncadd (!%p5340_p12), %s4576_s20, 4294967168  ;;  %s6866_s12 = sld [smem:[#allocation27_spill]]  ;;  %s6867_s25 = sld [smem:[#allocation28_spill]] }
 0x681   : > { %s6868_s30 = smov %s5961_s10  ;;  %s6869_s10 = smov %s5965_s11 }
 0x686   : > { %p26_p0 = scmp.ge.s32.totalorder %s6866_s12, 9   ;;  %s6870_s11 = smov %s6867_s25 }
 0x688   :  { %28 = sbr.rel (!%p26_p0) target bundleno = 15 (0xf), region = 145 }
 0x68f   :  { %4581 = vsyncpa [#allocation5], 1 }
 0x690   :  { %4583 = vsyncpa [#allocation5 + $0x1], 1 }
 0x691   :  { %4584 = vsyncpa [#allocation8], 1 }
 0x692   :  { %4585 = vsyncpa [#allocation11], 1 }
 0x693   :  { %4586 = vsyncpa [#allocation14], 1 }
 0x694   :  { %4587 = vsyncpa [#allocation17], 1 }
 0x695   :  { %4589 = vsyncpa [#allocation17 + $0x1], 1 }
 0x696   :  { %4590 = vsyncpa [#allocation6], 1 }
 0x697   :  { %4592 = vsyncpa [#allocation6 + $0x1], 1 }

</bundles_post_ra>
